<compile_context>
chip_gen: v7x
topology: tpu7x:2x2x1
jax: 0.10.0
libtpu: 0.0.40
codegen_flags: <defaults>
</compile_context>

<pallas_src>
import functools

import jax
import jax.numpy as jnp
from jax.experimental import pallas as pl
from jax.experimental.pallas import tpu as pltpu

# ---- model hyper-parameters (from the PyTorch module) ----
MODEL_DIM = 64
BLOCK_SIZE = 32
N_HEAD = 2
N_LAYER = 4
HEAD_SIZE = MODEL_DIM // N_HEAD
LN_EPS = 1e-5


def _layernorm(v, g, b):
    mu = jnp.mean(v, axis=-1, keepdims=True)
    var = jnp.mean((v - mu) ** 2, axis=-1, keepdims=True)
    return (v - mu) * jax.lax.rsqrt(var + LN_EPS) * g + b


# ---------------------------------------------------------------------------
# Single fused kernel: embedding gather + all encoder blocks + final LN + pool.
# ---------------------------------------------------------------------------
def fused_encoder_kernel(idx_ref,                       # scalar prefetch (SMEM)
                         tok_ref, bias_ref,
                         wqkv_ref, wproj_ref, w1_ref, b1_ref, w2_ref,
                         vec_ref, lnf_ref,
                         pooled_ref, attw_ref,
                         xinit_ref,                     # VMEM scratch (B*T, C)
                         *, batch, seq):
    C = MODEL_DIM
    hs = HEAD_SIZE
    H = N_HEAD
    B, T = batch, seq
    BT = B * T
    scale = hs ** (-0.5)

    # --- fused token-embedding gather: dynamic leading-dim loads from (V,1,C) ---
    for i in range(BT):                                   # static unroll, BT = 16
        xinit_ref[pl.ds(i, 1), :] = tok_ref[idx_ref[i]]   # (1, C) row
    x = xinit_ref[...]                                    # (BT, C) f32, stays in VMEM

    for l in range(N_LAYER):                              # static unroll over layers
        vecl = vec_ref[l]                # (6, C): [ln1_g, ln1_b, ln2_g, ln2_b, bproj, b2]
        ln1g, ln1b = vecl[0:1, :], vecl[1:2, :]
        ln2g, ln2b = vecl[2:3, :], vecl[3:4, :]
        bproj, b2 = vecl[4:5, :], vecl[5:6, :]

        # --- LayerNorm 1 -> packed Q/K/V projection (one bf16 matmul, N=192) ---
        content = _layernorm(x, ln1g, ln1b)                                   # (BT, C) f32
        qkv = jnp.dot(content.astype(jnp.bfloat16), wqkv_ref[l],
                      preferred_element_type=jnp.float32)                     # (BT, 3C)
        qkv3 = qkv.reshape(B, T, 3 * C)                                       # leading split

        # stack heads on the leading (batch) dim: rows [h*B + b]
        def head_stack(base):
            return jnp.concatenate(
                [qkv3[:, :, base + h * hs: base + (h + 1) * hs] for h in range(H)],
                axis=0)                                                        # (H*B, T, hs)

        qh = head_stack(0)
        kh = head_stack(C)
        vh = head_stack(2 * C)

        # content-content scores for all heads/batches in one batched dot_general
        cc = jax.lax.dot_general(
            qh, kh, (((2,), (2,)), ((0,), (0,))),
            preferred_element_type=jnp.float32)                               # (H*B, T, T)

        # precomputed, pre-scaled position-position bias (parameter-only)
        logits = cc * scale + bias_ref[l]                                     # (H*B, T, T)
        logits = logits - jnp.max(logits, axis=-1, keepdims=True)
        e = jnp.exp(logits)
        att = e * pl.reciprocal(jnp.sum(e, axis=-1, keepdims=True), approx=True)

        attw_ref[l] = att                 # attention weights out (static layer index)

        ho = jax.lax.dot_general(
            att, vh, (((2,), (1,)), ((0,), (0,))),
            preferred_element_type=jnp.float32)                               # (H*B, T, hs)

        # recombine head outputs along lanes -> one K=64 output projection
        out3 = jnp.concatenate([ho[h * B:(h + 1) * B] for h in range(H)], axis=-1)
        attn_proj = jnp.dot(out3.reshape(BT, C).astype(jnp.bfloat16), wproj_ref[l],
                            preferred_element_type=jnp.float32)               # (BT, C)

        # dropout is identity (eval semantics)
        x = x + attn_proj + bproj

        # --- LayerNorm 2 -> FFN -> residual ---
        h2 = _layernorm(x, ln2g, ln2b)
        ff = jnp.maximum(
            jnp.dot(h2.astype(jnp.bfloat16), w1_ref[l],
                    preferred_element_type=jnp.float32) + b1_ref[l], 0.0)
        ff = jnp.dot(ff.astype(jnp.bfloat16), w2_ref[l],
                     preferred_element_type=jnp.float32) + b2
        x = x + ff

    # --- final LayerNorm + mean-pool over the sequence axis ---
    xn = _layernorm(x, lnf_ref[0:1, :], lnf_ref[1:2, :])
    pooled_ref[...] = jnp.mean(xn.reshape(B, T, C), axis=1)


def fused_forward(idx_flat, tok3, bias_rep, params, *, batch, seq):
    B, T = batch, seq
    C = MODEL_DIM

    tensor_inputs = [tok3, bias_rep,
                     params["wqkv"], params["wproj"],
                     params["w1"], params["b1"], params["w2"],
                     params["vec"], params["lnf"]]

    def full_spec(a):
        n = a.ndim
        return pl.BlockSpec(a.shape, lambda i, idx_ref, _n=n: (0,) * _n)

    out_shapes = (
        jax.ShapeDtypeStruct((B, C), jnp.float32),
        jax.ShapeDtypeStruct((N_LAYER, N_HEAD * B, T, T), jnp.float32),
    )
    out_specs = (
        pl.BlockSpec((B, C), lambda i, idx_ref: (0, 0)),
        pl.BlockSpec((N_LAYER, N_HEAD * B, T, T), lambda i, idx_ref: (0, 0, 0, 0)),
    )

    grid_spec = pltpu.PrefetchScalarGridSpec(
        num_scalar_prefetch=1,
        grid=(1,),
        in_specs=[full_spec(a) for a in tensor_inputs],
        out_specs=out_specs,
        scratch_shapes=[pltpu.VMEM((B * T, C), jnp.float32)],
    )

    kernel = functools.partial(fused_encoder_kernel, batch=B, seq=T)
    pooled, attw = pl.pallas_call(
        kernel,
        grid_spec=grid_spec,
        out_shape=out_shapes,
        compiler_params=pltpu.CompilerParams(dimension_semantics=("arbitrary",)),
    )(idx_flat, *tensor_inputs)

    return pooled, attw.reshape(N_LAYER, N_HEAD, B, T, T)


# ---------------------------------------------------------------------------
# Parameter construction (matches PyTorch __init__ shapes; Linear/Embedding
# weights ~ N(0, 0.02), biases = 0, LayerNorm weight = 1, bias = 0).
# Large matmul weights are stored in bf16; wqp/wkp stay f32 (only used for the
# parameter-only position-bias precompute, which never enters the kernel).
# ---------------------------------------------------------------------------
def init_params(key, vocab_size):
    C = MODEL_DIM
    ks = jax.random.split(key, 10)
    norm = lambda k, shape: jax.random.normal(k, shape, jnp.float32) * 0.02
    bf16 = lambda a: a.astype(jnp.bfloat16)

    vec_one = jnp.stack([jnp.ones((C,), jnp.float32),
                         jnp.zeros((C,), jnp.float32),
                         jnp.ones((C,), jnp.float32),
                         jnp.zeros((C,), jnp.float32),
                         jnp.zeros((C,), jnp.float32),
                         jnp.zeros((C,), jnp.float32)], axis=0)          # (6, C)

    params = {
        "tok_emb": norm(ks[0], (vocab_size, C)),
        "pos_emb": norm(ks[1], (BLOCK_SIZE, C)),
        "wqkv": bf16(norm(ks[2], (N_LAYER, C, 3 * C))),                  # [Q | K | V]
        "wqp": norm(ks[3], (N_LAYER, C, C)),
        "wkp": norm(ks[4], (N_LAYER, C, C)),
        "wproj": bf16(norm(ks[5], (N_LAYER, C, C))),
        "w1": bf16(norm(ks[6], (N_LAYER, C, 4 * C))),
        "b1": jnp.zeros((N_LAYER, 1, 4 * C), jnp.float32),
        "w2": bf16(norm(ks[7], (N_LAYER, 4 * C, C))),
        "vec": jnp.tile(vec_one[None], (N_LAYER, 1, 1)),                 # (N_LAYER, 6, C)
        "lnf": jnp.stack([jnp.ones((C,), jnp.float32),
                          jnp.zeros((C,), jnp.float32)], axis=0),        # (2, C)
    }
    params["pos_bias"] = precompute_pos_bias(params)                     # (L, H, S, S)
    return params


def precompute_pos_bias(params):
    """Parameter-only, pre-scaled position-position attention bias (hoisted)."""
    pos = params["pos_emb"]                                    # (BLOCK_SIZE, C)
    hs = HEAD_SIZE
    scale = hs ** (-0.5)
    layers = []
    for l in range(N_LAYER):
        qp = pos @ params["wqp"][l]
        kp = pos @ params["wkp"][l]
        heads = []
        for h in range(N_HEAD):
            sl = slice(h * hs, (h + 1) * hs)
            heads.append((qp[:, sl] @ kp[:, sl].T) * scale)
        layers.append(jnp.stack(heads))
    return jnp.stack(layers)                                   # (L, H, BLOCK, BLOCK)


# ---------------------------------------------------------------------------
# Full model forward (jitted glue: bias slice/replicate + one fused kernel).
# ---------------------------------------------------------------------------
@jax.jit
def model_forward(idx, params):
    B, T = idx.shape
    L, H = N_LAYER, N_HEAD
    idx_flat = idx.reshape(B * T).astype(jnp.int32)
    tok3 = params["tok_emb"][:, None, :]                       # (V, 1, C)
    bias = params["pos_bias"][:, :, :T, :T]                    # (L, H, T, T), pre-scaled
    bias_rep = jnp.broadcast_to(bias[:, :, None], (L, H, B, T, T)).reshape(L, H * B, T, T)
    pooled, attw = fused_forward(idx_flat, tok3, bias_rep, params, batch=B, seq=T)
    attention_maps = [attw[l] for l in range(L)]               # each (N_HEAD, B, T, T)
    return pooled, attention_maps


# ---------------------------------------------------------------------------
# Pure-JAX reference (mirrors the kernel's bf16 weight / activation rounding).
# ---------------------------------------------------------------------------
def reference_forward(idx, params):
    C = MODEL_DIM
    hs = HEAD_SIZE
    f32 = jnp.float32
    x = jnp.take(params["tok_emb"], idx, axis=0)
    T = idx.shape[1]
    pos = params["pos_emb"][:T]
    maps = []
    for l in range(N_LAYER):
        vec = params["vec"][l]
        ln1g, ln1b, ln2g, ln2b, bproj, b2 = (vec[i] for i in range(6))
        content = _layernorm(x, ln1g, ln1b)
        qkv = jnp.dot(content.astype(jnp.bfloat16), params["wqkv"][l],
                      preferred_element_type=f32)
        qc, kc, vv = qkv[..., :C], qkv[..., C:2 * C], qkv[..., 2 * C:]
        qp = pos @ params["wqp"][l]
        kp = pos @ params["wkp"][l]
        heads, weights = [], []
        for h in range(N_HEAD):
            sl = slice(h * hs, (h + 1) * hs)
            cc = jnp.einsum('btd,bsd->bts', qc[:, :, sl], kc[:, :, sl]) * hs ** (-0.5)
            pp = (qp[:, sl] @ kp[:, sl].T) * hs ** (-0.5)
            att = jax.nn.softmax(cc + pp[None], axis=-1)
            weights.append(att)
            heads.append(jnp.einsum('bts,bsd->btd', att, vv[:, :, sl]))
        out = jnp.dot(jnp.concatenate(heads, axis=-1).astype(jnp.bfloat16),
                      params["wproj"][l], preferred_element_type=f32) + bproj
        x = x + out
        h2 = _layernorm(x, ln2g, ln2b)
        ff = jnp.maximum(jnp.dot(h2.astype(jnp.bfloat16), params["w1"][l],
                                 preferred_element_type=f32) + params["b1"][l], 0.0)
        ff = jnp.dot(ff.astype(jnp.bfloat16), params["w2"][l],
                     preferred_element_type=f32) + b2
        x = x + ff
        maps.append(jnp.stack(weights))                        # (N_HEAD, B, T, T)
    xn = _layernorm(x, params["lnf"][0], params["lnf"][1])
    return jnp.mean(xn, axis=1), maps


if __name__ == "__main__":
    key = jax.random.PRNGKey(0)
    k_param, k_idx = jax.random.split(key)

    VOCAB = 50
    B, T = 2, 8  # T <= block_size (32)

    params = init_params(k_param, VOCAB)
    idx = jax.random.randint(k_idx, (B, T), 0, VOCAB, dtype=jnp.int32)

    pooled, attention_maps = model_forward(idx, params)
    pooled = jax.block_until_ready(pooled)
    attention_maps = [jax.block_until_ready(a) for a in attention_maps]

    assert pooled.shape == (B, MODEL_DIM)
    assert len(attention_maps) == N_LAYER
    assert all(a.shape == (N_HEAD, B, T, T) for a in attention_maps)
    # softmax rows sum to 1 (approx reciprocal in kernel -> loose tolerance)
    assert jnp.allclose(jnp.sum(attention_maps[0], axis=-1), 1.0, atol=5e-3)

    # cross-check against a pure-JAX reference with identical bf16 weight rounding
    ref_pooled, ref_maps = reference_forward(idx, params)
    assert jnp.allclose(pooled, ref_pooled, atol=5e-3, rtol=1e-2)
    assert all(jnp.allclose(a, r, atol=5e-3, rtol=1e-2)
               for a, r in zip(attention_maps, ref_maps))

    print("KERNEL_OK")
</pallas_src>

<mosaic_0001>
module attributes {stable_mosaic.version = 11 : i64} {
  func.func @fused_encoder_kernel(%arg0: i32, %arg1: memref<16xi32, #tpu.memory_space<smem>>, %arg2: memref<50x1x64xf32, #tpu.memory_space<vmem>>, %arg3: memref<4x4x8x8xf32, #tpu.memory_space<vmem>>, %arg4: memref<4x64x192xbf16, #tpu.memory_space<vmem>>, %arg5: memref<4x64x64xbf16, #tpu.memory_space<vmem>>, %arg6: memref<4x64x256xbf16, #tpu.memory_space<vmem>>, %arg7: memref<4x1x256xf32, #tpu.memory_space<vmem>>, %arg8: memref<4x256x64xbf16, #tpu.memory_space<vmem>>, %arg9: memref<4x6x64xf32, #tpu.memory_space<vmem>>, %arg10: memref<2x64xf32, #tpu.memory_space<vmem>>, %arg11: memref<2x64xf32, #tpu.memory_space<vmem>>, %arg12: memref<4x4x8x8xf32, #tpu.memory_space<vmem>>, %arg13: memref<16x64xf32, #tpu.memory_space<vmem>>) attributes {dimension_semantics = [#tpu.dimension_semantics<arbitrary>], iteration_bounds = array<i64: 1>, scalar_prefetch = 1 : i64, scratch_operands = 1 : i64, tpu.core_type = #tpu.core_type<tc>, window_params = [{pipeline_mode = #tpu.pipeline_mode<synchronous>, transform_indices = @transform_0, window_bounds = array<i64: 50, 1, 64>}, {pipeline_mode = #tpu.pipeline_mode<synchronous>, transform_indices = @transform_1, window_bounds = array<i64: 4, 4, 8, 8>}, {pipeline_mode = #tpu.pipeline_mode<synchronous>, transform_indices = @transform_2, window_bounds = array<i64: 4, 64, 192>}, {pipeline_mode = #tpu.pipeline_mode<synchronous>, transform_indices = @transform_3, window_bounds = array<i64: 4, 64, 64>}, {pipeline_mode = #tpu.pipeline_mode<synchronous>, transform_indices = @transform_4, window_bounds = array<i64: 4, 64, 256>}, {pipeline_mode = #tpu.pipeline_mode<synchronous>, transform_indices = @transform_5, window_bounds = array<i64: 4, 1, 256>}, {pipeline_mode = #tpu.pipeline_mode<synchronous>, transform_indices = @transform_6, window_bounds = array<i64: 4, 256, 64>}, {pipeline_mode = #tpu.pipeline_mode<synchronous>, transform_indices = @transform_7, window_bounds = array<i64: 4, 6, 64>}, {pipeline_mode = #tpu.pipeline_mode<synchronous>, transform_indices = @transform_8, window_bounds = array<i64: 2, 64>}, {pipeline_mode = #tpu.pipeline_mode<synchronous>, transform_indices = @transform_9, window_bounds = array<i64: 2, 64>}, {pipeline_mode = #tpu.pipeline_mode<synchronous>, transform_indices = @transform_10, window_bounds = array<i64: 4, 4, 8, 8>}]} {
    %c0 = arith.constant 0 : index
    %0 = memref.load %arg1[%c0] : memref<16xi32, #tpu.memory_space<smem>>
    %1 = arith.index_cast %0 : i32 to index
    %c0_0 = arith.constant 0 : index
    %c0_1 = arith.constant 0 : index
    %2 = vector.load %arg2[%1, %c0_0, %c0_1] : memref<50x1x64xf32, #tpu.memory_space<vmem>>, vector<1x1x64xf32>
    %3 = vector.shape_cast %2 : vector<1x1x64xf32> to vector<1x64xf32>
    %c0_2 = arith.constant 0 : index
    %c0_3 = arith.constant 0 : index
    %4 = vector.load %arg13[%c0_2, %c0_3] : memref<16x64xf32, #tpu.memory_space<vmem>>, vector<1x64xf32>
    tpu.vector_store %arg13[%c0_2, %c0_3], %3 {strides = array<i32>} : memref<16x64xf32, #tpu.memory_space<vmem>>, vector<1x64xf32>,
    %c1 = arith.constant 1 : index
    %5 = memref.load %arg1[%c1] : memref<16xi32, #tpu.memory_space<smem>>
    %6 = arith.index_cast %5 : i32 to index
    %c0_4 = arith.constant 0 : index
    %c0_5 = arith.constant 0 : index
    %7 = vector.load %arg2[%6, %c0_4, %c0_5] : memref<50x1x64xf32, #tpu.memory_space<vmem>>, vector<1x1x64xf32>
    %8 = vector.shape_cast %7 : vector<1x1x64xf32> to vector<1x64xf32>
    %c1_6 = arith.constant 1 : index
    %c0_7 = arith.constant 0 : index
    %9 = vector.load %arg13[%c1_6, %c0_7] : memref<16x64xf32, #tpu.memory_space<vmem>>, vector<1x64xf32>
    tpu.vector_store %arg13[%c1_6, %c0_7], %8 {strides = array<i32>} : memref<16x64xf32, #tpu.memory_space<vmem>>, vector<1x64xf32>,
    %c2 = arith.constant 2 : index
    %10 = memref.load %arg1[%c2] : memref<16xi32, #tpu.memory_space<smem>>
    %11 = arith.index_cast %10 : i32 to index
    %c0_8 = arith.constant 0 : index
    %c0_9 = arith.constant 0 : index
    %12 = vector.load %arg2[%11, %c0_8, %c0_9] : memref<50x1x64xf32, #tpu.memory_space<vmem>>, vector<1x1x64xf32>
    %13 = vector.shape_cast %12 : vector<1x1x64xf32> to vector<1x64xf32>
    %c2_10 = arith.constant 2 : index
    %c0_11 = arith.constant 0 : index
    %14 = vector.load %arg13[%c2_10, %c0_11] : memref<16x64xf32, #tpu.memory_space<vmem>>, vector<1x64xf32>
    tpu.vector_store %arg13[%c2_10, %c0_11], %13 {strides = array<i32>} : memref<16x64xf32, #tpu.memory_space<vmem>>, vector<1x64xf32>,
    %c3 = arith.constant 3 : index
    %15 = memref.load %arg1[%c3] : memref<16xi32, #tpu.memory_space<smem>>
    %16 = arith.index_cast %15 : i32 to index
    %c0_12 = arith.constant 0 : index
    %c0_13 = arith.constant 0 : index
    %17 = vector.load %arg2[%16, %c0_12, %c0_13] : memref<50x1x64xf32, #tpu.memory_space<vmem>>, vector<1x1x64xf32>
    %18 = vector.shape_cast %17 : vector<1x1x64xf32> to vector<1x64xf32>
    %c3_14 = arith.constant 3 : index
    %c0_15 = arith.constant 0 : index
    %19 = vector.load %arg13[%c3_14, %c0_15] : memref<16x64xf32, #tpu.memory_space<vmem>>, vector<1x64xf32>
    tpu.vector_store %arg13[%c3_14, %c0_15], %18 {strides = array<i32>} : memref<16x64xf32, #tpu.memory_space<vmem>>, vector<1x64xf32>,
    %c4 = arith.constant 4 : index
    %20 = memref.load %arg1[%c4] : memref<16xi32, #tpu.memory_space<smem>>
    %21 = arith.index_cast %20 : i32 to index
    %c0_16 = arith.constant 0 : index
    %c0_17 = arith.constant 0 : index
    %22 = vector.load %arg2[%21, %c0_16, %c0_17] : memref<50x1x64xf32, #tpu.memory_space<vmem>>, vector<1x1x64xf32>
    %23 = vector.shape_cast %22 : vector<1x1x64xf32> to vector<1x64xf32>
    %c4_18 = arith.constant 4 : index
    %c0_19 = arith.constant 0 : index
    %24 = vector.load %arg13[%c4_18, %c0_19] : memref<16x64xf32, #tpu.memory_space<vmem>>, vector<1x64xf32>
    tpu.vector_store %arg13[%c4_18, %c0_19], %23 {strides = array<i32>} : memref<16x64xf32, #tpu.memory_space<vmem>>, vector<1x64xf32>,
    %c5 = arith.constant 5 : index
    %25 = memref.load %arg1[%c5] : memref<16xi32, #tpu.memory_space<smem>>
    %26 = arith.index_cast %25 : i32 to index
    %c0_20 = arith.constant 0 : index
    %c0_21 = arith.constant 0 : index
    %27 = vector.load %arg2[%26, %c0_20, %c0_21] : memref<50x1x64xf32, #tpu.memory_space<vmem>>, vector<1x1x64xf32>
    %28 = vector.shape_cast %27 : vector<1x1x64xf32> to vector<1x64xf32>
    %c5_22 = arith.constant 5 : index
    %c0_23 = arith.constant 0 : index
    %29 = vector.load %arg13[%c5_22, %c0_23] : memref<16x64xf32, #tpu.memory_space<vmem>>, vector<1x64xf32>
    tpu.vector_store %arg13[%c5_22, %c0_23], %28 {strides = array<i32>} : memref<16x64xf32, #tpu.memory_space<vmem>>, vector<1x64xf32>,
    %c6 = arith.constant 6 : index
    %30 = memref.load %arg1[%c6] : memref<16xi32, #tpu.memory_space<smem>>
    %31 = arith.index_cast %30 : i32 to index
    %c0_24 = arith.constant 0 : index
    %c0_25 = arith.constant 0 : index
    %32 = vector.load %arg2[%31, %c0_24, %c0_25] : memref<50x1x64xf32, #tpu.memory_space<vmem>>, vector<1x1x64xf32>
    %33 = vector.shape_cast %32 : vector<1x1x64xf32> to vector<1x64xf32>
    %c6_26 = arith.constant 6 : index
    %c0_27 = arith.constant 0 : index
    %34 = vector.load %arg13[%c6_26, %c0_27] : memref<16x64xf32, #tpu.memory_space<vmem>>, vector<1x64xf32>
    tpu.vector_store %arg13[%c6_26, %c0_27], %33 {strides = array<i32>} : memref<16x64xf32, #tpu.memory_space<vmem>>, vector<1x64xf32>,
    %c7 = arith.constant 7 : index
    %35 = memref.load %arg1[%c7] : memref<16xi32, #tpu.memory_space<smem>>
    %36 = arith.index_cast %35 : i32 to index
    %c0_28 = arith.constant 0 : index
    %c0_29 = arith.constant 0 : index
    %37 = vector.load %arg2[%36, %c0_28, %c0_29] : memref<50x1x64xf32, #tpu.memory_space<vmem>>, vector<1x1x64xf32>
    %38 = vector.shape_cast %37 : vector<1x1x64xf32> to vector<1x64xf32>
    %c7_30 = arith.constant 7 : index
    %c0_31 = arith.constant 0 : index
    %39 = vector.load %arg13[%c7_30, %c0_31] : memref<16x64xf32, #tpu.memory_space<vmem>>, vector<1x64xf32>
    tpu.vector_store %arg13[%c7_30, %c0_31], %38 {strides = array<i32>} : memref<16x64xf32, #tpu.memory_space<vmem>>, vector<1x64xf32>,
    %c8 = arith.constant 8 : index
    %40 = memref.load %arg1[%c8] : memref<16xi32, #tpu.memory_space<smem>>
    %41 = arith.index_cast %40 : i32 to index
    %c0_32 = arith.constant 0 : index
    %c0_33 = arith.constant 0 : index
    %42 = vector.load %arg2[%41, %c0_32, %c0_33] : memref<50x1x64xf32, #tpu.memory_space<vmem>>, vector<1x1x64xf32>
    %43 = vector.shape_cast %42 : vector<1x1x64xf32> to vector<1x64xf32>
    %c8_34 = arith.constant 8 : index
    %c0_35 = arith.constant 0 : index
    %44 = vector.load %arg13[%c8_34, %c0_35] : memref<16x64xf32, #tpu.memory_space<vmem>>, vector<1x64xf32>
    tpu.vector_store %arg13[%c8_34, %c0_35], %43 {strides = array<i32>} : memref<16x64xf32, #tpu.memory_space<vmem>>, vector<1x64xf32>,
    %c9 = arith.constant 9 : index
    %45 = memref.load %arg1[%c9] : memref<16xi32, #tpu.memory_space<smem>>
    %46 = arith.index_cast %45 : i32 to index
    %c0_36 = arith.constant 0 : index
    %c0_37 = arith.constant 0 : index
    %47 = vector.load %arg2[%46, %c0_36, %c0_37] : memref<50x1x64xf32, #tpu.memory_space<vmem>>, vector<1x1x64xf32>
    %48 = vector.shape_cast %47 : vector<1x1x64xf32> to vector<1x64xf32>
    %c9_38 = arith.constant 9 : index
    %c0_39 = arith.constant 0 : index
    %49 = vector.load %arg13[%c9_38, %c0_39] : memref<16x64xf32, #tpu.memory_space<vmem>>, vector<1x64xf32>
    tpu.vector_store %arg13[%c9_38, %c0_39], %48 {strides = array<i32>} : memref<16x64xf32, #tpu.memory_space<vmem>>, vector<1x64xf32>,
    %c10 = arith.constant 10 : index
    %50 = memref.load %arg1[%c10] : memref<16xi32, #tpu.memory_space<smem>>
    %51 = arith.index_cast %50 : i32 to index
    %c0_40 = arith.constant 0 : index
    %c0_41 = arith.constant 0 : index
    %52 = vector.load %arg2[%51, %c0_40, %c0_41] : memref<50x1x64xf32, #tpu.memory_space<vmem>>, vector<1x1x64xf32>
    %53 = vector.shape_cast %52 : vector<1x1x64xf32> to vector<1x64xf32>
    %c10_42 = arith.constant 10 : index
    %c0_43 = arith.constant 0 : index
    %54 = vector.load %arg13[%c10_42, %c0_43] : memref<16x64xf32, #tpu.memory_space<vmem>>, vector<1x64xf32>
    tpu.vector_store %arg13[%c10_42, %c0_43], %53 {strides = array<i32>} : memref<16x64xf32, #tpu.memory_space<vmem>>, vector<1x64xf32>,
    %c11 = arith.constant 11 : index
    %55 = memref.load %arg1[%c11] : memref<16xi32, #tpu.memory_space<smem>>
    %56 = arith.index_cast %55 : i32 to index
    %c0_44 = arith.constant 0 : index
    %c0_45 = arith.constant 0 : index
    %57 = vector.load %arg2[%56, %c0_44, %c0_45] : memref<50x1x64xf32, #tpu.memory_space<vmem>>, vector<1x1x64xf32>
    %58 = vector.shape_cast %57 : vector<1x1x64xf32> to vector<1x64xf32>
    %c11_46 = arith.constant 11 : index
    %c0_47 = arith.constant 0 : index
    %59 = vector.load %arg13[%c11_46, %c0_47] : memref<16x64xf32, #tpu.memory_space<vmem>>, vector<1x64xf32>
    tpu.vector_store %arg13[%c11_46, %c0_47], %58 {strides = array<i32>} : memref<16x64xf32, #tpu.memory_space<vmem>>, vector<1x64xf32>,
    %c12 = arith.constant 12 : index
    %60 = memref.load %arg1[%c12] : memref<16xi32, #tpu.memory_space<smem>>
    %61 = arith.index_cast %60 : i32 to index
    %c0_48 = arith.constant 0 : index
    %c0_49 = arith.constant 0 : index
    %62 = vector.load %arg2[%61, %c0_48, %c0_49] : memref<50x1x64xf32, #tpu.memory_space<vmem>>, vector<1x1x64xf32>
    %63 = vector.shape_cast %62 : vector<1x1x64xf32> to vector<1x64xf32>
    %c12_50 = arith.constant 12 : index
    %c0_51 = arith.constant 0 : index
    %64 = vector.load %arg13[%c12_50, %c0_51] : memref<16x64xf32, #tpu.memory_space<vmem>>, vector<1x64xf32>
    tpu.vector_store %arg13[%c12_50, %c0_51], %63 {strides = array<i32>} : memref<16x64xf32, #tpu.memory_space<vmem>>, vector<1x64xf32>,
    %c13 = arith.constant 13 : index
    %65 = memref.load %arg1[%c13] : memref<16xi32, #tpu.memory_space<smem>>
    %66 = arith.index_cast %65 : i32 to index
    %c0_52 = arith.constant 0 : index
    %c0_53 = arith.constant 0 : index
    %67 = vector.load %arg2[%66, %c0_52, %c0_53] : memref<50x1x64xf32, #tpu.memory_space<vmem>>, vector<1x1x64xf32>
    %68 = vector.shape_cast %67 : vector<1x1x64xf32> to vector<1x64xf32>
    %c13_54 = arith.constant 13 : index
    %c0_55 = arith.constant 0 : index
    %69 = vector.load %arg13[%c13_54, %c0_55] : memref<16x64xf32, #tpu.memory_space<vmem>>, vector<1x64xf32>
    tpu.vector_store %arg13[%c13_54, %c0_55], %68 {strides = array<i32>} : memref<16x64xf32, #tpu.memory_space<vmem>>, vector<1x64xf32>,
    %c14 = arith.constant 14 : index
    %70 = memref.load %arg1[%c14] : memref<16xi32, #tpu.memory_space<smem>>
    %71 = arith.index_cast %70 : i32 to index
    %c0_56 = arith.constant 0 : index
    %c0_57 = arith.constant 0 : index
    %72 = vector.load %arg2[%71, %c0_56, %c0_57] : memref<50x1x64xf32, #tpu.memory_space<vmem>>, vector<1x1x64xf32>
    %73 = vector.shape_cast %72 : vector<1x1x64xf32> to vector<1x64xf32>
    %c14_58 = arith.constant 14 : index
    %c0_59 = arith.constant 0 : index
    %74 = vector.load %arg13[%c14_58, %c0_59] : memref<16x64xf32, #tpu.memory_space<vmem>>, vector<1x64xf32>
    tpu.vector_store %arg13[%c14_58, %c0_59], %73 {strides = array<i32>} : memref<16x64xf32, #tpu.memory_space<vmem>>, vector<1x64xf32>,
    %c15 = arith.constant 15 : index
    %75 = memref.load %arg1[%c15] : memref<16xi32, #tpu.memory_space<smem>>
    %76 = arith.index_cast %75 : i32 to index
    %c0_60 = arith.constant 0 : index
    %c0_61 = arith.constant 0 : index
    %77 = vector.load %arg2[%76, %c0_60, %c0_61] : memref<50x1x64xf32, #tpu.memory_space<vmem>>, vector<1x1x64xf32>
    %78 = vector.shape_cast %77 : vector<1x1x64xf32> to vector<1x64xf32>
    %c15_62 = arith.constant 15 : index
    %c0_63 = arith.constant 0 : index
    %79 = vector.load %arg13[%c15_62, %c0_63] : memref<16x64xf32, #tpu.memory_space<vmem>>, vector<1x64xf32>
    tpu.vector_store %arg13[%c15_62, %c0_63], %78 {strides = array<i32>} : memref<16x64xf32, #tpu.memory_space<vmem>>, vector<1x64xf32>,
    %c0_64 = arith.constant 0 : index
    %c0_65 = arith.constant 0 : index
    %80 = vector.load %arg13[%c0_64, %c0_65] : memref<16x64xf32, #tpu.memory_space<vmem>>, vector<16x64xf32>
    %c0_66 = arith.constant 0 : index
    %c0_67 = arith.constant 0 : index
    %c0_68 = arith.constant 0 : index
    %81 = vector.load %arg9[%c0_66, %c0_67, %c0_68] : memref<4x6x64xf32, #tpu.memory_space<vmem>>, vector<1x6x64xf32>
    %82 = vector.shape_cast %81 : vector<1x6x64xf32> to vector<6x64xf32>
    %83 = vector.extract_strided_slice %82 {offsets = [0, 0], sizes = [1, 64], strides = [1, 1]} : vector<6x64xf32> to vector<1x64xf32>
    %84 = vector.extract_strided_slice %82 {offsets = [1, 0], sizes = [1, 64], strides = [1, 1]} : vector<6x64xf32> to vector<1x64xf32>
    %85 = vector.extract_strided_slice %82 {offsets = [2, 0], sizes = [1, 64], strides = [1, 1]} : vector<6x64xf32> to vector<1x64xf32>
    %86 = vector.extract_strided_slice %82 {offsets = [3, 0], sizes = [1, 64], strides = [1, 1]} : vector<6x64xf32> to vector<1x64xf32>
    %87 = vector.extract_strided_slice %82 {offsets = [4, 0], sizes = [1, 64], strides = [1, 1]} : vector<6x64xf32> to vector<1x64xf32>
    %88 = vector.extract_strided_slice %82 {offsets = [5, 0], sizes = [1, 64], strides = [1, 1]} : vector<6x64xf32> to vector<1x64xf32>
    %cst = arith.constant dense<0.000000e+00> : vector<16xf32>
    %89 = vector.multi_reduction <add>, %80, %cst [1] : vector<16x64xf32> to vector<16xf32>
    %90 = vector.shape_cast %89 : vector<16xf32> to vector<16x1xf32>
    %cst_69 = arith.constant 6.400000e+01 : f32
    %91 = vector.broadcast %cst_69 : f32 to vector<16x1xf32>
    %92 = arith.divf %90, %91 : vector<16x1xf32>
    %93 = vector.broadcast %92 : vector<16x1xf32> to vector<16x64xf32>
    %94 = arith.subf %80, %93 : vector<16x64xf32>
    %95 = arith.mulf %94, %94 : vector<16x64xf32>
    %cst_70 = arith.constant dense<0.000000e+00> : vector<16xf32>
    %96 = vector.multi_reduction <add>, %95, %cst_70 [1] : vector<16x64xf32> to vector<16xf32>
    %97 = vector.shape_cast %96 : vector<16xf32> to vector<16x1xf32>
    %cst_71 = arith.constant 6.400000e+01 : f32
    %98 = vector.broadcast %cst_71 : f32 to vector<16x1xf32>
    %99 = arith.divf %97, %98 : vector<16x1xf32>
    %100 = vector.broadcast %92 : vector<16x1xf32> to vector<16x64xf32>
    %101 = arith.subf %80, %100 : vector<16x64xf32>
    %cst_72 = arith.constant 9.99999974E-6 : f32
    %102 = vector.broadcast %cst_72 : f32 to vector<16x1xf32>
    %103 = arith.addf %99, %102 : vector<16x1xf32>
    %104 = math.rsqrt %103 : vector<16x1xf32>
    %105 = vector.broadcast %104 : vector<16x1xf32> to vector<16x64xf32>
    %106 = arith.mulf %101, %105 : vector<16x64xf32>
    %107 = vector.broadcast %83 : vector<1x64xf32> to vector<16x64xf32>
    %108 = arith.mulf %106, %107 : vector<16x64xf32>
    %109 = vector.broadcast %84 : vector<1x64xf32> to vector<16x64xf32>
    %110 = arith.addf %108, %109 : vector<16x64xf32>
    %111 = arith.truncf %110 : vector<16x64xf32> to vector<16x64xbf16>
    %c0_73 = arith.constant 0 : index
    %c0_74 = arith.constant 0 : index
    %c0_75 = arith.constant 0 : index
    %112 = vector.load %arg4[%c0_73, %c0_74, %c0_75] : memref<4x64x192xbf16, #tpu.memory_space<vmem>>, vector<1x64x192xbf16>
    %113 = vector.shape_cast %112 : vector<1x64x192xbf16> to vector<64x192xbf16>
    %cst_76 = arith.constant dense<0.000000e+00> : vector<16x192xf32>
    %114 = tpu.matmul %111, %113, %cst_76 {dimension_numbers = #tpu.dot_dimension_numbers<[1], [0], [0], [1], [0, 0, 1, 1], [], []>} : vector<16x64xbf16>, vector<64x192xbf16>, vector<16x192xf32> -> vector<16x192xf32>
    %115 = vector.shape_cast %114 : vector<16x192xf32> to vector<2x8x192xf32>
    %116 = vector.extract_strided_slice %115 {offsets = [0, 0, 0], sizes = [2, 8, 32], strides = [1, 1, 1]} : vector<2x8x192xf32> to vector<2x8x32xf32>
    %117 = vector.extract_strided_slice %115 {offsets = [0, 0, 32], sizes = [2, 8, 32], strides = [1, 1, 1]} : vector<2x8x192xf32> to vector<2x8x32xf32>
    %118 = tpu.concatenate %116, %117 in 0 : vector<2x8x32xf32>, vector<2x8x32xf32> -> vector<4x8x32xf32>
    %119 = vector.extract_strided_slice %115 {offsets = [0, 0, 64], sizes = [2, 8, 32], strides = [1, 1, 1]} : vector<2x8x192xf32> to vector<2x8x32xf32>
    %120 = vector.extract_strided_slice %115 {offsets = [0, 0, 96], sizes = [2, 8, 32], strides = [1, 1, 1]} : vector<2x8x192xf32> to vector<2x8x32xf32>
    %121 = tpu.concatenate %119, %120 in 0 : vector<2x8x32xf32>, vector<2x8x32xf32> -> vector<4x8x32xf32>
    %122 = vector.extract_strided_slice %115 {offsets = [0, 0, 128], sizes = [2, 8, 32], strides = [1, 1, 1]} : vector<2x8x192xf32> to vector<2x8x32xf32>
    %123 = vector.extract_strided_slice %115 {offsets = [0, 0, 160], sizes = [2, 8, 32], strides = [1, 1, 1]} : vector<2x8x192xf32> to vector<2x8x32xf32>
    %124 = tpu.concatenate %122, %123 in 0 : vector<2x8x32xf32>, vector<2x8x32xf32> -> vector<4x8x32xf32>
    %cst_77 = arith.constant dense<0.000000e+00> : vector<4x8x8xf32>
    %125 = tpu.matmul %118, %121, %cst_77 {dimension_numbers = #tpu.dot_dimension_numbers<[2], [2], [1], [1], [0, 0, 0, 1, 1, 1], [0], [0]>} : vector<4x8x32xf32>, vector<4x8x32xf32>, vector<4x8x8xf32> -> vector<4x8x8xf32>
    %cst_78 = arith.constant 0.176776692 : f32
    %126 = vector.broadcast %cst_78 : f32 to vector<4x8x8xf32>
    %127 = arith.mulf %125, %126 : vector<4x8x8xf32>
    %c0_79 = arith.constant 0 : index
    %c0_80 = arith.constant 0 : index
    %c0_81 = arith.constant 0 : index
    %c0_82 = arith.constant 0 : index
    %128 = vector.load %arg3[%c0_79, %c0_80, %c0_81, %c0_82] : memref<4x4x8x8xf32, #tpu.memory_space<vmem>>, vector<1x4x8x8xf32>
    %129 = vector.shape_cast %128 : vector<1x4x8x8xf32> to vector<4x8x8xf32>
    %130 = arith.addf %127, %129 : vector<4x8x8xf32>
    %cst_83 = arith.constant dense<0xFF800000> : vector<4x8xf32>
    %131 = vector.multi_reduction <maximumf>, %130, %cst_83 [2] : vector<4x8x8xf32> to vector<4x8xf32>
    %132 = vector.shape_cast %131 : vector<4x8xf32> to vector<4x8x1xf32>
    %133 = vector.broadcast %132 : vector<4x8x1xf32> to vector<4x8x8xf32>
    %134 = arith.subf %130, %133 : vector<4x8x8xf32>
    %135 = math.exp %134 : vector<4x8x8xf32>
    %cst_84 = arith.constant dense<0.000000e+00> : vector<4x8xf32>
    %136 = vector.multi_reduction <add>, %135, %cst_84 [2] : vector<4x8x8xf32> to vector<4x8xf32>
    %137 = vector.shape_cast %136 : vector<4x8xf32> to vector<4x8x1xf32>
    %138 = tpu.reciprocal %137 {approx = true} : vector<4x8x1xf32> -> vector<4x8x1xf32>
    %139 = vector.broadcast %138 : vector<4x8x1xf32> to vector<4x8x8xf32>
    %140 = arith.mulf %135, %139 : vector<4x8x8xf32>
    %c0_85 = arith.constant 0 : index
    %c0_86 = arith.constant 0 : index
    %c0_87 = arith.constant 0 : index
    %c0_88 = arith.constant 0 : index
    %141 = vector.load %arg12[%c0_85, %c0_86, %c0_87, %c0_88] : memref<4x4x8x8xf32, #tpu.memory_space<vmem>>, vector<1x4x8x8xf32>
    %142 = vector.shape_cast %141 : vector<1x4x8x8xf32> to vector<4x8x8xf32>
    %143 = vector.shape_cast %140 : vector<4x8x8xf32> to vector<1x4x8x8xf32>
    tpu.vector_store %arg12[%c0_85, %c0_86, %c0_87, %c0_88], %143 {strides = array<i32>} : memref<4x4x8x8xf32, #tpu.memory_space<vmem>>, vector<1x4x8x8xf32>,
    %cst_89 = arith.constant dense<0.000000e+00> : vector<4x8x32xf32>
    %144 = tpu.matmul %140, %124, %cst_89 {dimension_numbers = #tpu.dot_dimension_numbers<[2], [1], [1], [2], [0, 0, 0, 1, 1, 2], [0], [0]>} : vector<4x8x8xf32>, vector<4x8x32xf32>, vector<4x8x32xf32> -> vector<4x8x32xf32>
    %145 = vector.extract_strided_slice %144 {offsets = [0, 0, 0], sizes = [2, 8, 32], strides = [1, 1, 1]} : vector<4x8x32xf32> to vector<2x8x32xf32>
    %146 = vector.extract_strided_slice %144 {offsets = [2, 0, 0], sizes = [2, 8, 32], strides = [1, 1, 1]} : vector<4x8x32xf32> to vector<2x8x32xf32>
    %147 = tpu.concatenate %145, %146 in 2 : vector<2x8x32xf32>, vector<2x8x32xf32> -> vector<2x8x64xf32>
    %148 = vector.shape_cast %147 : vector<2x8x64xf32> to vector<16x64xf32>
    %149 = arith.truncf %148 : vector<16x64xf32> to vector<16x64xbf16>
    %c0_90 = arith.constant 0 : index
    %c0_91 = arith.constant 0 : index
    %c0_92 = arith.constant 0 : index
    %150 = vector.load %arg5[%c0_90, %c0_91, %c0_92] : memref<4x64x64xbf16, #tpu.memory_space<vmem>>, vector<1x64x64xbf16>
    %151 = vector.shape_cast %150 : vector<1x64x64xbf16> to vector<64x64xbf16>
    %cst_93 = arith.constant dense<0.000000e+00> : vector<16x64xf32>
    %152 = tpu.matmul %149, %151, %cst_93 {dimension_numbers = #tpu.dot_dimension_numbers<[1], [0], [0], [1], [0, 0, 1, 1], [], []>} : vector<16x64xbf16>, vector<64x64xbf16>, vector<16x64xf32> -> vector<16x64xf32>
    %153 = arith.addf %80, %152 : vector<16x64xf32>
    %154 = vector.broadcast %87 : vector<1x64xf32> to vector<16x64xf32>
    %155 = arith.addf %153, %154 : vector<16x64xf32>
    %cst_94 = arith.constant dense<0.000000e+00> : vector<16xf32>
    %156 = vector.multi_reduction <add>, %155, %cst_94 [1] : vector<16x64xf32> to vector<16xf32>
    %157 = vector.shape_cast %156 : vector<16xf32> to vector<16x1xf32>
    %cst_95 = arith.constant 6.400000e+01 : f32
    %158 = vector.broadcast %cst_95 : f32 to vector<16x1xf32>
    %159 = arith.divf %157, %158 : vector<16x1xf32>
    %160 = vector.broadcast %159 : vector<16x1xf32> to vector<16x64xf32>
    %161 = arith.subf %155, %160 : vector<16x64xf32>
    %162 = arith.mulf %161, %161 : vector<16x64xf32>
    %cst_96 = arith.constant dense<0.000000e+00> : vector<16xf32>
    %163 = vector.multi_reduction <add>, %162, %cst_96 [1] : vector<16x64xf32> to vector<16xf32>
    %164 = vector.shape_cast %163 : vector<16xf32> to vector<16x1xf32>
    %cst_97 = arith.constant 6.400000e+01 : f32
    %165 = vector.broadcast %cst_97 : f32 to vector<16x1xf32>
    %166 = arith.divf %164, %165 : vector<16x1xf32>
    %167 = vector.broadcast %159 : vector<16x1xf32> to vector<16x64xf32>
    %168 = arith.subf %155, %167 : vector<16x64xf32>
    %cst_98 = arith.constant 9.99999974E-6 : f32
    %169 = vector.broadcast %cst_98 : f32 to vector<16x1xf32>
    %170 = arith.addf %166, %169 : vector<16x1xf32>
    %171 = math.rsqrt %170 : vector<16x1xf32>
    %172 = vector.broadcast %171 : vector<16x1xf32> to vector<16x64xf32>
    %173 = arith.mulf %168, %172 : vector<16x64xf32>
    %174 = vector.broadcast %85 : vector<1x64xf32> to vector<16x64xf32>
    %175 = arith.mulf %173, %174 : vector<16x64xf32>
    %176 = vector.broadcast %86 : vector<1x64xf32> to vector<16x64xf32>
    %177 = arith.addf %175, %176 : vector<16x64xf32>
    %178 = arith.truncf %177 : vector<16x64xf32> to vector<16x64xbf16>
    %c0_99 = arith.constant 0 : index
    %c0_100 = arith.constant 0 : index
    %c0_101 = arith.constant 0 : index
    %179 = vector.load %arg6[%c0_99, %c0_100, %c0_101] : memref<4x64x256xbf16, #tpu.memory_space<vmem>>, vector<1x64x256xbf16>
    %180 = vector.shape_cast %179 : vector<1x64x256xbf16> to vector<64x256xbf16>
    %cst_102 = arith.constant dense<0.000000e+00> : vector<16x256xf32>
    %181 = tpu.matmul %178, %180, %cst_102 {dimension_numbers = #tpu.dot_dimension_numbers<[1], [0], [0], [1], [0, 0, 1, 1], [], []>} : vector<16x64xbf16>, vector<64x256xbf16>, vector<16x256xf32> -> vector<16x256xf32>
    %c0_103 = arith.constant 0 : index
    %c0_104 = arith.constant 0 : index
    %c0_105 = arith.constant 0 : index
    %182 = vector.load %arg7[%c0_103, %c0_104, %c0_105] : memref<4x1x256xf32, #tpu.memory_space<vmem>>, vector<1x1x256xf32>
    %183 = vector.shape_cast %182 : vector<1x1x256xf32> to vector<1x256xf32>
    %184 = vector.broadcast %183 : vector<1x256xf32> to vector<16x256xf32>
    %185 = arith.addf %181, %184 : vector<16x256xf32>
    %cst_106 = arith.constant 0.000000e+00 : f32
    %186 = vector.broadcast %cst_106 : f32 to vector<16x256xf32>
    %187 = arith.maximumf %185, %186 : vector<16x256xf32>
    %188 = arith.truncf %187 : vector<16x256xf32> to vector<16x256xbf16>
    %c0_107 = arith.constant 0 : index
    %c0_108 = arith.constant 0 : index
    %c0_109 = arith.constant 0 : index
    %189 = vector.load %arg8[%c0_107, %c0_108, %c0_109] : memref<4x256x64xbf16, #tpu.memory_space<vmem>>, vector<1x256x64xbf16>
    %190 = vector.shape_cast %189 : vector<1x256x64xbf16> to vector<256x64xbf16>
    %cst_110 = arith.constant dense<0.000000e+00> : vector<16x64xf32>
    %191 = tpu.matmul %188, %190, %cst_110 {dimension_numbers = #tpu.dot_dimension_numbers<[1], [0], [0], [1], [0, 0, 1, 1], [], []>} : vector<16x256xbf16>, vector<256x64xbf16>, vector<16x64xf32> -> vector<16x64xf32>
    %192 = vector.broadcast %88 : vector<1x64xf32> to vector<16x64xf32>
    %193 = arith.addf %191, %192 : vector<16x64xf32>
    %194 = arith.addf %155, %193 : vector<16x64xf32>
    %c1_111 = arith.constant 1 : index
    %c0_112 = arith.constant 0 : index
    %c0_113 = arith.constant 0 : index
    %195 = vector.load %arg9[%c1_111, %c0_112, %c0_113] : memref<4x6x64xf32, #tpu.memory_space<vmem>>, vector<1x6x64xf32>
    %196 = vector.shape_cast %195 : vector<1x6x64xf32> to vector<6x64xf32>
    %197 = vector.extract_strided_slice %196 {offsets = [0, 0], sizes = [1, 64], strides = [1, 1]} : vector<6x64xf32> to vector<1x64xf32>
    %198 = vector.extract_strided_slice %196 {offsets = [1, 0], sizes = [1, 64], strides = [1, 1]} : vector<6x64xf32> to vector<1x64xf32>
    %199 = vector.extract_strided_slice %196 {offsets = [2, 0], sizes = [1, 64], strides = [1, 1]} : vector<6x64xf32> to vector<1x64xf32>
    %200 = vector.extract_strided_slice %196 {offsets = [3, 0], sizes = [1, 64], strides = [1, 1]} : vector<6x64xf32> to vector<1x64xf32>
    %201 = vector.extract_strided_slice %196 {offsets = [4, 0], sizes = [1, 64], strides = [1, 1]} : vector<6x64xf32> to vector<1x64xf32>
    %202 = vector.extract_strided_slice %196 {offsets = [5, 0], sizes = [1, 64], strides = [1, 1]} : vector<6x64xf32> to vector<1x64xf32>
    %cst_114 = arith.constant dense<0.000000e+00> : vector<16xf32>
    %203 = vector.multi_reduction <add>, %194, %cst_114 [1] : vector<16x64xf32> to vector<16xf32>
    %204 = vector.shape_cast %203 : vector<16xf32> to vector<16x1xf32>
    %cst_115 = arith.constant 6.400000e+01 : f32
    %205 = vector.broadcast %cst_115 : f32 to vector<16x1xf32>
    %206 = arith.divf %204, %205 : vector<16x1xf32>
    %207 = vector.broadcast %206 : vector<16x1xf32> to vector<16x64xf32>
    %208 = arith.subf %194, %207 : vector<16x64xf32>
    %209 = arith.mulf %208, %208 : vector<16x64xf32>
    %cst_116 = arith.constant dense<0.000000e+00> : vector<16xf32>
    %210 = vector.multi_reduction <add>, %209, %cst_116 [1] : vector<16x64xf32> to vector<16xf32>
    %211 = vector.shape_cast %210 : vector<16xf32> to vector<16x1xf32>
    %cst_117 = arith.constant 6.400000e+01 : f32
    %212 = vector.broadcast %cst_117 : f32 to vector<16x1xf32>
    %213 = arith.divf %211, %212 : vector<16x1xf32>
    %214 = vector.broadcast %206 : vector<16x1xf32> to vector<16x64xf32>
    %215 = arith.subf %194, %214 : vector<16x64xf32>
    %cst_118 = arith.constant 9.99999974E-6 : f32
    %216 = vector.broadcast %cst_118 : f32 to vector<16x1xf32>
    %217 = arith.addf %213, %216 : vector<16x1xf32>
    %218 = math.rsqrt %217 : vector<16x1xf32>
    %219 = vector.broadcast %218 : vector<16x1xf32> to vector<16x64xf32>
    %220 = arith.mulf %215, %219 : vector<16x64xf32>
    %221 = vector.broadcast %197 : vector<1x64xf32> to vector<16x64xf32>
    %222 = arith.mulf %220, %221 : vector<16x64xf32>
    %223 = vector.broadcast %198 : vector<1x64xf32> to vector<16x64xf32>
    %224 = arith.addf %222, %223 : vector<16x64xf32>
    %225 = arith.truncf %224 : vector<16x64xf32> to vector<16x64xbf16>
    %c1_119 = arith.constant 1 : index
    %c0_120 = arith.constant 0 : index
    %c0_121 = arith.constant 0 : index
    %226 = vector.load %arg4[%c1_119, %c0_120, %c0_121] : memref<4x64x192xbf16, #tpu.memory_space<vmem>>, vector<1x64x192xbf16>
    %227 = vector.shape_cast %226 : vector<1x64x192xbf16> to vector<64x192xbf16>
    %cst_122 = arith.constant dense<0.000000e+00> : vector<16x192xf32>
    %228 = tpu.matmul %225, %227, %cst_122 {dimension_numbers = #tpu.dot_dimension_numbers<[1], [0], [0], [1], [0, 0, 1, 1], [], []>} : vector<16x64xbf16>, vector<64x192xbf16>, vector<16x192xf32> -> vector<16x192xf32>
    %229 = vector.shape_cast %228 : vector<16x192xf32> to vector<2x8x192xf32>
    %230 = vector.extract_strided_slice %229 {offsets = [0, 0, 0], sizes = [2, 8, 32], strides = [1, 1, 1]} : vector<2x8x192xf32> to vector<2x8x32xf32>
    %231 = vector.extract_strided_slice %229 {offsets = [0, 0, 32], sizes = [2, 8, 32], strides = [1, 1, 1]} : vector<2x8x192xf32> to vector<2x8x32xf32>
    %232 = tpu.concatenate %230, %231 in 0 : vector<2x8x32xf32>, vector<2x8x32xf32> -> vector<4x8x32xf32>
    %233 = vector.extract_strided_slice %229 {offsets = [0, 0, 64], sizes = [2, 8, 32], strides = [1, 1, 1]} : vector<2x8x192xf32> to vector<2x8x32xf32>
    %234 = vector.extract_strided_slice %229 {offsets = [0, 0, 96], sizes = [2, 8, 32], strides = [1, 1, 1]} : vector<2x8x192xf32> to vector<2x8x32xf32>
    %235 = tpu.concatenate %233, %234 in 0 : vector<2x8x32xf32>, vector<2x8x32xf32> -> vector<4x8x32xf32>
    %236 = vector.extract_strided_slice %229 {offsets = [0, 0, 128], sizes = [2, 8, 32], strides = [1, 1, 1]} : vector<2x8x192xf32> to vector<2x8x32xf32>
    %237 = vector.extract_strided_slice %229 {offsets = [0, 0, 160], sizes = [2, 8, 32], strides = [1, 1, 1]} : vector<2x8x192xf32> to vector<2x8x32xf32>
    %238 = tpu.concatenate %236, %237 in 0 : vector<2x8x32xf32>, vector<2x8x32xf32> -> vector<4x8x32xf32>
    %cst_123 = arith.constant dense<0.000000e+00> : vector<4x8x8xf32>
    %239 = tpu.matmul %232, %235, %cst_123 {dimension_numbers = #tpu.dot_dimension_numbers<[2], [2], [1], [1], [0, 0, 0, 1, 1, 1], [0], [0]>} : vector<4x8x32xf32>, vector<4x8x32xf32>, vector<4x8x8xf32> -> vector<4x8x8xf32>
    %cst_124 = arith.constant 0.176776692 : f32
    %240 = vector.broadcast %cst_124 : f32 to vector<4x8x8xf32>
    %241 = arith.mulf %239, %240 : vector<4x8x8xf32>
    %c1_125 = arith.constant 1 : index
    %c0_126 = arith.constant 0 : index
    %c0_127 = arith.constant 0 : index
    %c0_128 = arith.constant 0 : index
    %242 = vector.load %arg3[%c1_125, %c0_126, %c0_127, %c0_128] : memref<4x4x8x8xf32, #tpu.memory_space<vmem>>, vector<1x4x8x8xf32>
    %243 = vector.shape_cast %242 : vector<1x4x8x8xf32> to vector<4x8x8xf32>
    %244 = arith.addf %241, %243 : vector<4x8x8xf32>
    %cst_129 = arith.constant dense<0xFF800000> : vector<4x8xf32>
    %245 = vector.multi_reduction <maximumf>, %244, %cst_129 [2] : vector<4x8x8xf32> to vector<4x8xf32>
    %246 = vector.shape_cast %245 : vector<4x8xf32> to vector<4x8x1xf32>
    %247 = vector.broadcast %246 : vector<4x8x1xf32> to vector<4x8x8xf32>
    %248 = arith.subf %244, %247 : vector<4x8x8xf32>
    %249 = math.exp %248 : vector<4x8x8xf32>
    %cst_130 = arith.constant dense<0.000000e+00> : vector<4x8xf32>
    %250 = vector.multi_reduction <add>, %249, %cst_130 [2] : vector<4x8x8xf32> to vector<4x8xf32>
    %251 = vector.shape_cast %250 : vector<4x8xf32> to vector<4x8x1xf32>
    %252 = tpu.reciprocal %251 {approx = true} : vector<4x8x1xf32> -> vector<4x8x1xf32>
    %253 = vector.broadcast %252 : vector<4x8x1xf32> to vector<4x8x8xf32>
    %254 = arith.mulf %249, %253 : vector<4x8x8xf32>
    %c1_131 = arith.constant 1 : index
    %c0_132 = arith.constant 0 : index
    %c0_133 = arith.constant 0 : index
    %c0_134 = arith.constant 0 : index
    %255 = vector.load %arg12[%c1_131, %c0_132, %c0_133, %c0_134] : memref<4x4x8x8xf32, #tpu.memory_space<vmem>>, vector<1x4x8x8xf32>
    %256 = vector.shape_cast %255 : vector<1x4x8x8xf32> to vector<4x8x8xf32>
    %257 = vector.shape_cast %254 : vector<4x8x8xf32> to vector<1x4x8x8xf32>
    tpu.vector_store %arg12[%c1_131, %c0_132, %c0_133, %c0_134], %257 {strides = array<i32>} : memref<4x4x8x8xf32, #tpu.memory_space<vmem>>, vector<1x4x8x8xf32>,
    %cst_135 = arith.constant dense<0.000000e+00> : vector<4x8x32xf32>
    %258 = tpu.matmul %254, %238, %cst_135 {dimension_numbers = #tpu.dot_dimension_numbers<[2], [1], [1], [2], [0, 0, 0, 1, 1, 2], [0], [0]>} : vector<4x8x8xf32>, vector<4x8x32xf32>, vector<4x8x32xf32> -> vector<4x8x32xf32>
    %259 = vector.extract_strided_slice %258 {offsets = [0, 0, 0], sizes = [2, 8, 32], strides = [1, 1, 1]} : vector<4x8x32xf32> to vector<2x8x32xf32>
    %260 = vector.extract_strided_slice %258 {offsets = [2, 0, 0], sizes = [2, 8, 32], strides = [1, 1, 1]} : vector<4x8x32xf32> to vector<2x8x32xf32>
    %261 = tpu.concatenate %259, %260 in 2 : vector<2x8x32xf32>, vector<2x8x32xf32> -> vector<2x8x64xf32>
    %262 = vector.shape_cast %261 : vector<2x8x64xf32> to vector<16x64xf32>
    %263 = arith.truncf %262 : vector<16x64xf32> to vector<16x64xbf16>
    %c1_136 = arith.constant 1 : index
    %c0_137 = arith.constant 0 : index
    %c0_138 = arith.constant 0 : index
    %264 = vector.load %arg5[%c1_136, %c0_137, %c0_138] : memref<4x64x64xbf16, #tpu.memory_space<vmem>>, vector<1x64x64xbf16>
    %265 = vector.shape_cast %264 : vector<1x64x64xbf16> to vector<64x64xbf16>
    %cst_139 = arith.constant dense<0.000000e+00> : vector<16x64xf32>
    %266 = tpu.matmul %263, %265, %cst_139 {dimension_numbers = #tpu.dot_dimension_numbers<[1], [0], [0], [1], [0, 0, 1, 1], [], []>} : vector<16x64xbf16>, vector<64x64xbf16>, vector<16x64xf32> -> vector<16x64xf32>
    %267 = arith.addf %194, %266 : vector<16x64xf32>
    %268 = vector.broadcast %201 : vector<1x64xf32> to vector<16x64xf32>
    %269 = arith.addf %267, %268 : vector<16x64xf32>
    %cst_140 = arith.constant dense<0.000000e+00> : vector<16xf32>
    %270 = vector.multi_reduction <add>, %269, %cst_140 [1] : vector<16x64xf32> to vector<16xf32>
    %271 = vector.shape_cast %270 : vector<16xf32> to vector<16x1xf32>
    %cst_141 = arith.constant 6.400000e+01 : f32
    %272 = vector.broadcast %cst_141 : f32 to vector<16x1xf32>
    %273 = arith.divf %271, %272 : vector<16x1xf32>
    %274 = vector.broadcast %273 : vector<16x1xf32> to vector<16x64xf32>
    %275 = arith.subf %269, %274 : vector<16x64xf32>
    %276 = arith.mulf %275, %275 : vector<16x64xf32>
    %cst_142 = arith.constant dense<0.000000e+00> : vector<16xf32>
    %277 = vector.multi_reduction <add>, %276, %cst_142 [1] : vector<16x64xf32> to vector<16xf32>
    %278 = vector.shape_cast %277 : vector<16xf32> to vector<16x1xf32>
    %cst_143 = arith.constant 6.400000e+01 : f32
    %279 = vector.broadcast %cst_143 : f32 to vector<16x1xf32>
    %280 = arith.divf %278, %279 : vector<16x1xf32>
    %281 = vector.broadcast %273 : vector<16x1xf32> to vector<16x64xf32>
    %282 = arith.subf %269, %281 : vector<16x64xf32>
    %cst_144 = arith.constant 9.99999974E-6 : f32
    %283 = vector.broadcast %cst_144 : f32 to vector<16x1xf32>
    %284 = arith.addf %280, %283 : vector<16x1xf32>
    %285 = math.rsqrt %284 : vector<16x1xf32>
    %286 = vector.broadcast %285 : vector<16x1xf32> to vector<16x64xf32>
    %287 = arith.mulf %282, %286 : vector<16x64xf32>
    %288 = vector.broadcast %199 : vector<1x64xf32> to vector<16x64xf32>
    %289 = arith.mulf %287, %288 : vector<16x64xf32>
    %290 = vector.broadcast %200 : vector<1x64xf32> to vector<16x64xf32>
    %291 = arith.addf %289, %290 : vector<16x64xf32>
    %292 = arith.truncf %291 : vector<16x64xf32> to vector<16x64xbf16>
    %c1_145 = arith.constant 1 : index
    %c0_146 = arith.constant 0 : index
    %c0_147 = arith.constant 0 : index
    %293 = vector.load %arg6[%c1_145, %c0_146, %c0_147] : memref<4x64x256xbf16, #tpu.memory_space<vmem>>, vector<1x64x256xbf16>
    %294 = vector.shape_cast %293 : vector<1x64x256xbf16> to vector<64x256xbf16>
    %cst_148 = arith.constant dense<0.000000e+00> : vector<16x256xf32>
    %295 = tpu.matmul %292, %294, %cst_148 {dimension_numbers = #tpu.dot_dimension_numbers<[1], [0], [0], [1], [0, 0, 1, 1], [], []>} : vector<16x64xbf16>, vector<64x256xbf16>, vector<16x256xf32> -> vector<16x256xf32>
    %c1_149 = arith.constant 1 : index
    %c0_150 = arith.constant 0 : index
    %c0_151 = arith.constant 0 : index
    %296 = vector.load %arg7[%c1_149, %c0_150, %c0_151] : memref<4x1x256xf32, #tpu.memory_space<vmem>>, vector<1x1x256xf32>
    %297 = vector.shape_cast %296 : vector<1x1x256xf32> to vector<1x256xf32>
    %298 = vector.broadcast %297 : vector<1x256xf32> to vector<16x256xf32>
    %299 = arith.addf %295, %298 : vector<16x256xf32>
    %cst_152 = arith.constant 0.000000e+00 : f32
    %300 = vector.broadcast %cst_152 : f32 to vector<16x256xf32>
    %301 = arith.maximumf %299, %300 : vector<16x256xf32>
    %302 = arith.truncf %301 : vector<16x256xf32> to vector<16x256xbf16>
    %c1_153 = arith.constant 1 : index
    %c0_154 = arith.constant 0 : index
    %c0_155 = arith.constant 0 : index
    %303 = vector.load %arg8[%c1_153, %c0_154, %c0_155] : memref<4x256x64xbf16, #tpu.memory_space<vmem>>, vector<1x256x64xbf16>
    %304 = vector.shape_cast %303 : vector<1x256x64xbf16> to vector<256x64xbf16>
    %cst_156 = arith.constant dense<0.000000e+00> : vector<16x64xf32>
    %305 = tpu.matmul %302, %304, %cst_156 {dimension_numbers = #tpu.dot_dimension_numbers<[1], [0], [0], [1], [0, 0, 1, 1], [], []>} : vector<16x256xbf16>, vector<256x64xbf16>, vector<16x64xf32> -> vector<16x64xf32>
    %306 = vector.broadcast %202 : vector<1x64xf32> to vector<16x64xf32>
    %307 = arith.addf %305, %306 : vector<16x64xf32>
    %308 = arith.addf %269, %307 : vector<16x64xf32>
    %c2_157 = arith.constant 2 : index
    %c0_158 = arith.constant 0 : index
    %c0_159 = arith.constant 0 : index
    %309 = vector.load %arg9[%c2_157, %c0_158, %c0_159] : memref<4x6x64xf32, #tpu.memory_space<vmem>>, vector<1x6x64xf32>
    %310 = vector.shape_cast %309 : vector<1x6x64xf32> to vector<6x64xf32>
    %311 = vector.extract_strided_slice %310 {offsets = [0, 0], sizes = [1, 64], strides = [1, 1]} : vector<6x64xf32> to vector<1x64xf32>
    %312 = vector.extract_strided_slice %310 {offsets = [1, 0], sizes = [1, 64], strides = [1, 1]} : vector<6x64xf32> to vector<1x64xf32>
    %313 = vector.extract_strided_slice %310 {offsets = [2, 0], sizes = [1, 64], strides = [1, 1]} : vector<6x64xf32> to vector<1x64xf32>
    %314 = vector.extract_strided_slice %310 {offsets = [3, 0], sizes = [1, 64], strides = [1, 1]} : vector<6x64xf32> to vector<1x64xf32>
    %315 = vector.extract_strided_slice %310 {offsets = [4, 0], sizes = [1, 64], strides = [1, 1]} : vector<6x64xf32> to vector<1x64xf32>
    %316 = vector.extract_strided_slice %310 {offsets = [5, 0], sizes = [1, 64], strides = [1, 1]} : vector<6x64xf32> to vector<1x64xf32>
    %cst_160 = arith.constant dense<0.000000e+00> : vector<16xf32>
    %317 = vector.multi_reduction <add>, %308, %cst_160 [1] : vector<16x64xf32> to vector<16xf32>
    %318 = vector.shape_cast %317 : vector<16xf32> to vector<16x1xf32>
    %cst_161 = arith.constant 6.400000e+01 : f32
    %319 = vector.broadcast %cst_161 : f32 to vector<16x1xf32>
    %320 = arith.divf %318, %319 : vector<16x1xf32>
    %321 = vector.broadcast %320 : vector<16x1xf32> to vector<16x64xf32>
    %322 = arith.subf %308, %321 : vector<16x64xf32>
    %323 = arith.mulf %322, %322 : vector<16x64xf32>
    %cst_162 = arith.constant dense<0.000000e+00> : vector<16xf32>
    %324 = vector.multi_reduction <add>, %323, %cst_162 [1] : vector<16x64xf32> to vector<16xf32>
    %325 = vector.shape_cast %324 : vector<16xf32> to vector<16x1xf32>
    %cst_163 = arith.constant 6.400000e+01 : f32
    %326 = vector.broadcast %cst_163 : f32 to vector<16x1xf32>
    %327 = arith.divf %325, %326 : vector<16x1xf32>
    %328 = vector.broadcast %320 : vector<16x1xf32> to vector<16x64xf32>
    %329 = arith.subf %308, %328 : vector<16x64xf32>
    %cst_164 = arith.constant 9.99999974E-6 : f32
    %330 = vector.broadcast %cst_164 : f32 to vector<16x1xf32>
    %331 = arith.addf %327, %330 : vector<16x1xf32>
    %332 = math.rsqrt %331 : vector<16x1xf32>
    %333 = vector.broadcast %332 : vector<16x1xf32> to vector<16x64xf32>
    %334 = arith.mulf %329, %333 : vector<16x64xf32>
    %335 = vector.broadcast %311 : vector<1x64xf32> to vector<16x64xf32>
    %336 = arith.mulf %334, %335 : vector<16x64xf32>
    %337 = vector.broadcast %312 : vector<1x64xf32> to vector<16x64xf32>
    %338 = arith.addf %336, %337 : vector<16x64xf32>
    %339 = arith.truncf %338 : vector<16x64xf32> to vector<16x64xbf16>
    %c2_165 = arith.constant 2 : index
    %c0_166 = arith.constant 0 : index
    %c0_167 = arith.constant 0 : index
    %340 = vector.load %arg4[%c2_165, %c0_166, %c0_167] : memref<4x64x192xbf16, #tpu.memory_space<vmem>>, vector<1x64x192xbf16>
    %341 = vector.shape_cast %340 : vector<1x64x192xbf16> to vector<64x192xbf16>
    %cst_168 = arith.constant dense<0.000000e+00> : vector<16x192xf32>
    %342 = tpu.matmul %339, %341, %cst_168 {dimension_numbers = #tpu.dot_dimension_numbers<[1], [0], [0], [1], [0, 0, 1, 1], [], []>} : vector<16x64xbf16>, vector<64x192xbf16>, vector<16x192xf32> -> vector<16x192xf32>
    %343 = vector.shape_cast %342 : vector<16x192xf32> to vector<2x8x192xf32>
    %344 = vector.extract_strided_slice %343 {offsets = [0, 0, 0], sizes = [2, 8, 32], strides = [1, 1, 1]} : vector<2x8x192xf32> to vector<2x8x32xf32>
    %345 = vector.extract_strided_slice %343 {offsets = [0, 0, 32], sizes = [2, 8, 32], strides = [1, 1, 1]} : vector<2x8x192xf32> to vector<2x8x32xf32>
    %346 = tpu.concatenate %344, %345 in 0 : vector<2x8x32xf32>, vector<2x8x32xf32> -> vector<4x8x32xf32>
    %347 = vector.extract_strided_slice %343 {offsets = [0, 0, 64], sizes = [2, 8, 32], strides = [1, 1, 1]} : vector<2x8x192xf32> to vector<2x8x32xf32>
    %348 = vector.extract_strided_slice %343 {offsets = [0, 0, 96], sizes = [2, 8, 32], strides = [1, 1, 1]} : vector<2x8x192xf32> to vector<2x8x32xf32>
    %349 = tpu.concatenate %347, %348 in 0 : vector<2x8x32xf32>, vector<2x8x32xf32> -> vector<4x8x32xf32>
    %350 = vector.extract_strided_slice %343 {offsets = [0, 0, 128], sizes = [2, 8, 32], strides = [1, 1, 1]} : vector<2x8x192xf32> to vector<2x8x32xf32>
    %351 = vector.extract_strided_slice %343 {offsets = [0, 0, 160], sizes = [2, 8, 32], strides = [1, 1, 1]} : vector<2x8x192xf32> to vector<2x8x32xf32>
    %352 = tpu.concatenate %350, %351 in 0 : vector<2x8x32xf32>, vector<2x8x32xf32> -> vector<4x8x32xf32>
    %cst_169 = arith.constant dense<0.000000e+00> : vector<4x8x8xf32>
    %353 = tpu.matmul %346, %349, %cst_169 {dimension_numbers = #tpu.dot_dimension_numbers<[2], [2], [1], [1], [0, 0, 0, 1, 1, 1], [0], [0]>} : vector<4x8x32xf32>, vector<4x8x32xf32>, vector<4x8x8xf32> -> vector<4x8x8xf32>
    %cst_170 = arith.constant 0.176776692 : f32
    %354 = vector.broadcast %cst_170 : f32 to vector<4x8x8xf32>
    %355 = arith.mulf %353, %354 : vector<4x8x8xf32>
    %c2_171 = arith.constant 2 : index
    %c0_172 = arith.constant 0 : index
    %c0_173 = arith.constant 0 : index
    %c0_174 = arith.constant 0 : index
    %356 = vector.load %arg3[%c2_171, %c0_172, %c0_173, %c0_174] : memref<4x4x8x8xf32, #tpu.memory_space<vmem>>, vector<1x4x8x8xf32>
    %357 = vector.shape_cast %356 : vector<1x4x8x8xf32> to vector<4x8x8xf32>
    %358 = arith.addf %355, %357 : vector<4x8x8xf32>
    %cst_175 = arith.constant dense<0xFF800000> : vector<4x8xf32>
    %359 = vector.multi_reduction <maximumf>, %358, %cst_175 [2] : vector<4x8x8xf32> to vector<4x8xf32>
    %360 = vector.shape_cast %359 : vector<4x8xf32> to vector<4x8x1xf32>
    %361 = vector.broadcast %360 : vector<4x8x1xf32> to vector<4x8x8xf32>
    %362 = arith.subf %358, %361 : vector<4x8x8xf32>
    %363 = math.exp %362 : vector<4x8x8xf32>
    %cst_176 = arith.constant dense<0.000000e+00> : vector<4x8xf32>
    %364 = vector.multi_reduction <add>, %363, %cst_176 [2] : vector<4x8x8xf32> to vector<4x8xf32>
    %365 = vector.shape_cast %364 : vector<4x8xf32> to vector<4x8x1xf32>
    %366 = tpu.reciprocal %365 {approx = true} : vector<4x8x1xf32> -> vector<4x8x1xf32>
    %367 = vector.broadcast %366 : vector<4x8x1xf32> to vector<4x8x8xf32>
    %368 = arith.mulf %363, %367 : vector<4x8x8xf32>
    %c2_177 = arith.constant 2 : index
    %c0_178 = arith.constant 0 : index
    %c0_179 = arith.constant 0 : index
    %c0_180 = arith.constant 0 : index
    %369 = vector.load %arg12[%c2_177, %c0_178, %c0_179, %c0_180] : memref<4x4x8x8xf32, #tpu.memory_space<vmem>>, vector<1x4x8x8xf32>
    %370 = vector.shape_cast %369 : vector<1x4x8x8xf32> to vector<4x8x8xf32>
    %371 = vector.shape_cast %368 : vector<4x8x8xf32> to vector<1x4x8x8xf32>
    tpu.vector_store %arg12[%c2_177, %c0_178, %c0_179, %c0_180], %371 {strides = array<i32>} : memref<4x4x8x8xf32, #tpu.memory_space<vmem>>, vector<1x4x8x8xf32>,
    %cst_181 = arith.constant dense<0.000000e+00> : vector<4x8x32xf32>
    %372 = tpu.matmul %368, %352, %cst_181 {dimension_numbers = #tpu.dot_dimension_numbers<[2], [1], [1], [2], [0, 0, 0, 1, 1, 2], [0], [0]>} : vector<4x8x8xf32>, vector<4x8x32xf32>, vector<4x8x32xf32> -> vector<4x8x32xf32>
    %373 = vector.extract_strided_slice %372 {offsets = [0, 0, 0], sizes = [2, 8, 32], strides = [1, 1, 1]} : vector<4x8x32xf32> to vector<2x8x32xf32>
    %374 = vector.extract_strided_slice %372 {offsets = [2, 0, 0], sizes = [2, 8, 32], strides = [1, 1, 1]} : vector<4x8x32xf32> to vector<2x8x32xf32>
    %375 = tpu.concatenate %373, %374 in 2 : vector<2x8x32xf32>, vector<2x8x32xf32> -> vector<2x8x64xf32>
    %376 = vector.shape_cast %375 : vector<2x8x64xf32> to vector<16x64xf32>
    %377 = arith.truncf %376 : vector<16x64xf32> to vector<16x64xbf16>
    %c2_182 = arith.constant 2 : index
    %c0_183 = arith.constant 0 : index
    %c0_184 = arith.constant 0 : index
    %378 = vector.load %arg5[%c2_182, %c0_183, %c0_184] : memref<4x64x64xbf16, #tpu.memory_space<vmem>>, vector<1x64x64xbf16>
    %379 = vector.shape_cast %378 : vector<1x64x64xbf16> to vector<64x64xbf16>
    %cst_185 = arith.constant dense<0.000000e+00> : vector<16x64xf32>
    %380 = tpu.matmul %377, %379, %cst_185 {dimension_numbers = #tpu.dot_dimension_numbers<[1], [0], [0], [1], [0, 0, 1, 1], [], []>} : vector<16x64xbf16>, vector<64x64xbf16>, vector<16x64xf32> -> vector<16x64xf32>
    %381 = arith.addf %308, %380 : vector<16x64xf32>
    %382 = vector.broadcast %315 : vector<1x64xf32> to vector<16x64xf32>
    %383 = arith.addf %381, %382 : vector<16x64xf32>
    %cst_186 = arith.constant dense<0.000000e+00> : vector<16xf32>
    %384 = vector.multi_reduction <add>, %383, %cst_186 [1] : vector<16x64xf32> to vector<16xf32>
    %385 = vector.shape_cast %384 : vector<16xf32> to vector<16x1xf32>
    %cst_187 = arith.constant 6.400000e+01 : f32
    %386 = vector.broadcast %cst_187 : f32 to vector<16x1xf32>
    %387 = arith.divf %385, %386 : vector<16x1xf32>
    %388 = vector.broadcast %387 : vector<16x1xf32> to vector<16x64xf32>
    %389 = arith.subf %383, %388 : vector<16x64xf32>
    %390 = arith.mulf %389, %389 : vector<16x64xf32>
    %cst_188 = arith.constant dense<0.000000e+00> : vector<16xf32>
    %391 = vector.multi_reduction <add>, %390, %cst_188 [1] : vector<16x64xf32> to vector<16xf32>
    %392 = vector.shape_cast %391 : vector<16xf32> to vector<16x1xf32>
    %cst_189 = arith.constant 6.400000e+01 : f32
    %393 = vector.broadcast %cst_189 : f32 to vector<16x1xf32>
    %394 = arith.divf %392, %393 : vector<16x1xf32>
    %395 = vector.broadcast %387 : vector<16x1xf32> to vector<16x64xf32>
    %396 = arith.subf %383, %395 : vector<16x64xf32>
    %cst_190 = arith.constant 9.99999974E-6 : f32
    %397 = vector.broadcast %cst_190 : f32 to vector<16x1xf32>
    %398 = arith.addf %394, %397 : vector<16x1xf32>
    %399 = math.rsqrt %398 : vector<16x1xf32>
    %400 = vector.broadcast %399 : vector<16x1xf32> to vector<16x64xf32>
    %401 = arith.mulf %396, %400 : vector<16x64xf32>
    %402 = vector.broadcast %313 : vector<1x64xf32> to vector<16x64xf32>
    %403 = arith.mulf %401, %402 : vector<16x64xf32>
    %404 = vector.broadcast %314 : vector<1x64xf32> to vector<16x64xf32>
    %405 = arith.addf %403, %404 : vector<16x64xf32>
    %406 = arith.truncf %405 : vector<16x64xf32> to vector<16x64xbf16>
    %c2_191 = arith.constant 2 : index
    %c0_192 = arith.constant 0 : index
    %c0_193 = arith.constant 0 : index
    %407 = vector.load %arg6[%c2_191, %c0_192, %c0_193] : memref<4x64x256xbf16, #tpu.memory_space<vmem>>, vector<1x64x256xbf16>
    %408 = vector.shape_cast %407 : vector<1x64x256xbf16> to vector<64x256xbf16>
    %cst_194 = arith.constant dense<0.000000e+00> : vector<16x256xf32>
    %409 = tpu.matmul %406, %408, %cst_194 {dimension_numbers = #tpu.dot_dimension_numbers<[1], [0], [0], [1], [0, 0, 1, 1], [], []>} : vector<16x64xbf16>, vector<64x256xbf16>, vector<16x256xf32> -> vector<16x256xf32>
    %c2_195 = arith.constant 2 : index
    %c0_196 = arith.constant 0 : index
    %c0_197 = arith.constant 0 : index
    %410 = vector.load %arg7[%c2_195, %c0_196, %c0_197] : memref<4x1x256xf32, #tpu.memory_space<vmem>>, vector<1x1x256xf32>
    %411 = vector.shape_cast %410 : vector<1x1x256xf32> to vector<1x256xf32>
    %412 = vector.broadcast %411 : vector<1x256xf32> to vector<16x256xf32>
    %413 = arith.addf %409, %412 : vector<16x256xf32>
    %cst_198 = arith.constant 0.000000e+00 : f32
    %414 = vector.broadcast %cst_198 : f32 to vector<16x256xf32>
    %415 = arith.maximumf %413, %414 : vector<16x256xf32>
    %416 = arith.truncf %415 : vector<16x256xf32> to vector<16x256xbf16>
    %c2_199 = arith.constant 2 : index
    %c0_200 = arith.constant 0 : index
    %c0_201 = arith.constant 0 : index
    %417 = vector.load %arg8[%c2_199, %c0_200, %c0_201] : memref<4x256x64xbf16, #tpu.memory_space<vmem>>, vector<1x256x64xbf16>
    %418 = vector.shape_cast %417 : vector<1x256x64xbf16> to vector<256x64xbf16>
    %cst_202 = arith.constant dense<0.000000e+00> : vector<16x64xf32>
    %419 = tpu.matmul %416, %418, %cst_202 {dimension_numbers = #tpu.dot_dimension_numbers<[1], [0], [0], [1], [0, 0, 1, 1], [], []>} : vector<16x256xbf16>, vector<256x64xbf16>, vector<16x64xf32> -> vector<16x64xf32>
    %420 = vector.broadcast %316 : vector<1x64xf32> to vector<16x64xf32>
    %421 = arith.addf %419, %420 : vector<16x64xf32>
    %422 = arith.addf %383, %421 : vector<16x64xf32>
    %c3_203 = arith.constant 3 : index
    %c0_204 = arith.constant 0 : index
    %c0_205 = arith.constant 0 : index
    %423 = vector.load %arg9[%c3_203, %c0_204, %c0_205] : memref<4x6x64xf32, #tpu.memory_space<vmem>>, vector<1x6x64xf32>
    %424 = vector.shape_cast %423 : vector<1x6x64xf32> to vector<6x64xf32>
    %425 = vector.extract_strided_slice %424 {offsets = [0, 0], sizes = [1, 64], strides = [1, 1]} : vector<6x64xf32> to vector<1x64xf32>
    %426 = vector.extract_strided_slice %424 {offsets = [1, 0], sizes = [1, 64], strides = [1, 1]} : vector<6x64xf32> to vector<1x64xf32>
    %427 = vector.extract_strided_slice %424 {offsets = [2, 0], sizes = [1, 64], strides = [1, 1]} : vector<6x64xf32> to vector<1x64xf32>
    %428 = vector.extract_strided_slice %424 {offsets = [3, 0], sizes = [1, 64], strides = [1, 1]} : vector<6x64xf32> to vector<1x64xf32>
    %429 = vector.extract_strided_slice %424 {offsets = [4, 0], sizes = [1, 64], strides = [1, 1]} : vector<6x64xf32> to vector<1x64xf32>
    %430 = vector.extract_strided_slice %424 {offsets = [5, 0], sizes = [1, 64], strides = [1, 1]} : vector<6x64xf32> to vector<1x64xf32>
    %cst_206 = arith.constant dense<0.000000e+00> : vector<16xf32>
    %431 = vector.multi_reduction <add>, %422, %cst_206 [1] : vector<16x64xf32> to vector<16xf32>
    %432 = vector.shape_cast %431 : vector<16xf32> to vector<16x1xf32>
    %cst_207 = arith.constant 6.400000e+01 : f32
    %433 = vector.broadcast %cst_207 : f32 to vector<16x1xf32>
    %434 = arith.divf %432, %433 : vector<16x1xf32>
    %435 = vector.broadcast %434 : vector<16x1xf32> to vector<16x64xf32>
    %436 = arith.subf %422, %435 : vector<16x64xf32>
    %437 = arith.mulf %436, %436 : vector<16x64xf32>
    %cst_208 = arith.constant dense<0.000000e+00> : vector<16xf32>
    %438 = vector.multi_reduction <add>, %437, %cst_208 [1] : vector<16x64xf32> to vector<16xf32>
    %439 = vector.shape_cast %438 : vector<16xf32> to vector<16x1xf32>
    %cst_209 = arith.constant 6.400000e+01 : f32
    %440 = vector.broadcast %cst_209 : f32 to vector<16x1xf32>
    %441 = arith.divf %439, %440 : vector<16x1xf32>
    %442 = vector.broadcast %434 : vector<16x1xf32> to vector<16x64xf32>
    %443 = arith.subf %422, %442 : vector<16x64xf32>
    %cst_210 = arith.constant 9.99999974E-6 : f32
    %444 = vector.broadcast %cst_210 : f32 to vector<16x1xf32>
    %445 = arith.addf %441, %444 : vector<16x1xf32>
    %446 = math.rsqrt %445 : vector<16x1xf32>
    %447 = vector.broadcast %446 : vector<16x1xf32> to vector<16x64xf32>
    %448 = arith.mulf %443, %447 : vector<16x64xf32>
    %449 = vector.broadcast %425 : vector<1x64xf32> to vector<16x64xf32>
    %450 = arith.mulf %448, %449 : vector<16x64xf32>
    %451 = vector.broadcast %426 : vector<1x64xf32> to vector<16x64xf32>
    %452 = arith.addf %450, %451 : vector<16x64xf32>
    %453 = arith.truncf %452 : vector<16x64xf32> to vector<16x64xbf16>
    %c3_211 = arith.constant 3 : index
    %c0_212 = arith.constant 0 : index
    %c0_213 = arith.constant 0 : index
    %454 = vector.load %arg4[%c3_211, %c0_212, %c0_213] : memref<4x64x192xbf16, #tpu.memory_space<vmem>>, vector<1x64x192xbf16>
    %455 = vector.shape_cast %454 : vector<1x64x192xbf16> to vector<64x192xbf16>
    %cst_214 = arith.constant dense<0.000000e+00> : vector<16x192xf32>
    %456 = tpu.matmul %453, %455, %cst_214 {dimension_numbers = #tpu.dot_dimension_numbers<[1], [0], [0], [1], [0, 0, 1, 1], [], []>} : vector<16x64xbf16>, vector<64x192xbf16>, vector<16x192xf32> -> vector<16x192xf32>
    %457 = vector.shape_cast %456 : vector<16x192xf32> to vector<2x8x192xf32>
    %458 = vector.extract_strided_slice %457 {offsets = [0, 0, 0], sizes = [2, 8, 32], strides = [1, 1, 1]} : vector<2x8x192xf32> to vector<2x8x32xf32>
    %459 = vector.extract_strided_slice %457 {offsets = [0, 0, 32], sizes = [2, 8, 32], strides = [1, 1, 1]} : vector<2x8x192xf32> to vector<2x8x32xf32>
    %460 = tpu.concatenate %458, %459 in 0 : vector<2x8x32xf32>, vector<2x8x32xf32> -> vector<4x8x32xf32>
    %461 = vector.extract_strided_slice %457 {offsets = [0, 0, 64], sizes = [2, 8, 32], strides = [1, 1, 1]} : vector<2x8x192xf32> to vector<2x8x32xf32>
    %462 = vector.extract_strided_slice %457 {offsets = [0, 0, 96], sizes = [2, 8, 32], strides = [1, 1, 1]} : vector<2x8x192xf32> to vector<2x8x32xf32>
    %463 = tpu.concatenate %461, %462 in 0 : vector<2x8x32xf32>, vector<2x8x32xf32> -> vector<4x8x32xf32>
    %464 = vector.extract_strided_slice %457 {offsets = [0, 0, 128], sizes = [2, 8, 32], strides = [1, 1, 1]} : vector<2x8x192xf32> to vector<2x8x32xf32>
    %465 = vector.extract_strided_slice %457 {offsets = [0, 0, 160], sizes = [2, 8, 32], strides = [1, 1, 1]} : vector<2x8x192xf32> to vector<2x8x32xf32>
    %466 = tpu.concatenate %464, %465 in 0 : vector<2x8x32xf32>, vector<2x8x32xf32> -> vector<4x8x32xf32>
    %cst_215 = arith.constant dense<0.000000e+00> : vector<4x8x8xf32>
    %467 = tpu.matmul %460, %463, %cst_215 {dimension_numbers = #tpu.dot_dimension_numbers<[2], [2], [1], [1], [0, 0, 0, 1, 1, 1], [0], [0]>} : vector<4x8x32xf32>, vector<4x8x32xf32>, vector<4x8x8xf32> -> vector<4x8x8xf32>
    %cst_216 = arith.constant 0.176776692 : f32
    %468 = vector.broadcast %cst_216 : f32 to vector<4x8x8xf32>
    %469 = arith.mulf %467, %468 : vector<4x8x8xf32>
    %c3_217 = arith.constant 3 : index
    %c0_218 = arith.constant 0 : index
    %c0_219 = arith.constant 0 : index
    %c0_220 = arith.constant 0 : index
    %470 = vector.load %arg3[%c3_217, %c0_218, %c0_219, %c0_220] : memref<4x4x8x8xf32, #tpu.memory_space<vmem>>, vector<1x4x8x8xf32>
    %471 = vector.shape_cast %470 : vector<1x4x8x8xf32> to vector<4x8x8xf32>
    %472 = arith.addf %469, %471 : vector<4x8x8xf32>
    %cst_221 = arith.constant dense<0xFF800000> : vector<4x8xf32>
    %473 = vector.multi_reduction <maximumf>, %472, %cst_221 [2] : vector<4x8x8xf32> to vector<4x8xf32>
    %474 = vector.shape_cast %473 : vector<4x8xf32> to vector<4x8x1xf32>
    %475 = vector.broadcast %474 : vector<4x8x1xf32> to vector<4x8x8xf32>
    %476 = arith.subf %472, %475 : vector<4x8x8xf32>
    %477 = math.exp %476 : vector<4x8x8xf32>
    %cst_222 = arith.constant dense<0.000000e+00> : vector<4x8xf32>
    %478 = vector.multi_reduction <add>, %477, %cst_222 [2] : vector<4x8x8xf32> to vector<4x8xf32>
    %479 = vector.shape_cast %478 : vector<4x8xf32> to vector<4x8x1xf32>
    %480 = tpu.reciprocal %479 {approx = true} : vector<4x8x1xf32> -> vector<4x8x1xf32>
    %481 = vector.broadcast %480 : vector<4x8x1xf32> to vector<4x8x8xf32>
    %482 = arith.mulf %477, %481 : vector<4x8x8xf32>
    %c3_223 = arith.constant 3 : index
    %c0_224 = arith.constant 0 : index
    %c0_225 = arith.constant 0 : index
    %c0_226 = arith.constant 0 : index
    %483 = vector.load %arg12[%c3_223, %c0_224, %c0_225, %c0_226] : memref<4x4x8x8xf32, #tpu.memory_space<vmem>>, vector<1x4x8x8xf32>
    %484 = vector.shape_cast %483 : vector<1x4x8x8xf32> to vector<4x8x8xf32>
    %485 = vector.shape_cast %482 : vector<4x8x8xf32> to vector<1x4x8x8xf32>
    tpu.vector_store %arg12[%c3_223, %c0_224, %c0_225, %c0_226], %485 {strides = array<i32>} : memref<4x4x8x8xf32, #tpu.memory_space<vmem>>, vector<1x4x8x8xf32>,
    %cst_227 = arith.constant dense<0.000000e+00> : vector<4x8x32xf32>
    %486 = tpu.matmul %482, %466, %cst_227 {dimension_numbers = #tpu.dot_dimension_numbers<[2], [1], [1], [2], [0, 0, 0, 1, 1, 2], [0], [0]>} : vector<4x8x8xf32>, vector<4x8x32xf32>, vector<4x8x32xf32> -> vector<4x8x32xf32>
    %487 = vector.extract_strided_slice %486 {offsets = [0, 0, 0], sizes = [2, 8, 32], strides = [1, 1, 1]} : vector<4x8x32xf32> to vector<2x8x32xf32>
    %488 = vector.extract_strided_slice %486 {offsets = [2, 0, 0], sizes = [2, 8, 32], strides = [1, 1, 1]} : vector<4x8x32xf32> to vector<2x8x32xf32>
    %489 = tpu.concatenate %487, %488 in 2 : vector<2x8x32xf32>, vector<2x8x32xf32> -> vector<2x8x64xf32>
    %490 = vector.shape_cast %489 : vector<2x8x64xf32> to vector<16x64xf32>
    %491 = arith.truncf %490 : vector<16x64xf32> to vector<16x64xbf16>
    %c3_228 = arith.constant 3 : index
    %c0_229 = arith.constant 0 : index
    %c0_230 = arith.constant 0 : index
    %492 = vector.load %arg5[%c3_228, %c0_229, %c0_230] : memref<4x64x64xbf16, #tpu.memory_space<vmem>>, vector<1x64x64xbf16>
    %493 = vector.shape_cast %492 : vector<1x64x64xbf16> to vector<64x64xbf16>
    %cst_231 = arith.constant dense<0.000000e+00> : vector<16x64xf32>
    %494 = tpu.matmul %491, %493, %cst_231 {dimension_numbers = #tpu.dot_dimension_numbers<[1], [0], [0], [1], [0, 0, 1, 1], [], []>} : vector<16x64xbf16>, vector<64x64xbf16>, vector<16x64xf32> -> vector<16x64xf32>
    %495 = arith.addf %422, %494 : vector<16x64xf32>
    %496 = vector.broadcast %429 : vector<1x64xf32> to vector<16x64xf32>
    %497 = arith.addf %495, %496 : vector<16x64xf32>
    %cst_232 = arith.constant dense<0.000000e+00> : vector<16xf32>
    %498 = vector.multi_reduction <add>, %497, %cst_232 [1] : vector<16x64xf32> to vector<16xf32>
    %499 = vector.shape_cast %498 : vector<16xf32> to vector<16x1xf32>
    %cst_233 = arith.constant 6.400000e+01 : f32
    %500 = vector.broadcast %cst_233 : f32 to vector<16x1xf32>
    %501 = arith.divf %499, %500 : vector<16x1xf32>
    %502 = vector.broadcast %501 : vector<16x1xf32> to vector<16x64xf32>
    %503 = arith.subf %497, %502 : vector<16x64xf32>
    %504 = arith.mulf %503, %503 : vector<16x64xf32>
    %cst_234 = arith.constant dense<0.000000e+00> : vector<16xf32>
    %505 = vector.multi_reduction <add>, %504, %cst_234 [1] : vector<16x64xf32> to vector<16xf32>
    %506 = vector.shape_cast %505 : vector<16xf32> to vector<16x1xf32>
    %cst_235 = arith.constant 6.400000e+01 : f32
    %507 = vector.broadcast %cst_235 : f32 to vector<16x1xf32>
    %508 = arith.divf %506, %507 : vector<16x1xf32>
    %509 = vector.broadcast %501 : vector<16x1xf32> to vector<16x64xf32>
    %510 = arith.subf %497, %509 : vector<16x64xf32>
    %cst_236 = arith.constant 9.99999974E-6 : f32
    %511 = vector.broadcast %cst_236 : f32 to vector<16x1xf32>
    %512 = arith.addf %508, %511 : vector<16x1xf32>
    %513 = math.rsqrt %512 : vector<16x1xf32>
    %514 = vector.broadcast %513 : vector<16x1xf32> to vector<16x64xf32>
    %515 = arith.mulf %510, %514 : vector<16x64xf32>
    %516 = vector.broadcast %427 : vector<1x64xf32> to vector<16x64xf32>
    %517 = arith.mulf %515, %516 : vector<16x64xf32>
    %518 = vector.broadcast %428 : vector<1x64xf32> to vector<16x64xf32>
    %519 = arith.addf %517, %518 : vector<16x64xf32>
    %520 = arith.truncf %519 : vector<16x64xf32> to vector<16x64xbf16>
    %c3_237 = arith.constant 3 : index
    %c0_238 = arith.constant 0 : index
    %c0_239 = arith.constant 0 : index
    %521 = vector.load %arg6[%c3_237, %c0_238, %c0_239] : memref<4x64x256xbf16, #tpu.memory_space<vmem>>, vector<1x64x256xbf16>
    %522 = vector.shape_cast %521 : vector<1x64x256xbf16> to vector<64x256xbf16>
    %cst_240 = arith.constant dense<0.000000e+00> : vector<16x256xf32>
    %523 = tpu.matmul %520, %522, %cst_240 {dimension_numbers = #tpu.dot_dimension_numbers<[1], [0], [0], [1], [0, 0, 1, 1], [], []>} : vector<16x64xbf16>, vector<64x256xbf16>, vector<16x256xf32> -> vector<16x256xf32>
    %c3_241 = arith.constant 3 : index
    %c0_242 = arith.constant 0 : index
    %c0_243 = arith.constant 0 : index
    %524 = vector.load %arg7[%c3_241, %c0_242, %c0_243] : memref<4x1x256xf32, #tpu.memory_space<vmem>>, vector<1x1x256xf32>
    %525 = vector.shape_cast %524 : vector<1x1x256xf32> to vector<1x256xf32>
    %526 = vector.broadcast %525 : vector<1x256xf32> to vector<16x256xf32>
    %527 = arith.addf %523, %526 : vector<16x256xf32>
    %cst_244 = arith.constant 0.000000e+00 : f32
    %528 = vector.broadcast %cst_244 : f32 to vector<16x256xf32>
    %529 = arith.maximumf %527, %528 : vector<16x256xf32>
    %530 = arith.truncf %529 : vector<16x256xf32> to vector<16x256xbf16>
    %c3_245 = arith.constant 3 : index
    %c0_246 = arith.constant 0 : index
    %c0_247 = arith.constant 0 : index
    %531 = vector.load %arg8[%c3_245, %c0_246, %c0_247] : memref<4x256x64xbf16, #tpu.memory_space<vmem>>, vector<1x256x64xbf16>
    %532 = vector.shape_cast %531 : vector<1x256x64xbf16> to vector<256x64xbf16>
    %cst_248 = arith.constant dense<0.000000e+00> : vector<16x64xf32>
    %533 = tpu.matmul %530, %532, %cst_248 {dimension_numbers = #tpu.dot_dimension_numbers<[1], [0], [0], [1], [0, 0, 1, 1], [], []>} : vector<16x256xbf16>, vector<256x64xbf16>, vector<16x64xf32> -> vector<16x64xf32>
    %534 = vector.broadcast %430 : vector<1x64xf32> to vector<16x64xf32>
    %535 = arith.addf %533, %534 : vector<16x64xf32>
    %536 = arith.addf %497, %535 : vector<16x64xf32>
    %c0_249 = arith.constant 0 : index
    %c0_250 = arith.constant 0 : index
    %537 = vector.load %arg10[%c0_249, %c0_250] : memref<2x64xf32, #tpu.memory_space<vmem>>, vector<1x64xf32>
    %c1_251 = arith.constant 1 : index
    %c0_252 = arith.constant 0 : index
    %538 = vector.load %arg10[%c1_251, %c0_252] : memref<2x64xf32, #tpu.memory_space<vmem>>, vector<1x64xf32>
    %cst_253 = arith.constant dense<0.000000e+00> : vector<16xf32>
    %539 = vector.multi_reduction <add>, %536, %cst_253 [1] : vector<16x64xf32> to vector<16xf32>
    %540 = vector.shape_cast %539 : vector<16xf32> to vector<16x1xf32>
    %cst_254 = arith.constant 6.400000e+01 : f32
    %541 = vector.broadcast %cst_254 : f32 to vector<16x1xf32>
    %542 = arith.divf %540, %541 : vector<16x1xf32>
    %543 = vector.broadcast %542 : vector<16x1xf32> to vector<16x64xf32>
    %544 = arith.subf %536, %543 : vector<16x64xf32>
    %545 = arith.mulf %544, %544 : vector<16x64xf32>
    %cst_255 = arith.constant dense<0.000000e+00> : vector<16xf32>
    %546 = vector.multi_reduction <add>, %545, %cst_255 [1] : vector<16x64xf32> to vector<16xf32>
    %547 = vector.shape_cast %546 : vector<16xf32> to vector<16x1xf32>
    %cst_256 = arith.constant 6.400000e+01 : f32
    %548 = vector.broadcast %cst_256 : f32 to vector<16x1xf32>
    %549 = arith.divf %547, %548 : vector<16x1xf32>
    %550 = vector.broadcast %542 : vector<16x1xf32> to vector<16x64xf32>
    %551 = arith.subf %536, %550 : vector<16x64xf32>
    %cst_257 = arith.constant 9.99999974E-6 : f32
    %552 = vector.broadcast %cst_257 : f32 to vector<16x1xf32>
    %553 = arith.addf %549, %552 : vector<16x1xf32>
    %554 = math.rsqrt %553 : vector<16x1xf32>
    %555 = vector.broadcast %554 : vector<16x1xf32> to vector<16x64xf32>
    %556 = arith.mulf %551, %555 : vector<16x64xf32>
    %557 = vector.broadcast %537 : vector<1x64xf32> to vector<16x64xf32>
    %558 = arith.mulf %556, %557 : vector<16x64xf32>
    %559 = vector.broadcast %538 : vector<1x64xf32> to vector<16x64xf32>
    %560 = arith.addf %558, %559 : vector<16x64xf32>
    %561 = vector.shape_cast %560 : vector<16x64xf32> to vector<2x8x64xf32>
    %cst_258 = arith.constant dense<0.000000e+00> : vector<2x64xf32>
    %562 = vector.multi_reduction <add>, %561, %cst_258 [1] : vector<2x8x64xf32> to vector<2x64xf32>
    %cst_259 = arith.constant 8.000000e+00 : f32
    %563 = vector.broadcast %cst_259 : f32 to vector<2x64xf32>
    %564 = arith.divf %562, %563 : vector<2x64xf32>
    %c0_260 = arith.constant 0 : index
    %c0_261 = arith.constant 0 : index
    %565 = vector.load %arg11[%c0_260, %c0_261] : memref<2x64xf32, #tpu.memory_space<vmem>>, vector<2x64xf32>
    tpu.vector_store %arg11[%c0_260, %c0_261], %564 {strides = array<i32>} : memref<2x64xf32, #tpu.memory_space<vmem>>, vector<2x64xf32>,
    return
  }
  func.func @transform_0(%arg0: i32, %arg1: memref<16xi32, #tpu.memory_space<smem>>) -> (i32, i32, i32) {
    %c0_i32 = arith.constant 0 : i32
    %c0_i32_0 = arith.constant 0 : i32
    %c0_i32_1 = arith.constant 0 : i32
    %c0_i32_2 = arith.constant 0 : i32
    return %c0_i32, %c0_i32_0, %c0_i32_1 : i32, i32, i32
  }
  func.func @transform_1(%arg0: i32, %arg1: memref<16xi32, #tpu.memory_space<smem>>) -> (i32, i32, i32, i32) {
    %c0_i32 = arith.constant 0 : i32
    %c0_i32_0 = arith.constant 0 : i32
    %c0_i32_1 = arith.constant 0 : i32
    %c0_i32_2 = arith.constant 0 : i32
    %c0_i32_3 = arith.constant 0 : i32
    return %c0_i32, %c0_i32_0, %c0_i32_1, %c0_i32_2 : i32, i32, i32, i32
  }
  func.func @transform_2(%arg0: i32, %arg1: memref<16xi32, #tpu.memory_space<smem>>) -> (i32, i32, i32) {
    %c0_i32 = arith.constant 0 : i32
    %c0_i32_0 = arith.constant 0 : i32
    %c0_i32_1 = arith.constant 0 : i32
    %c0_i32_2 = arith.constant 0 : i32
    return %c0_i32, %c0_i32_0, %c0_i32_1 : i32, i32, i32
  }
  func.func @transform_3(%arg0: i32, %arg1: memref<16xi32, #tpu.memory_space<smem>>) -> (i32, i32, i32) {
    %c0_i32 = arith.constant 0 : i32
    %c0_i32_0 = arith.constant 0 : i32
    %c0_i32_1 = arith.constant 0 : i32
    %c0_i32_2 = arith.constant 0 : i32
    return %c0_i32, %c0_i32_0, %c0_i32_1 : i32, i32, i32
  }
  func.func @transform_4(%arg0: i32, %arg1: memref<16xi32, #tpu.memory_space<smem>>) -> (i32, i32, i32) {
    %c0_i32 = arith.constant 0 : i32
    %c0_i32_0 = arith.constant 0 : i32
    %c0_i32_1 = arith.constant 0 : i32
    %c0_i32_2 = arith.constant 0 : i32
    return %c0_i32, %c0_i32_0, %c0_i32_1 : i32, i32, i32
  }
  func.func @transform_5(%arg0: i32, %arg1: memref<16xi32, #tpu.memory_space<smem>>) -> (i32, i32, i32) {
    %c0_i32 = arith.constant 0 : i32
    %c0_i32_0 = arith.constant 0 : i32
    %c0_i32_1 = arith.constant 0 : i32
    %c0_i32_2 = arith.constant 0 : i32
    return %c0_i32, %c0_i32_0, %c0_i32_1 : i32, i32, i32
  }
  func.func @transform_6(%arg0: i32, %arg1: memref<16xi32, #tpu.memory_space<smem>>) -> (i32, i32, i32) {
    %c0_i32 = arith.constant 0 : i32
    %c0_i32_0 = arith.constant 0 : i32
    %c0_i32_1 = arith.constant 0 : i32
    %c0_i32_2 = arith.constant 0 : i32
    return %c0_i32, %c0_i32_0, %c0_i32_1 : i32, i32, i32
  }
  func.func @transform_7(%arg0: i32, %arg1: memref<16xi32, #tpu.memory_space<smem>>) -> (i32, i32, i32) {
    %c0_i32 = arith.constant 0 : i32
    %c0_i32_0 = arith.constant 0 : i32
    %c0_i32_1 = arith.constant 0 : i32
    %c0_i32_2 = arith.constant 0 : i32
    return %c0_i32, %c0_i32_0, %c0_i32_1 : i32, i32, i32
  }
  func.func @transform_8(%arg0: i32, %arg1: memref<16xi32, #tpu.memory_space<smem>>) -> (i32, i32) {
    %c0_i32 = arith.constant 0 : i32
    %c0_i32_0 = arith.constant 0 : i32
    %c0_i32_1 = arith.constant 0 : i32
    return %c0_i32, %c0_i32_0 : i32, i32
  }
  func.func @transform_9(%arg0: i32, %arg1: memref<16xi32, #tpu.memory_space<smem>>) -> (i32, i32) {
    %c0_i32 = arith.constant 0 : i32
    %c0_i32_0 = arith.constant 0 : i32
    %c0_i32_1 = arith.constant 0 : i32
    return %c0_i32, %c0_i32_0 : i32, i32
  }
  func.func @transform_10(%arg0: i32, %arg1: memref<16xi32, #tpu.memory_space<smem>>) -> (i32, i32, i32, i32) {
    %c0_i32 = arith.constant 0 : i32
    %c0_i32_0 = arith.constant 0 : i32
    %c0_i32_1 = arith.constant 0 : i32
    %c0_i32_2 = arith.constant 0 : i32
    %c0_i32_3 = arith.constant 0 : i32
    return %c0_i32, %c0_i32_0, %c0_i32_1, %c0_i32_2 : i32, i32, i32, i32
  }
}

</mosaic_0001>

<bundles_post_ra>
// kernel: model_forward.1
= control target key start
LH: loop header
LB: loop body
LE: loop exit
PB: predicated region body
PF: predicated region fallthrough
CT: control target
= control target key end

     0   :  { %s7508_s0 = inlined_call_operand.vmem [shape: s32[16], index: 0, kind: input, shape index: {}]   ;;  %s7509_s1 = inlined_call_operand.vmem [shape: f32[50,1,64], index: 1, kind: input, shape index: {}]   ;;  %s7510_s2 = inlined_call_operand.vmem [shape: f32[4,4,8,8], index: 2, kind: input, shape index: {}]   ;;  %s7511_s3 = inlined_call_operand.vmem [shape: bf16[4,64,192], index: 3, kind: input, shape index: {}]   ;;  %s7512_s4 = inlined_call_operand.vmem [shape: bf16[4,64,64], index: 4, kind: input, shape index: {}]   ;;  %s7513_s5 = inlined_call_operand.vmem [shape: bf16[4,64,256], index: 5, kind: input, shape index: {}]   ;;  %s7514_s6 = inlined_call_operand.vmem [shape: f32[4,1,256], index: 6, kind: input, shape index: {}]   ;;  %s7515_s7 = inlined_call_operand.vmem [shape: bf16[4,256,64], index: 7, kind: input, shape index: {}]   ;;  %s7516_s8 = inlined_call_operand.vmem [shape: f32[4,6,64], index: 8, kind: input, shape index: {}]   ;;  %s7517_s9 = inlined_call_operand.vmem [shape: f32[2,64], index: 9, kind: input, shape index: {}]   ;;  %s7518_s10 = inlined_call_operand.hbm [shape: f32[2,64], index: 10, kind: output, shape index: {0}]   ;;  %s7519_s11 = inlined_call_operand.vmem [shape: f32[4,4,8,8], index: 11, kind: output, shape index: {1}]  }
   0x1   :  { %7524 = sst [smem:[#allocation9_spill]] %s7514_s6  ;;  %s17_s19 = sshll.u32 %s7508_s0, 4  ;;  %s18_s19 = int_to_ptr.vmem [resolvable:$true] %s17_s19 }
   0x2   :  { %7525 = sst [smem:[#allocation10_spill]] %s7515_s7  ;;  %s6239_s20 = scalar_lea.vmem %s18_s19, 16 }
   0x3   :  { %7526 = sst [smem:[#allocation11_spill]] %s7517_s9  ;;  %p6240_p0 = scmp.ne.s32.totalorder %s18_s19, %s6239_s20 }
   0x4   :  { %7527 = sst [smem:[#allocation12_spill]] %s7518_s10  ;;  %p6244_p1 = scmp.lt.s32.totalorder %s18_s19, %s18_s19 }
   0x5   :  { %p6245_p2 = scmp.lt.s32.totalorder %s6239_s20, %s6239_s20 }
   0x7   :  { %p6246_p3 = por %p6245_p2, %p6244_p1 }
   0x9   :  { %p6247_p4 = pnand %p6246_p3, %p6240_p0 }
   0xb   :  { %6250 = shalt.err (!%p6247_p4)  }
   0xc   :  { %s6277_s21 = smov [#allocation4]  }
   0xd   :  { %20 = dma.vmem_to_smem %s18_s19, 16, %s6277_s21, [#allocation3] }
   0xe   :  { %6273 = dma.done.wait [#allocation3], 16 }
   0xf   :  { %6274 = vsyncadd [#allocation3], 4294967280 }
  0x10   :  { %22 = sfence }
  0x11   :  { %s43_s22 = sld [smem:[#allocation4]]  ;;  %vm46_vm0 = vcmask 516096   ;;  %s5136_s23 = sld [smem:[#allocation4 + $0x1]]  ;;  %vm111_vm1 = vcmask 523264  }
  0x12   :  { %s5137_s24 = sld [smem:[#allocation4 + $0x2]]  ;;  %s5138_s25 = sld [smem:[#allocation4 + $0x3]] }
  0x13   :  { %s5139_s26 = sld [smem:[#allocation4 + $0x4]]  ;;  %s5140_s0 = sld [smem:[#allocation4 + $0x5]] }
  0x14   :  { %s5141_s27 = sld [smem:[#allocation4 + $0x6]]  ;;  %s5142_s28 = sld [smem:[#allocation4 + $0x7]] }
  0x15   :  { %s6348_s29 = sld [smem:[#allocation4 + $0x8]]  ;;  %s6350_s30 = sld [smem:[#allocation4 + $0x9]] }
  0x16   :  { %s6352_s12 = sld [smem:[#allocation4 + $0xa]]  ;;  %s6354_s13 = sld [smem:[#allocation4 + $0xb]] }
  0x17   :  { %s44_s16 = scalar_lea.vmem %s7509_s1, %s43_s22  ;;  %s49_s19 = scalar_lea.vmem %s7509_s1, %s5136_s23 }
  0x18   :  { %v45_v0 = vld [vmem:[%s44_s16] sm:$0x1]  ;;  %s53_s10 = scalar_lea.vmem %s7509_s1, %s5137_s24  ;;  %s57_s7 = scalar_lea.vmem %s7509_s1, %s5138_s25 }
  0x19   :  { %v50_v1 = vld [vmem:[%s49_s19] sm:$0x1]  ;;  %47 = vst.msk [vmem:[#allocation2] sm:$0x1] %vm46_vm0, %v45_v0  ;;  %s61_s14 = scalar_lea.vmem %s7509_s1, %s5139_s26  ;;  %s65_s24 = scalar_lea.vmem %s7509_s1, %s5140_s0 }
  0x1a   :  { %51 = vst.msk [vmem:[#allocation2 + $0x1] sm:$0x1] %vm46_vm0, %v50_v1  ;;  %v54_v2 = vld [vmem:[%s53_s10] sm:$0x1]  ;;  %s73_s26 = scalar_lea.vmem %s7509_s1, %s5142_s28  ;;  %s5149_s16 = sld [smem:[#allocation4 + $0xe]] }
  0x1b   :  { %v58_v3 = vld [vmem:[%s57_s7] sm:$0x1]  ;;  %55 = vst.msk [vmem:[#allocation2 + $0x2] sm:$0x1] %vm46_vm0, %v54_v2  ;;  %s69_s7 = scalar_lea.vmem %s7509_s1, %s5141_s27  ;;  %s77_s18 = scalar_lea.vmem %s7509_s1, %s6348_s29 }
  0x1c   :  { %59 = vst.msk [vmem:[#allocation2 + $0x3] sm:$0x1] %vm46_vm0, %v58_v3  ;;  %v62_v4 = vld [vmem:[%s61_s14] sm:$0x1]  ;;  %s81_s21 = scalar_lea.vmem %s7509_s1, %s6350_s30  ;;  %s85_s22 = scalar_lea.vmem %s7509_s1, %s6352_s12 }
  0x1d   :  { %v66_v5 = vld [vmem:[%s65_s24] sm:$0x1]  ;;  %63 = vst.msk [vmem:[#allocation2 + $0x4] sm:$0x1] %vm46_vm0, %v62_v4  ;;  %s89_s15 = scalar_lea.vmem %s7509_s1, %s6354_s13  ;;  %s5147_s29 = sld [smem:[#allocation4 + $0xc]] }
  0x1e   :  { %67 = vst.msk [vmem:[#allocation2 + $0x5] sm:$0x1] %vm46_vm0, %v66_v5  ;;  %v70_v6 = vld [vmem:[%s69_s7] sm:$0x1]  ;;  %s5148_s30 = sld [smem:[#allocation4 + $0xd]]  ;;  %s5150_s24 = sld [smem:[#allocation4 + $0xf]] }
  0x1f   :  { %v74_v7 = vld [vmem:[%s73_s26] sm:$0x1]  ;;  %71 = vst.msk [vmem:[#allocation2 + $0x6] sm:$0x1] %vm46_vm0, %v70_v6 }
  0x20   :  { %75 = vst.msk [vmem:[#allocation2 + $0x7] sm:$0x1] %vm46_vm0, %v74_v7  ;;  %v78_v8 = vld [vmem:[%s77_s18] sm:$0x1]  ;;  %s101_s0 = scalar_lea.vmem %s7509_s1, %s5149_s16 }
  0x21   :  { %v82_v9 = vld [vmem:[%s81_s21] sm:$0x1]  ;;  %79 = vst.msk [vmem:[#allocation2 + $0x8] sm:$0x1] %vm46_vm0, %v78_v8 }
  0x22   :  { %83 = vst.msk [vmem:[#allocation2 + $0x9] sm:$0x1] %vm46_vm0, %v82_v9  ;;  %v86_v10 = vld [vmem:[%s85_s22] sm:$0x1] }
  0x23   :  { %v90_v11 = vld [vmem:[%s89_s15] sm:$0x1]  ;;  %87 = vst.msk [vmem:[#allocation2 + $0xa] sm:$0x1] %vm46_vm0, %v86_v10  ;;  %s93_s13 = scalar_lea.vmem %s7509_s1, %s5147_s29 }
  0x24   :  { %91 = vst.msk [vmem:[#allocation2 + $0xb] sm:$0x1] %vm46_vm0, %v90_v11  ;;  %v94_v14 = vld [vmem:[%s93_s13] sm:$0x1]  ;;  %s97_s10 = scalar_lea.vmem %s7509_s1, %s5148_s30  ;;  %s105_s19 = scalar_lea.vmem %s7509_s1, %s5150_s24 }
  0x25   :  { %95 = vst.msk [vmem:[#allocation2 + $0xc] sm:$0x1] %vm46_vm0, %v94_v14  ;;  %v98_v15 = vld [vmem:[%s97_s10] sm:$0x1] }
  0x26   :  { %v102_v16 = vld [vmem:[%s101_s0] sm:$0x1]  ;;  %99 = vst.msk [vmem:[#allocation2 + $0xd] sm:$0x1] %vm46_vm0, %v98_v15 }
  0x27   :  { %v6408_v12 = vld [vmem:[#allocation2] sm:$0xff]  ;;  %103 = vst.msk [vmem:[#allocation2 + $0xe] sm:$0x1] %vm46_vm0, %v102_v16 }
  0x28   :  { %v112_v13 = vsel %vm111_vm1, %v6408_v12, 0.0  ;;  %v106_v17 = vld [vmem:[%s105_s19] sm:$0x1] }
  0x29   :  { %113 = vadd.xlane.f32.xlu0 %v112_v13  ;;  %107 = vst.msk [vmem:[#allocation2 + $0xf] sm:$0x1] %vm46_vm0, %v106_v17 }
  0x30   :  { %v6428_v18 = vld [vmem:[#allocation2 + $0x8] sm:$0xff] }
  0x31   :  { %v115_v19 = vsel %vm111_vm1, %v6428_v18, 0.0 }
  0x32   :  { %116 = vadd.xlane.f32.xlu0 %v115_v19 }
  0x33   :  { %23 = vsyncpa [#allocation6], 0  ;;  %v5963_v30 = vld [vmem:[%s7511_s3 + $0x4] ss:$8 sps:$4 sm:$0xff]   ;;  %v5965_v31 = vld [vmem:[%s7511_s3] ss:$8 sps:$4 sm:$0xff]   ;;  %v139_v43 = vlaneseq }
  0x34   :  { %v5966_v32 = vld [vmem:[%s7511_s3 + $0x14] ss:$8 sps:$4 sm:$0xff]   ;;  %203 = vmatprep.subr.bf16.mxu0 %v5963_v30  ;;  %v5968_v33 = vld [vmem:[%s7511_s3 + $0x10] ss:$8 sps:$4 sm:$0xff]   ;;  %v6278_v34 = vmov 0   ;;  %v6279_v61 = vmov 0.0  }
  0x35   :  { %204 = vmatpush1.bf16.msra.mxu0 %v5965_v31  ;;  %235 = vmatprep.mubr.bf16.mxu0 %v6278_v34  ;;  %v5969_v35 = vld [vmem:[%s7511_s3 + $0x24] ss:$8 sps:$4 sm:$0xff]   ;;  %v5971_v36 = vld [vmem:[%s7511_s3 + $0x20] ss:$8 sps:$4 sm:$0xff]   ;;  %v5972_v37 = vld [vmem:[%s7511_s3 + $0x34] ss:$8 sps:$4 sm:$0xff]  }
  0x36   :  { %205 = vmatprep.subr.bf16.mxu0 %v5966_v32  ;;  %v5974_v38 = vld [vmem:[%s7511_s3 + $0x30] ss:$8 sps:$4 sm:$0xff]   ;;  %v6461_v46 = vshrl.u32 %v139_v43, 7  ;;  %v6469_v49 = vld [vmem:[%s7516_s8] sm:$0x3f]  ;;  %5727 = vmatprep.subr.mxu1 %v6279_v61  ;;  %vm6280_vm2 = vmmov 0  }
  0x37   :  { %5729 = vmatprep.mubr.msk.f32.mxu1 %vm6280_vm2, %v6279_v61  ;;  %s6281_s10 = smov 96   ;;  %s6282_s25 = smov 64   ;;  %vm262_vm3 = vcmask 261120   ;;  %v569_v9 = vld [vmem:[%s7510_s2] sm:$0xff]  ;;  %vm577_vm4 = vcmask 64512   ;;  %v570_v15 = vld [vmem:[%s7510_s2 + $0x8] sm:$0xff] }
  0x38   :  { %v6464_v47 = vsub.s32 0, %v6461_v46  ;;  %v6474_v52 = vsub.s32 1, %v6461_v46  ;;  %s6283_s0 = smov 32   ;;  %s7528_s13 = sld [smem:[#allocation10_spill]]  ;;  %vm5097_vm5 = vcmask 1041409   ;;  %vm5100_vm6 = vcmask 517120  }
  0x39   :  { %206 = vmatpush1.bf16.msra.mxu0 %v5968_v33  ;;  %s7529_s22 = sld [smem:[#allocation9_spill]]  ;;  %s7530_s19 = sld [smem:[#allocation11_spill]] }
  0x3a   :  { %207 = vmatprep.subr.bf16.mxu0 %v5969_v35  ;;  %v142_v51 = vrot.slane %v6469_v49, %v6464_v47  ;;  %v148_v56 = vrot.slane %v6469_v49, %v6474_v52 }
  0x3d   :  { %208 = vmatpush1.bf16.msra.mxu0 %v5971_v36 }
  0x3e   :  { %209 = vmatprep.subr.bf16.mxu0 %v5972_v37 }
  0x41   :  { %210 = vmatpush1.bf16.msra.mxu0 %v5974_v38 }
  0x42   :  { %5752 = vmatprep.subr.mxu0 %v6279_v61 }
  0xb6   :  { %v114_v20 = vpop.xlane.xlu0 %113 }
  0xb7   :  { %v119_v21 = vmul.f32 0.015625, %v114_v20 }
  0xb9   :  { %v121_v22 = vsub.f32 %v6408_v12, %v119_v21 }
  0xbb   :  { %v123_v23 = vmul.f32 %v121_v22, %v121_v22 }
  0xbd   :  { %v125_v24 = vsel %vm111_vm1, %v123_v23, 0.0  ;;  %v571_v23 = vld [vmem:[%s7510_s2 + $0x10] sm:$0xff] }
  0xbe   :  { %126 = vadd.xlane.f32.xlu1 %v125_v24 }
  0xbf   :  { %v117_v25 = vpop.xlane.xlu0 %116 }
  0xc0   :  { %v120_v26 = vmul.f32 0.015625, %v117_v25 }
  0xc2   :  { %v122_v27 = vsub.f32 %v6428_v18, %v120_v26 }
  0xc4   :  { %v124_v28 = vmul.f32 %v122_v27, %v122_v27 }
  0xc6   :  { %v128_v29 = vsel %vm111_vm1, %v124_v28, 0.0  ;;  %v572_v28 = vld [vmem:[%s7510_s2 + $0x18] sm:$0xff] }
  0xc7   :  { %129 = vadd.xlane.f32.xlu1 %v128_v29 }
 0x14b   :  { %v127_v39 = vpop.xlane.xlu1 %126 }
 0x14c   :  { %v131_v40 = vmul.f32 0.015625, %v127_v39 }
 0x14e   :  { %v133_v41 = vadd.f32 1e-05, %v131_v40 }
 0x150   :  { %6139 = vrsqrt.f32 %v133_v41 }
 0x154   :  { %v130_v42 = vpop.xlane.xlu1 %129 }
 0x155   :  { %v132_v44 = vmul.f32 0.015625, %v130_v42 }
 0x157   :  { %v134_v45 = vadd.f32 1e-05, %v132_v44 }
 0x159   :  { %6141 = vrsqrt.f32 %v134_v45 }
 0x15a   :  { %v6140_v48 = vpop.eup %6139 }
 0x15b   :  { %v137_v50 = vmul.f32 %v6140_v48, %v121_v22 }
 0x15d   :  { %v143_v55 = vmul.f32 %v142_v51, %v137_v50 }
 0x15f   :  { %v149_v58 = vadd.f32 %v148_v56, %v143_v55 }
 0x163   :  { %v6142_v53 = vpop.eup %6141 }
 0x164   :  { %v138_v54 = vmul.f32 %v6142_v53, %v122_v27 }
 0x166   :  { %v144_v57 = vmul.f32 %v142_v51, %v138_v54 }
 0x168   :  { %v150_v59 = vadd.f32 %v148_v56, %v144_v57 }
 0x16a   :  { %v151_v60 = vpack.c.bf16 %v150_v59, %v149_v58 }
 0x16c   :  { %5159 = vmatmul.mubr.msk.bf16.vlgmr.msra.gmra.mrb[0].mxu0 %vm111_vm1, %v151_v60 }
 0x16d   :  { %5754 = vmatprep.mubr.msk.f32.mxu0 %vm6280_vm2, %v6279_v61 }
 0x23f   :  { %v237_v62 = vpop.f32.mrb[0].mxu0 }
 0x240   :  { %248 = vrot.lane.b32.xlu0 %v237_v62, %s6281_s10  ;;  %v6486_v63 = vpop.f32.mrb[1].mxu0 }
 0x241   :  { %v241_v0 = vpop.f32.mrb[2].mxu0 }
 0x242   :  { %250 = vrot.lane.b32.xlu1 %v241_v0, %s6281_s10  ;;  %v6489_v1 = vpop.f32.mrb[3].mxu0 }
 0x243   :  { %5753 = vmatpush3.msra.mxu0 %v6489_v1 }
 0x244   :  { %5762 = vmatprep.subr.mxu0 %v6279_v61 }
 0x246   :  { %260 = vrot.lane.b32.xlu1 %v237_v62, %s6282_s25 }
 0x24a   :  { %337 = vrot.lane.b32.xlu1 %v241_v0, %s6282_s25 }
 0x2b2   :  { %v249_v2 = vpop.permute.xlu0 %248 }
 0x2b3   :  { %413 = vrot.lane.b32.xlu0 %v249_v2, %s6282_s25 }
 0x2b4   :  { %v251_v3 = vpop.permute.xlu1 %250 }
 0x2b5   :  { %489 = vrot.lane.b32.xlu1 %v251_v3, %s6282_s25 }
 0x2b8   :  { %v261_v4 = vpop.permute.xlu1 %260 }
 0x2b9   :  { %5728 = vmatpush3.xpose.msk.msra.mxu1 %vm262_vm3, %v261_v4 }
 0x2ba   :  { %5732 = vmatprep.subr.mxu1 %v6279_v61 }
 0x2bc   :  { %5730 = vmatmul.mubr.msk.f32.vlgmr.msra.gmra.mrb[0].mxu1 %vm262_vm3, %v237_v62  ;;  %v338_v5 = vpop.permute.xlu1 %337 }
 0x2bd   :  { %5733 = vmatpush3.xpose.msk.msra.mxu1 %vm262_vm3, %v338_v5  ;;  %5734 = vmatprep.mubr.msk.f32.mxu1 %vm6280_vm2, %v6279_v61 }
 0x2be   :  { %5737 = vmatprep.subr.mxu1 %v6279_v61 }
 0x2c0   :  { %5735 = vmatmul.mubr.msk.f32.vlgmr.msra.gmra.mrb[2].mxu1 %vm262_vm3, %v241_v0 }
 0x2c1   :  { %5739 = vmatprep.mubr.msk.f32.mxu1 %vm6280_vm2, %v6279_v61 }
 0x325   :  { %v414_v6 = vpop.permute.xlu0 %413 }
 0x326   :  { %5738 = vmatpush3.xpose.msk.msra.mxu1 %vm262_vm3, %v414_v6 }
 0x327   :  { %5742 = vmatprep.subr.mxu1 %v6279_v61  ;;  %v490_v7 = vpop.permute.xlu1 %489 }
 0x329   :  { %5740 = vmatmul.mubr.msk.f32.vlgmr.msra.gmra.mrb[4].mxu1 %vm262_vm3, %v249_v2 }
 0x32a   :  { %5743 = vmatpush3.xpose.msk.msra.mxu1 %vm262_vm3, %v490_v7  ;;  %5744 = vmatprep.mubr.msk.f32.mxu1 %vm6280_vm2, %v6279_v61 }
 0x32b   :  { %5747 = vmatprep.subr.mxu1 %v6279_v61 }
 0x32d   :  { %5745 = vmatmul.mubr.msk.f32.vlgmr.msra.gmra.mrb[6].mxu1 %vm262_vm3, %v251_v3 }
 0x32e   :  { %5748 = vmatpush3.msra.mxu1 %v6486_v63  ;;  %5749 = vmatprep.mubr.msk.f32.mxu1 %vm6280_vm2, %v6279_v61 }
 0x32f   :  { %5757 = vmatprep.subr.mxu1 %v6279_v61 }
 0x38f   :  { %v333_v8 = vpop.f32.mrb[0].mxu1 }
 0x390   :  { %v565_v10 = vmul.f32 0.17677669, %v333_v8  ;;  %v5731_v11 = vpop.f32.mrb[1].mxu1 }
 0x391   :  { %v5976_v11 = vld [vmem:[%s7512_s4 + $0x8] sm:$0xff]  }
 0x392   :  { %v573_v13 = vadd.f32 %v569_v9, %v565_v10  ;;  %v5975_v10 = vld [vmem:[%s7512_s4] sm:$0xff]  }
 0x393   :  { %v409_v14 = vpop.f32.mrb[2].mxu1 }
 0x394   :  { %v566_v16 = vmul.f32 0.17677669, %v409_v14  ;;  %v5736_v17 = vpop.f32.mrb[3].mxu1  ;;  %v578_v19 = vsel %vm577_vm4, %v573_v13, -inf }
 0x395   :  { %579 = vmax.xlane.f32.xlu0 %v578_v19  ;;  %v5978_v19 = vld [vmem:[%s7512_s4 + $0x18] sm:$0xff]  }
 0x396   :  { %v574_v20 = vadd.f32 %v570_v15, %v566_v16 }
 0x398   :  { %v581_v21 = vsel %vm577_vm4, %v574_v20, -inf }
 0x399   :  { %582 = vmax.xlane.f32.xlu1 %v581_v21 }
 0x3fc   :  { %v485_v22 = vpop.f32.mrb[4].mxu1 }
 0x3fd   :  { %v567_v24 = vmul.f32 0.17677669, %v485_v22  ;;  %v5741_v25 = vpop.f32.mrb[5].mxu1 }
 0x3ff   :  { %v575_v26 = vadd.f32 %v571_v23, %v567_v24 }
 0x400   :  { %v561_v27 = vpop.f32.mrb[6].mxu1 }
 0x401   :  { %v568_v29 = vmul.f32 0.17677669, %v561_v27  ;;  %v5746_v30 = vpop.f32.mrb[7].mxu1  ;;  %v584_v31 = vsel %vm577_vm4, %v575_v26, -inf }
 0x402   :  { %585 = vmax.xlane.f32.xlu0 %v584_v31  ;;  %v6591_v31 = vsub.s32 4, %v6461_v46 }
 0x403   :  { %v576_v32 = vadd.f32 %v572_v28, %v568_v29 }
 0x405   :  { %v587_v33 = vsel %vm577_vm4, %v576_v32, -inf }
 0x406   :  { %588 = vmax.xlane.f32.xlu0 %v587_v33 }
 0x422   :  { %v580_v35 = vpop.xlane.xlu0 %579 }
 0x423   :  { %v590_v36 = vsub.f32 %v573_v13, %v580_v35  ;;  %v5977_v13 = vld [vmem:[%s7512_s4 + $0x10] sm:$0xff]  }
 0x425   :  { %v594_v37 = vmul.f32 1.442695, %v590_v36 }
 0x426   :  { %v583_v38 = vpop.xlane.xlu1 %582 }
 0x427   :  { %6143 = vpow2.f32 %v594_v37  ;;  %v591_v39 = vsub.f32 %v574_v20, %v583_v38 }
 0x429   :  { %v596_v40 = vmul.f32 1.442695, %v591_v39 }
 0x42b   :  { %6145 = vpow2.f32 %v596_v40 }
 0x431   :  { %v6144_v41 = vpop.eup %6143 }
 0x432   :  { %v602_v42 = vsel %vm577_vm4, %v6144_v41, 0.0 }
 0x433   :  { %603 = vadd.xlane.f32.xlu0 %v602_v42 }
 0x435   :  { %v6146_v43 = vpop.eup %6145 }
 0x436   :  { %v605_v44 = vsel %vm577_vm4, %v6146_v43, 0.0 }
 0x437   :  { %606 = vadd.xlane.f32.xlu1 %v605_v44 }
 0x48f   :  { %v586_v45 = vpop.xlane.xlu0 %585 }
 0x490   :  { %v592_v48 = vsub.f32 %v575_v26, %v586_v45 }
 0x492   :  { %v598_v50 = vmul.f32 1.442695, %v592_v48 }
 0x493   :  { %v589_v51 = vpop.xlane.xlu0 %588 }
 0x494   :  { %6147 = vpow2.f32 %v598_v50  ;;  %v593_v53 = vsub.f32 %v576_v32, %v589_v51  ;;  %v1010_v32 = vrot.slane %v6469_v49, %v6591_v31 }
 0x496   :  { %v600_v54 = vmul.f32 1.442695, %v593_v53 }
 0x498   :  { %6149 = vpow2.f32 %v600_v54 }
 0x49e   :  { %v6148_v55 = vpop.eup %6147 }
 0x49f   :  { %v608_v56 = vsel %vm577_vm4, %v6148_v55, 0.0 }
 0x4a0   :  { %609 = vadd.xlane.f32.xlu0 %v608_v56  ;;  %v5981_v56 = vld [vmem:[%s7513_s5 + $0x4] ss:$8 sps:$4 sm:$0xff]  }
 0x4a2   :  { %v6150_v57 = vpop.eup %6149 }
 0x4a3   :  { %v611_v58 = vsel %vm577_vm4, %v6150_v57, 0.0 }
 0x4a4   :  { %612 = vadd.xlane.f32.xlu1 %v611_v58  ;;  %v5984_v58 = vld [vmem:[%s7513_s5 + $0x14] ss:$8 sps:$4 sm:$0xff]  }
 0x4b5   :  { %256 = vrot.lane.b32.xlu1 %v6489_v1, %s6281_s10 }
 0x4b6   :  { %254 = vrot.lane.b32.xlu0 %v6486_v63, %s6281_s10 }
 0x4c0   :  { %v604_v59 = vpop.xlane.xlu0 %603 }
 0x4c1   :  { %6151 = vrcp.f32 %v604_v59  ;;  %v5982_v59 = vld [vmem:[%s7513_s5 + $0x10] ss:$8 sps:$4 sm:$0xff]  }
 0x4c4   :  { %v607_v60 = vpop.xlane.xlu1 %606 }
 0x4c5   :  { %6153 = vrcp.f32 %v607_v60  ;;  %v5987_v60 = vld [vmem:[%s7513_s5 + $0x24] ss:$8 sps:$4 sm:$0xff]  }
 0x4cb   :  { %v6152_v62 = vpop.eup %6151 }
 0x4cc   :  { %v618_v0 = vmul.f32 %v6152_v62, %v6144_v41  ;;  %v5985_v62 = vld [vmem:[%s7513_s5 + $0x20] ss:$8 sps:$4 sm:$0xff]  }
 0x4ce   :  { %622 = vst.msk [vmem:[%s7519_s11] sm:$0xff] %vm577_vm4, %v618_v0  ;;  %5750 = vmatmul.mubr.msk.f32.vlgmr.msra.gmra.mrb[8].mxu1 %vm577_vm4, %v618_v0  ;;  %v5988_v0 = vld [vmem:[%s7513_s5 + $0x30] ss:$8 sps:$4 sm:$0xff]  }
 0x4cf   :  { %v6154_v2 = vpop.eup %6153  ;;  %5759 = vmatprep.mubr.msk.f32.mxu1 %vm6280_vm2, %v6279_v61 }
 0x4d0   :  { %v619_v1 = vmul.f32 %v6154_v2, %v6146_v43  ;;  %v5990_v2 = vld [vmem:[%s7513_s5 + $0x34] ss:$8 sps:$4 sm:$0xff]  }
 0x4d2   :  { %623 = vst.msk [vmem:[%s7519_s11 + $0x8] sm:$0xff] %vm577_vm4, %v619_v1  ;;  %5755 = vmatmul.mubr.msk.f32.vlgmr.msra.gmra.mrb[4].mxu0 %vm577_vm4, %v619_v1  ;;  %v5991_v1 = vld [vmem:[%s7528_s13 + $0x40] sm:$0xff]  }
 0x4d3   :  { %5764 = vmatprep.mubr.msk.f32.mxu0 %vm6280_vm2, %v6279_v61 }
 0x52d   :  { %v610_v63 = vpop.xlane.xlu0 %609 }
 0x52e   :  { %6155 = vrcp.f32 %v610_v63  ;;  %v5992_v63 = vld [vmem:[%s7528_s13] sm:$0xff]  }
 0x531   :  { %v255_v3 = vpop.permute.xlu0 %254  ;;  %v613_v4 = vpop.xlane.xlu1 %612 }
 0x532   :  { %6157 = vrcp.f32 %v613_v4  ;;  %5758 = vmatpush3.msra.mxu1 %v255_v3  ;;  %v5993_v3 = vld [vmem:[%s7528_s13 + $0x48] sm:$0xff]  }
 0x533   :  { %5576 = vmatprep.subr.bf16.mxu1 %v5991_v1  ;;  %v5994_v4 = vld [vmem:[%s7528_s13 + $0x8] sm:$0xff]  }
 0x535   :  { %v257_v5 = vpop.permute.xlu1 %256 }
 0x536   :  { %5763 = vmatpush3.msra.mxu0 %v257_v5  ;;  %v5995_v5 = vld [vmem:[%s7528_s13 + $0x50] sm:$0xff]  }
 0x537   :  { %5767 = vmatprep.subr.bf16.mxu0 %v6279_v61 }
 0x538   :  { %v6156_v6 = vpop.eup %6155 }
 0x539   :  { %v620_v7 = vmul.f32 %v6156_v6, %v6148_v55  ;;  %v5996_v6 = vld [vmem:[%s7528_s13 + $0x10] sm:$0xff]  }
 0x53b   :  { %624 = vst.msk [vmem:[%s7519_s11 + $0x10] sm:$0xff] %vm577_vm4, %v620_v7  ;;  %5760 = vmatmul.mubr.msk.f32.vlgmr.msra.gmra.mrb[10].mxu1 %vm577_vm4, %v620_v7  ;;  %v5997_v7 = vld [vmem:[%s7528_s13 + $0x58] sm:$0xff]  }
 0x53c   :  { %v6158_v8 = vpop.eup %6157  ;;  %5577 = vmatpush3.bf16.msra.mxu1 %v5992_v63 }
 0x53d   :  { %v621_v9 = vmul.f32 %v6158_v8, %v6150_v57  ;;  %v5979_v57 = vld [vmem:[%s7513_s5] ss:$8 sps:$4 sm:$0xff]   ;;  %5578 = vmatprep.subr.bf16.mxu1 %v5993_v3  ;;  %v5998_v8 = vld [vmem:[%s7528_s13 + $0x18] sm:$0xff]  }
 0x53f   :  { %625 = vst.msk [vmem:[%s7519_s11 + $0x18] sm:$0xff] %vm577_vm4, %v621_v9  ;;  %5765 = vmatmul.mubr.msk.f32.vlgmr.msra.gmra.mrb[6].mxu0 %vm577_vm4, %v621_v9  ;;  %v5999_v9 = vld [vmem:[%s7528_s13 + $0x60] sm:$0xff]  }
 0x540   :  { %5775 = vmatprep.mubr.msk.bf16.mxu0 %vm6280_vm2, %v6279_v61  ;;  %5768 = vmatpush3.bf16.msra.mxu0 %v5975_v10  ;;  %v6000_v10 = vld [vmem:[%s7528_s13 + $0x20] sm:$0xff]  }
 0x541   :  { %5769 = vmatprep.subr.bf16.mxu0 %v6279_v61  ;;  %5579 = vmatpush3.bf16.msra.mxu1 %v5994_v4 }
 0x542   :  { %5580 = vmatprep.subr.bf16.mxu1 %v5995_v5 }
 0x544   :  { %5770 = vmatpush3.bf16.msra.mxu0 %v5976_v11  ;;  %v6001_v11 = vld [vmem:[%s7528_s13 + $0x68] sm:$0xff]  }
 0x545   :  { %5771 = vmatprep.subr.bf16.mxu0 %v6279_v61  ;;  %5581 = vmatpush3.bf16.msra.mxu1 %v5996_v6 }
 0x546   :  { %5582 = vmatprep.subr.bf16.mxu1 %v5997_v7 }
 0x548   :  { %5772 = vmatpush3.bf16.msra.mxu0 %v5977_v13 }
 0x549   :  { %5773 = vmatprep.subr.bf16.mxu0 %v6279_v61  ;;  %5583 = vmatpush3.bf16.msra.mxu1 %v5998_v8 }
 0x54a   :  { %5584 = vmatprep.subr.bf16.mxu1 %v5999_v9 }
 0x54c   :  { %5774 = vmatpush3.bf16.msra.mxu0 %v5978_v19 }
 0x54d   :  { %1115 = vmatprep.subr.bf16.mxu0 %v5981_v56  ;;  %5585 = vmatpush3.bf16.msra.mxu1 %v6000_v10 }
 0x54e   :  { %5586 = vmatprep.subr.bf16.mxu1 %v6001_v11 }
 0x5a1   :  { %v695_v14 = vpop.f32.mrb[8].mxu1 }
 0x5a2   :  { %v5751_v15 = vpop.f32.mrb[9].mxu1 }
 0x5a5   :  { %v768_v16 = vpop.f32.mrb[4].mxu0 }
 0x5a6   :  { %v5756_v17 = vpop.f32.mrb[5].mxu0 }
 0x60e   :  { %v841_v20 = vpop.f32.mrb[10].mxu1 }
 0x60f   :  { %v5761_v21 = vpop.f32.mrb[11].mxu1 }
 0x612   :  { %v914_v22 = vpop.f32.mrb[6].mxu0 }
 0x613   :  { %v5943_v23 = vpack.i.bf16 %v914_v22, %v841_v20  ;;  %v5766_v24 = vpop.f32.mrb[7].mxu0  ;;  %v6667_v20 = vsub.s32 2, %v6461_v46 }
 0x614   :  { %v6672_v24 = vsub.s32 3, %v6461_v46 }
 0x615   :  { %5944 = vrot.lane.b32.xlu1 %v5943_v23, %s6283_s0  ;;  %v1042_v22 = vrot.slane %v6469_v49, %v6667_v20 }
 0x687   :  { %v5945_v25 = vpop.permute.xlu1 %5944 }
 0x688   :  { %v5947_v26 = vunpack.i.h.bf16 %v5945_v25  ;;  %v5946_v27 = vunpack.i.l.bf16 %v5945_v25 }
 0x68a   :  { %v927_v28 = vsel %vm262_vm3, %v768_v16, %v5947_v26  ;;  %v926_v29 = vsel %vm262_vm3, %v695_v14, %v5946_v27 }
 0x68b   :  { %v928_v30 = vpack.c.bf16 %v927_v28, %v926_v29  ;;  %v1048_v28 = vrot.slane %v6469_v49, %v6672_v24 }
 0x68d   :  { %5776 = vmatmul.mubr.msk.bf16.vlgmr.msra.gmra.mrb[8].mxu0 %vm111_vm1, %v928_v30 }
 0x68e   :  { %1147 = vmatprep.mubr.bf16.mxu0 %v6278_v34  ;;  %1116 = vmatpush1.bf16.msra.mxu0 %v5979_v57 }
 0x68f   :  { %1117 = vmatprep.subr.bf16.mxu0 %v5984_v58 }
 0x692   :  { %1118 = vmatpush1.bf16.msra.mxu0 %v5982_v59 }
 0x693   :  { %1119 = vmatprep.subr.bf16.mxu0 %v5987_v60 }
 0x696   :  { %1120 = vmatpush1.bf16.msra.mxu0 %v5985_v62  ;;  %v6702_v62 = vsub.s32 5, %v6461_v46 }
 0x697   :  { %1121 = vmatprep.subr.bf16.mxu0 %v5990_v2 }
 0x698   :  { %v1199_v2 = vrot.slane %v6469_v49, %v6702_v62 }
 0x69a   :  { %1122 = vmatpush1.bf16.msra.mxu0 %v5988_v0 }
 0x760   :  { %v998_v33 = vpop.f32.mrb[8].mxu0 }
 0x761   :  { %v1005_v35 = vadd.f32 %v998_v33, %v6408_v12  ;;  %v5777_v36 = vpop.f32.mrb[9].mxu0 }
 0x762   :  { %v1001_v37 = vpop.f32.mrb[10].mxu0  ;;  %v6003_v36 = vld [vmem:[%s7528_s13 + $0x70] sm:$0xff]  }
 0x763   :  { %v6596_v38 = vadd.f32 %v1010_v32, %v1005_v35  ;;  %v1006_v39 = vadd.f32 %v1001_v37, %v6428_v18  ;;  %v5778_v40 = vpop.f32.mrb[11].mxu0  ;;  %v6002_v35 = vld [vmem:[%s7528_s13 + $0x28] sm:$0xff]   ;;  %v6004_v37 = vld [vmem:[%s7528_s13 + $0x30] sm:$0xff]  }
 0x764   :  { %5587 = vmatpush3.bf16.msra.mxu1 %v6002_v35  ;;  %v6006_v40 = vld [vmem:[%s7528_s13 + $0x38] sm:$0xff]  }
 0x765   :  { %v6599_v41 = vadd.f32 %v1010_v32, %v1006_v39  ;;  %v1013_v42 = vsel %vm111_vm1, %v6596_v38, 0.0  ;;  %5588 = vmatprep.subr.bf16.mxu1 %v6003_v36  ;;  %v6005_v39 = vld [vmem:[%s7528_s13 + $0x78] sm:$0xff]  }
 0x766   :  { %1014 = vadd.xlane.f32.xlu1 %v1013_v42  ;;  %v1060_v42 = vld [vmem:[%s7529_s22] sm:$0x3] }
 0x767   :  { %v1016_v43 = vsel %vm111_vm1, %v6599_v41, 0.0 }
 0x768   :  { %1017 = vadd.xlane.f32.xlu0 %v1016_v43  ;;  %5589 = vmatpush3.bf16.msra.mxu1 %v6004_v37  ;;  %v1065_v43 = vrot.slane %v1060_v42, %v6464_v47 }
 0x769   :  { %5590 = vmatprep.subr.bf16.mxu1 %v6005_v39  ;;  %v6748_v39 = vld [vmem:[%s7516_s8 + $0x8] sm:$0x3f] }
 0x76c   :  { %5591 = vmatpush3.bf16.msra.mxu1 %v6006_v40  ;;  %v1370_v40 = vrot.slane %v6748_v39, %v6464_v47 }
 0x76d   :  { %5799 = vmatprep.subr.mxu1 %v6279_v61 }
 0x7f3   :  { %v1015_v44 = vpop.xlane.xlu1 %1014 }
 0x7f4   :  { %v1019_v45 = vmul.f32 0.015625, %v1015_v44  ;;  %v1069_v44 = vrot.slane %v1060_v42, %v6474_v52 }
 0x7f5   :  { %v1018_v12 = vpop.xlane.xlu0 %1017 }
 0x7f6   :  { %v1021_v48 = vsub.f32 %v6596_v38, %v1019_v45  ;;  %v1020_v50 = vmul.f32 0.015625, %v1018_v12 }
 0x7f8   :  { %v1022_v51 = vsub.f32 %v6599_v41, %v1020_v50  ;;  %v1023_v18 = vmul.f32 %v1021_v48, %v1021_v48 }
 0x7fa   :  { %v1025_v53 = vsel %vm111_vm1, %v1023_v18, 0.0  ;;  %v1024_v54 = vmul.f32 %v1022_v51, %v1022_v51 }
 0x7fb   :  { %1026 = vadd.xlane.f32.xlu0 %v1025_v53 }
 0x7fc   :  { %v1028_v55 = vsel %vm111_vm1, %v1024_v54, 0.0 }
 0x7ff   :  { %1029 = vadd.xlane.f32.xlu0 %v1028_v55 }
 0x888   :  { %v1027_v13 = vpop.xlane.xlu0 %1026 }
 0x889   :  { %v1031_v14 = vmul.f32 0.015625, %v1027_v13 }
 0x88b   :  { %v1033_v15 = vadd.f32 1e-05, %v1031_v14 }
 0x88c   :  { %v1030_v16 = vpop.xlane.xlu0 %1029 }
 0x88d   :  { %6159 = vrsqrt.f32 %v1033_v15  ;;  %v1032_v17 = vmul.f32 0.015625, %v1030_v16 }
 0x88f   :  { %v1034_v19 = vadd.f32 1e-05, %v1032_v17 }
 0x891   :  { %6161 = vrsqrt.f32 %v1034_v19 }
 0x897   :  { %v6160_v21 = vpop.eup %6159 }
 0x898   :  { %v1037_v23 = vmul.f32 %v6160_v21, %v1021_v48  ;;  %v6009_v21 = vld [vmem:[%s7511_s3 + $0x44] ss:$8 sps:$4 sm:$0xff]  }
 0x899   :  { %1432 = vmatprep.subr.bf16.mxu0 %v6009_v21  ;;  %v5231_v21 = vld [vmem:[%s7510_s2 + $0x38] sm:$0xff] }
 0x89a   :  { %v1043_v26 = vmul.f32 %v1042_v22, %v1037_v23  ;;  %v6012_v23 = vld [vmem:[%s7511_s3 + $0x54] ss:$8 sps:$4 sm:$0xff]  }
 0x89b   :  { %v6162_v25 = vpop.eup %6161 }
 0x89c   :  { %v1038_v27 = vmul.f32 %v6162_v25, %v1022_v51  ;;  %v1049_v30 = vadd.f32 %v1048_v28, %v1043_v26  ;;  %v6010_v25 = vld [vmem:[%s7511_s3 + $0x50] ss:$8 sps:$4 sm:$0xff]   ;;  %v6015_v26 = vld [vmem:[%s7511_s3 + $0x64] ss:$8 sps:$4 sm:$0xff]  }
 0x89e   :  { %v1044_v29 = vmul.f32 %v1042_v22, %v1038_v27  ;;  %v6007_v22 = vld [vmem:[%s7511_s3 + $0x40] ss:$8 sps:$4 sm:$0xff]  }
 0x89f   :  { %v6013_v27 = vld [vmem:[%s7511_s3 + $0x60] ss:$8 sps:$4 sm:$0xff]  }
 0x8a0   :  { %v1050_v32 = vadd.f32 %v1048_v28, %v1044_v29  ;;  %v6016_v28 = vld [vmem:[%s7511_s3 + $0x70] ss:$8 sps:$4 sm:$0xff]   ;;  %v6018_v29 = vld [vmem:[%s7511_s3 + $0x74] ss:$8 sps:$4 sm:$0xff]  }
 0x8a2   :  { %v1051_v33 = vpack.c.bf16 %v1050_v32, %v1049_v30 }
 0x8a4   :  { %5185 = vmatmul.mubr.msk.bf16.vlgmr.msra.gmra.mrb[12].mxu0 %vm111_vm1, %v1051_v33 }
 0x8a5   :  { %1464 = vmatprep.mubr.bf16.mxu0 %v6278_v34  ;;  %1433 = vmatpush1.bf16.msra.mxu0 %v6007_v22 }
 0x8a6   :  { %1434 = vmatprep.subr.bf16.mxu0 %v6012_v23 }
 0x8a9   :  { %1435 = vmatpush1.bf16.msra.mxu0 %v6010_v25 }
 0x8aa   :  { %1436 = vmatprep.subr.bf16.mxu0 %v6015_v26 }
 0x8ad   :  { %1437 = vmatpush1.bf16.msra.mxu0 %v6013_v27 }
 0x8ae   :  { %1438 = vmatprep.subr.bf16.mxu0 %v6018_v29 }
 0x8b1   :  { %1439 = vmatpush1.bf16.msra.mxu0 %v6016_v28 }
 0x8b2   :  { %5779 = vmatprep.subr.mxu0 %v6279_v61 }
 0x977   :  { %v1149_v45 = vpop.f32.mrb[12].mxu0 }
 0x978   :  { %v1150_v12 = vadd.f32 %v1149_v45, %v1065_v43  ;;  %v1151_v48 = vpop.f32.mrb[13].mxu0 }
 0x979   :  { %v1152_v50 = vadd.f32 %v1151_v48, %v1069_v44  ;;  %v1153_v51 = vpop.f32.mrb[14].mxu0  ;;  %v1376_v48 = vrot.slane %v6748_v39, %v6474_v52 }
 0x97a   :  { %v1154_v18 = vadd.f32 %v1153_v51, %v1065_v43  ;;  %v1155_v53 = vpop.f32.mrb[15].mxu0  ;;  %v1158_v55 = vmax.f32 %v1150_v12, 0.0 }
 0x97b   :  { %v1156_v54 = vadd.f32 %v1155_v53, %v1069_v44  ;;  %v1159_v57 = vmax.f32 %v1152_v50, 0.0 }
 0x97c   :  { %v1160_v56 = vmax.f32 %v1154_v18, 0.0 }
 0x97d   :  { %v1161_v58 = vmax.f32 %v1156_v54, 0.0 }
 0x97e   :  { %v1162_v59 = vpack.c.bf16 %v1160_v56, %v1158_v55 }
 0x97f   :  { %v1163_v60 = vpack.c.bf16 %v1161_v58, %v1159_v57 }
 0x981   :  { %1328 = vmatprep.mubr.bf16.mxu1 %v1163_v60 }
 0x982   :  { %1329 = vmatmul.mubr.bf16.vlgmr.msra.gmra.mrb[12].mxu1 %v1162_v59 }
 0x983   :  { %5801 = vmatprep.mubr.msk.f32.mxu1 %vm6280_vm2, %v6279_v61 }
 0xa55   :  { %v5592_v0 = vpop.f32.mrb[12].mxu1 }
 0xa56   :  { %v5593_v1 = vpop.f32.mrb[13].mxu1 }
 0xa57   :  { %v5594_v63 = vadd.f32 %v5593_v1, %v5592_v0  ;;  %v5595_v3 = vpop.f32.mrb[14].mxu1 }
 0xa58   :  { %v5596_v4 = vpop.f32.mrb[15].mxu1 }
 0xa59   :  { %v1331_v5 = vadd.f32 %v5594_v63, %v1199_v2  ;;  %v5597_v6 = vadd.f32 %v5596_v4, %v5595_v3  ;;  %v5228_v3 = vld [vmem:[%s7510_s2 + $0x20] sm:$0xff] }
 0xa5b   :  { %v6707_v7 = vadd.f32 %v1331_v5, %v6596_v38  ;;  %v1334_v8 = vadd.f32 %v5597_v6, %v1199_v2 }
 0xa5d   :  { %v6710_v9 = vadd.f32 %v1334_v8, %v6599_v41  ;;  %v1341_v46 = vsel %vm111_vm1, %v6707_v7, 0.0 }
 0xa5e   :  { %1342 = vadd.xlane.f32.xlu1 %v1341_v46  ;;  %v5229_v46 = vld [vmem:[%s7510_s2 + $0x28] sm:$0xff] }
 0xa5f   :  { %v1344_v49 = vsel %vm111_vm1, %v6710_v9, 0.0 }
 0xa60   :  { %1345 = vadd.xlane.f32.xlu0 %v1344_v49 }
 0xaeb   :  { %v1343_v10 = vpop.xlane.xlu1 %1342 }
 0xaec   :  { %v1347_v11 = vmul.f32 0.015625, %v1343_v10 }
 0xaed   :  { %v1346_v13 = vpop.xlane.xlu0 %1345 }
 0xaee   :  { %v1349_v14 = vsub.f32 %v6707_v7, %v1347_v11  ;;  %v1348_v15 = vmul.f32 0.015625, %v1346_v13 }
 0xaf0   :  { %v1350_v38 = vsub.f32 %v6710_v9, %v1348_v15  ;;  %v1351_v16 = vmul.f32 %v1349_v14, %v1349_v14 }
 0xaf2   :  { %v1353_v41 = vsel %vm111_vm1, %v1351_v16, 0.0  ;;  %v1352_v17 = vmul.f32 %v1350_v38, %v1350_v38 }
 0xaf3   :  { %1354 = vadd.xlane.f32.xlu1 %v1353_v41 }
 0xaf4   :  { %v1356_v19 = vsel %vm111_vm1, %v1352_v17, 0.0 }
 0xaf5   :  { %1357 = vadd.xlane.f32.xlu0 %v1356_v19 }
 0xb80   :  { %v1355_v30 = vpop.xlane.xlu1 %1354 }
 0xb81   :  { %v1359_v32 = vmul.f32 0.015625, %v1355_v30 }
 0xb82   :  { %v1358_v33 = vpop.xlane.xlu0 %1357 }
 0xb83   :  { %v1361_v35 = vadd.f32 1e-05, %v1359_v32  ;;  %v1360_v36 = vmul.f32 0.015625, %v1358_v33 }
 0xb85   :  { %6163 = vrsqrt.f32 %v1361_v35  ;;  %v1362_v37 = vadd.f32 1e-05, %v1360_v36 }
 0xb87   :  { %6165 = vrsqrt.f32 %v1362_v37 }
 0xb8f   :  { %v6164_v42 = vpop.eup %6163 }
 0xb90   :  { %v1365_v43 = vmul.f32 %v6164_v42, %v1349_v14 }
 0xb91   :  { %v6166_v44 = vpop.eup %6165 }
 0xb92   :  { %v1371_v45 = vmul.f32 %v1370_v40, %v1365_v43  ;;  %v1366_v12 = vmul.f32 %v6166_v44, %v1350_v38  ;;  %v5230_v38 = vld [vmem:[%s7510_s2 + $0x30] sm:$0xff] }
 0xb94   :  { %v1372_v50 = vmul.f32 %v1370_v40, %v1366_v12  ;;  %v1377_v51 = vadd.f32 %v1376_v48, %v1371_v45 }
 0xb96   :  { %v1378_v18 = vadd.f32 %v1376_v48, %v1372_v50 }
 0xb98   :  { %v1379_v53 = vpack.c.bf16 %v1378_v18, %v1377_v51 }
 0xb9a   :  { %5219 = vmatmul.mubr.msk.bf16.vlgmr.msra.gmra.mrb[16].mxu0 %vm111_vm1, %v1379_v53 }
 0xb9b   :  { %5781 = vmatprep.mubr.msk.f32.mxu0 %vm6280_vm2, %v6279_v61 }
 0xc6d   :  { %v1466_v54 = vpop.f32.mrb[16].mxu0 }
 0xc6e   :  { %1477 = vrot.lane.b32.xlu1 %v1466_v54, %s6281_s10  ;;  %v6758_v55 = vpop.f32.mrb[17].mxu0 }
 0xc6f   :  { %v1470_v56 = vpop.f32.mrb[18].mxu0  ;;  %5800 = vmatpush3.msra.mxu1 %v6758_v55 }
 0xc70   :  { %1479 = vrot.lane.b32.xlu0 %v1470_v56, %s6281_s10  ;;  %v6762_v57 = vpop.f32.mrb[19].mxu0  ;;  %5809 = vmatprep.subr.mxu1 %v6279_v61 }
 0xc72   :  { %1489 = vrot.lane.b32.xlu1 %v1466_v54, %s6282_s25 }
 0xc76   :  { %1565 = vrot.lane.b32.xlu1 %v1470_v56, %s6282_s25 }
 0xce0   :  { %v1478_v58 = vpop.permute.xlu1 %1477 }
 0xce1   :  { %1641 = vrot.lane.b32.xlu1 %v1478_v58, %s6282_s25 }
 0xce2   :  { %v1480_v59 = vpop.permute.xlu0 %1479 }
 0xce3   :  { %1717 = vrot.lane.b32.xlu0 %v1480_v59, %s6282_s25 }
 0xce4   :  { %v1490_v60 = vpop.permute.xlu1 %1489 }
 0xce5   :  { %5780 = vmatpush3.xpose.msk.msra.mxu0 %vm262_vm3, %v1490_v60 }
 0xce6   :  { %5784 = vmatprep.subr.mxu0 %v6279_v61 }
 0xce8   :  { %5782 = vmatmul.mubr.msk.f32.vlgmr.msra.gmra.mrb[20].mxu0 %vm262_vm3, %v1466_v54  ;;  %v1566_v0 = vpop.permute.xlu1 %1565 }
 0xce9   :  { %5785 = vmatpush3.xpose.msk.msra.mxu0 %vm262_vm3, %v1566_v0  ;;  %5786 = vmatprep.mubr.msk.f32.mxu0 %vm6280_vm2, %v6279_v61 }
 0xcea   :  { %5789 = vmatprep.subr.mxu0 %v6279_v61 }
 0xcec   :  { %5787 = vmatmul.mubr.msk.f32.vlgmr.msra.gmra.mrb[22].mxu0 %vm262_vm3, %v1470_v56 }
 0xced   :  { %5791 = vmatprep.mubr.msk.f32.mxu0 %vm6280_vm2, %v6279_v61 }
 0xd53   :  { %v1642_v2 = vpop.permute.xlu1 %1641 }
 0xd54   :  { %5790 = vmatpush3.xpose.msk.msra.mxu0 %vm262_vm3, %v1642_v2 }
 0xd55   :  { %5794 = vmatprep.subr.mxu0 %v6279_v61  ;;  %v1718_v1 = vpop.permute.xlu0 %1717 }
 0xd57   :  { %5792 = vmatmul.mubr.msk.f32.vlgmr.msra.gmra.mrb[24].mxu0 %vm262_vm3, %v1478_v58 }
 0xd58   :  { %5795 = vmatpush3.xpose.msk.msra.mxu0 %vm262_vm3, %v1718_v1  ;;  %5796 = vmatprep.mubr.msk.f32.mxu0 %vm6280_vm2, %v6279_v61 }
 0xd59   :  { %5804 = vmatprep.subr.mxu0 %v6279_v61 }
 0xd5b   :  { %5797 = vmatmul.mubr.msk.f32.vlgmr.msra.gmra.mrb[26].mxu0 %vm262_vm3, %v1480_v59 }
 0xd5c   :  { %5805 = vmatpush3.msra.mxu0 %v6762_v57  ;;  %5806 = vmatprep.mubr.msk.f32.mxu0 %vm6280_vm2, %v6279_v61 }
 0xd5d   :  { %5814 = vmatprep.subr.mxu0 %v6279_v61 }
 0xdbb   :  { %v1561_v63 = vpop.f32.mrb[20].mxu0 }
 0xdbc   :  { %v1793_v4 = vmul.f32 0.17677669, %v1561_v63  ;;  %v5783_v5 = vpop.f32.mrb[21].mxu0 }
 0xdbe   :  { %v1802_v6 = vadd.f32 %v5228_v3, %v1793_v4 }
 0xdbf   :  { %v1637_v8 = vpop.f32.mrb[22].mxu0 }
 0xdc0   :  { %v1794_v49 = vmul.f32 0.17677669, %v1637_v8  ;;  %v5788_v10 = vpop.f32.mrb[23].mxu0  ;;  %v1806_v11 = vsel %vm577_vm4, %v1802_v6, -inf  ;;  %v6019_v8 = vld [vmem:[%s7512_s4 + $0x20] sm:$0xff]  }
 0xdc1   :  { %1807 = vmax.xlane.f32.xlu1 %v1806_v11 }
 0xdc2   :  { %v1803_v13 = vadd.f32 %v5229_v46, %v1794_v49  ;;  %v6020_v46 = vld [vmem:[%s7512_s4 + $0x28] sm:$0xff]   ;;  %v6021_v49 = vld [vmem:[%s7512_s4 + $0x30] sm:$0xff]  }
 0xdc4   :  { %v1809_v14 = vsel %vm577_vm4, %v1803_v13, -inf }
 0xdc5   :  { %1810 = vmax.xlane.f32.xlu0 %v1809_v14 }
 0xe2a   :  { %v1713_v15 = vpop.f32.mrb[24].mxu0 }
 0xe2b   :  { %v1795_v16 = vmul.f32 0.17677669, %v1713_v15  ;;  %v5793_v41 = vpop.f32.mrb[25].mxu0  ;;  %v6022_v15 = vld [vmem:[%s7512_s4 + $0x38] sm:$0xff]  }
 0xe2d   :  { %v1804_v17 = vadd.f32 %v5230_v38, %v1795_v16 }
 0xe2e   :  { %v1789_v19 = vpop.f32.mrb[26].mxu0 }
 0xe2f   :  { %v1796_v22 = vmul.f32 0.17677669, %v1789_v19  ;;  %v5798_v23 = vpop.f32.mrb[27].mxu0  ;;  %v1812_v25 = vsel %vm577_vm4, %v1804_v17, -inf }
 0xe30   :  { %1813 = vmax.xlane.f32.xlu0 %v1812_v25 }
 0xe31   :  { %v1805_v26 = vadd.f32 %v5231_v21, %v1796_v22 }
 0xe33   :  { %v1815_v27 = vsel %vm577_vm4, %v1805_v26, -inf }
 0xe34   :  { %1816 = vmax.xlane.f32.xlu0 %v1815_v27 }
 0xe4e   :  { %v1808_v28 = vpop.xlane.xlu1 %1807 }
 0xe4f   :  { %v1818_v29 = vsub.f32 %v1802_v6, %v1808_v28  ;;  %v2240_v28 = vrot.slane %v6748_v39, %v6591_v31 }
 0xe51   :  { %v1822_v30 = vmul.f32 1.442695, %v1818_v29 }
 0xe52   :  { %v1811_v32 = vpop.xlane.xlu0 %1810 }
 0xe53   :  { %6167 = vpow2.f32 %v1822_v30  ;;  %v1819_v33 = vsub.f32 %v1803_v13, %v1811_v32 }
 0xe55   :  { %v1824_v35 = vmul.f32 1.442695, %v1819_v33 }
 0xe57   :  { %6169 = vpow2.f32 %v1824_v35 }
 0xe5d   :  { %v6168_v36 = vpop.eup %6167 }
 0xe5e   :  { %v1830_v37 = vsel %vm577_vm4, %v6168_v36, 0.0 }
 0xe5f   :  { %1831 = vadd.xlane.f32.xlu1 %v1830_v37 }
 0xe61   :  { %v6170_v40 = vpop.eup %6169 }
 0xe62   :  { %v1833_v42 = vsel %vm577_vm4, %v6170_v40, 0.0 }
 0xe63   :  { %1834 = vadd.xlane.f32.xlu0 %v1833_v42 }
 0xebd   :  { %v1814_v43 = vpop.xlane.xlu0 %1813 }
 0xebe   :  { %v1820_v44 = vsub.f32 %v1804_v17, %v1814_v43 }
 0xec0   :  { %v1826_v45 = vmul.f32 1.442695, %v1820_v44 }
 0xec1   :  { %v1817_v12 = vpop.xlane.xlu0 %1816 }
 0xec2   :  { %6171 = vpow2.f32 %v1826_v45  ;;  %v1821_v48 = vsub.f32 %v1805_v26, %v1817_v12 }
 0xec4   :  { %v1828_v50 = vmul.f32 1.442695, %v1821_v48 }
 0xec6   :  { %6173 = vpow2.f32 %v1828_v50 }
 0xecc   :  { %v6172_v51 = vpop.eup %6171 }
 0xecd   :  { %v1836_v18 = vsel %vm577_vm4, %v6172_v51, 0.0 }
 0xece   :  { %1837 = vadd.xlane.f32.xlu1 %v1836_v18 }
 0xed0   :  { %v6174_v53 = vpop.eup %6173 }
 0xed1   :  { %v1839_v54 = vsel %vm577_vm4, %v6174_v53, 0.0 }
 0xed2   :  { %1840 = vadd.xlane.f32.xlu0 %v1839_v54  ;;  %v6025_v54 = vld [vmem:[%s7513_s5 + $0x44] ss:$8 sps:$4 sm:$0xff]  }
 0xedf   :  { %1483 = vrot.lane.b32.xlu1 %v6758_v55, %s6281_s10 }
 0xee8   :  { %1485 = vrot.lane.b32.xlu0 %v6762_v57, %s6281_s10 }
 0xeec   :  { %v1832_v56 = vpop.xlane.xlu1 %1831 }
 0xeed   :  { %6175 = vrcp.f32 %v1832_v56  ;;  %v6023_v56 = vld [vmem:[%s7513_s5 + $0x40] ss:$8 sps:$4 sm:$0xff]  }
 0xef0   :  { %v1835_v58 = vpop.xlane.xlu0 %1834 }
 0xef1   :  { %6177 = vrcp.f32 %v1835_v58  ;;  %v6028_v58 = vld [vmem:[%s7513_s5 + $0x54] ss:$8 sps:$4 sm:$0xff]  }
 0xef7   :  { %v6176_v59 = vpop.eup %6175 }
 0xef8   :  { %v1846_v60 = vmul.f32 %v6176_v59, %v6168_v36  ;;  %v6026_v59 = vld [vmem:[%s7513_s5 + $0x50] ss:$8 sps:$4 sm:$0xff]  }
 0xefa   :  { %5232 = vst.msk [vmem:[%s7519_s11 + $0x20] sm:$0xff] %vm577_vm4, %v1846_v60  ;;  %5802 = vmatmul.mubr.msk.f32.vlgmr.msra.gmra.mrb[16].mxu1 %vm577_vm4, %v1846_v60  ;;  %v6031_v60 = vld [vmem:[%s7513_s5 + $0x64] ss:$8 sps:$4 sm:$0xff]  }
 0xefb   :  { %v6178_v0 = vpop.eup %6177  ;;  %5811 = vmatprep.mubr.msk.f32.mxu1 %vm6280_vm2, %v6279_v61 }
 0xefc   :  { %v1847_v55 = vmul.f32 %v6178_v0, %v6170_v40  ;;  %v6029_v0 = vld [vmem:[%s7513_s5 + $0x60] ss:$8 sps:$4 sm:$0xff]  }
 0xefe   :  { %5233 = vst.msk [vmem:[%s7519_s11 + $0x28] sm:$0xff] %vm577_vm4, %v1847_v55  ;;  %5807 = vmatmul.mubr.msk.f32.vlgmr.msra.gmra.mrb[28].mxu0 %vm577_vm4, %v1847_v55  ;;  %v6032_v55 = vld [vmem:[%s7513_s5 + $0x70] ss:$8 sps:$4 sm:$0xff]  }
 0xeff   :  { %5816 = vmatprep.mubr.msk.f32.mxu0 %vm6280_vm2, %v6279_v61 }
 0xf5b   :  { %v1838_v57 = vpop.xlane.xlu1 %1837 }
 0xf5c   :  { %6179 = vrcp.f32 %v1838_v57  ;;  %v6034_v57 = vld [vmem:[%s7513_s5 + $0x74] ss:$8 sps:$4 sm:$0xff]  }
 0xf5f   :  { %v1484_v2 = vpop.permute.xlu1 %1483  ;;  %v1841_v1 = vpop.xlane.xlu0 %1840 }
 0xf60   :  { %6181 = vrcp.f32 %v1841_v1  ;;  %5810 = vmatpush3.msra.mxu1 %v1484_v2  ;;  %v6035_v2 = vld [vmem:[%s7528_s13 + $0xc0] sm:$0xff]  }
 0xf61   :  { %5819 = vmatprep.subr.bf16.mxu1 %v6279_v61  ;;  %v6036_v1 = vld [vmem:[%s7528_s13 + $0x80] sm:$0xff]  }
 0xf63   :  { %v1486_v63 = vpop.permute.xlu0 %1485 }
 0xf64   :  { %5815 = vmatpush3.msra.mxu0 %v1486_v63  ;;  %v6037_v63 = vld [vmem:[%s7528_s13 + $0xc8] sm:$0xff]  }
 0xf65   :  { %2347 = vmatprep.subr.bf16.mxu0 %v6025_v54 }
 0xf66   :  { %v6180_v3 = vpop.eup %6179 }
 0xf67   :  { %v1848_v4 = vmul.f32 %v6180_v3, %v6172_v51  ;;  %v6038_v3 = vld [vmem:[%s7528_s13 + $0x88] sm:$0xff]  }
 0xf69   :  { %5234 = vst.msk [vmem:[%s7519_s11 + $0x30] sm:$0xff] %vm577_vm4, %v1848_v4  ;;  %5812 = vmatmul.mubr.msk.f32.vlgmr.msra.gmra.mrb[18].mxu1 %vm577_vm4, %v1848_v4  ;;  %v6039_v4 = vld [vmem:[%s7528_s13 + $0xd0] sm:$0xff]  }
 0xf6a   :  { %v6182_v5 = vpop.eup %6181  ;;  %5827 = vmatprep.mubr.msk.bf16.mxu1 %vm6280_vm2, %v6279_v61  ;;  %5820 = vmatpush3.bf16.msra.mxu1 %v6019_v8  ;;  %v6042_v8 = vld [vmem:[%s7528_s13 + $0x98] sm:$0xff]  }
 0xf6b   :  { %v1849_v6 = vmul.f32 %v6182_v5, %v6174_v53  ;;  %5821 = vmatprep.subr.bf16.mxu1 %v6279_v61  ;;  %v6040_v5 = vld [vmem:[%s7528_s13 + $0x90] sm:$0xff]  }
 0xf6d   :  { %5235 = vst.msk [vmem:[%s7519_s11 + $0x38] sm:$0xff] %vm577_vm4, %v1849_v6  ;;  %5817 = vmatmul.mubr.msk.f32.vlgmr.msra.gmra.mrb[30].mxu0 %vm577_vm4, %v1849_v6  ;;  %v6041_v6 = vld [vmem:[%s7528_s13 + $0xd8] sm:$0xff]  }
 0xf6e   :  { %2379 = vmatprep.mubr.bf16.mxu0 %v6278_v34  ;;  %5822 = vmatpush3.bf16.msra.mxu1 %v6020_v46  ;;  %v6043_v46 = vld [vmem:[%s7528_s13 + $0xe0] sm:$0xff]  }
 0xf6f   :  { %5823 = vmatprep.subr.bf16.mxu1 %v6279_v61  ;;  %2348 = vmatpush1.bf16.msra.mxu0 %v6023_v56 }
 0xf70   :  { %2349 = vmatprep.subr.bf16.mxu0 %v6028_v58 }
 0xf72   :  { %5824 = vmatpush3.bf16.msra.mxu1 %v6021_v49  ;;  %v6044_v49 = vld [vmem:[%s7528_s13 + $0xa0] sm:$0xff]  }
 0xf73   :  { %5825 = vmatprep.subr.bf16.mxu1 %v6279_v61  ;;  %2350 = vmatpush1.bf16.msra.mxu0 %v6026_v59 }
 0xf74   :  { %2351 = vmatprep.subr.bf16.mxu0 %v6031_v60 }
 0xf76   :  { %5826 = vmatpush3.bf16.msra.mxu1 %v6022_v15 }
 0xf77   :  { %2352 = vmatpush1.bf16.msra.mxu0 %v6029_v0  ;;  %5619 = vmatprep.subr.bf16.mxu1 %v6035_v2 }
 0xf78   :  { %2353 = vmatprep.subr.bf16.mxu0 %v6034_v57 }
 0xf7b   :  { %2354 = vmatpush1.bf16.msra.mxu0 %v6032_v55  ;;  %v2432_v55 = vrot.slane %v6748_v39, %v6702_v62 }
 0xfcd   :  { %v1924_v10 = vpop.f32.mrb[16].mxu1 }
 0xfce   :  { %v5803_v11 = vpop.f32.mrb[17].mxu1 }
 0xfd1   :  { %v1997_v13 = vpop.f32.mrb[28].mxu0 }
 0xfd2   :  { %v5808_v14 = vpop.f32.mrb[29].mxu0 }
0x103c   :  { %v2070_v38 = vpop.f32.mrb[18].mxu1 }
0x103d   :  { %v5813_v16 = vpop.f32.mrb[19].mxu1 }
0x1040   :  { %v2143_v41 = vpop.f32.mrb[30].mxu0 }
0x1041   :  { %v5948_v17 = vpack.i.bf16 %v2143_v41, %v2070_v38  ;;  %v5818_v19 = vpop.f32.mrb[31].mxu0  ;;  %v2272_v41 = vrot.slane %v6748_v39, %v6667_v20 }
0x1043   :  { %5949 = vrot.lane.b32.xlu1 %v5948_v17, %s6283_s0 }
0x10b5   :  { %v5950_v21 = vpop.permute.xlu1 %5949 }
0x10b6   :  { %v5952_v22 = vunpack.i.h.bf16 %v5950_v21  ;;  %v5951_v23 = vunpack.i.l.bf16 %v5950_v21 }
0x10b8   :  { %v2156_v25 = vsel %vm262_vm3, %v1997_v13, %v5952_v22  ;;  %v2155_v26 = vsel %vm262_vm3, %v1924_v10, %v5951_v23  ;;  %v6045_v10 = vld [vmem:[%s7528_s13 + $0xe8] sm:$0xff]  }
0x10b9   :  { %v2157_v27 = vpack.c.bf16 %v2156_v25, %v2155_v26  ;;  %v2278_v25 = vrot.slane %v6748_v39, %v6672_v24 }
0x10bb   :  { %5828 = vmatmul.mubr.msk.bf16.vlgmr.msra.gmra.mrb[20].mxu1 %vm111_vm1, %v2157_v27 }
0x10bc   :  { %5620 = vmatpush3.bf16.msra.mxu1 %v6036_v1 }
0x10bd   :  { %5621 = vmatprep.subr.bf16.mxu1 %v6037_v63 }
0x10c0   :  { %5622 = vmatpush3.bf16.msra.mxu1 %v6038_v3 }
0x10c1   :  { %5623 = vmatprep.subr.bf16.mxu1 %v6039_v4 }
0x10c4   :  { %5624 = vmatpush3.bf16.msra.mxu1 %v6040_v5 }
0x10c5   :  { %5625 = vmatprep.subr.bf16.mxu1 %v6041_v6 }
0x10c8   :  { %5626 = vmatpush3.bf16.msra.mxu1 %v6042_v8 }
0x10c9   :  { %5627 = vmatprep.subr.bf16.mxu1 %v6043_v46 }
0x10cc   :  { %5628 = vmatpush3.bf16.msra.mxu1 %v6044_v49 }
0x10cd   :  { %5629 = vmatprep.subr.bf16.mxu1 %v6045_v10 }
0x118e   :  { %v2228_v29 = vpop.f32.mrb[20].mxu1 }
0x118f   :  { %v2235_v30 = vadd.f32 %v2228_v29, %v6707_v7  ;;  %v5829_v32 = vpop.f32.mrb[21].mxu1 }
0x1190   :  { %v2231_v33 = vpop.f32.mrb[22].mxu1  ;;  %v6047_v32 = vld [vmem:[%s7528_s13 + $0xf0] sm:$0xff]  }
0x1191   :  { %v6865_v35 = vadd.f32 %v2240_v28, %v2235_v30  ;;  %v2236_v36 = vadd.f32 %v2231_v33, %v6710_v9  ;;  %v5830_v37 = vpop.f32.mrb[23].mxu1  ;;  %v6046_v30 = vld [vmem:[%s7528_s13 + $0xa8] sm:$0xff]   ;;  %v6048_v33 = vld [vmem:[%s7528_s13 + $0xb0] sm:$0xff]  }
0x1192   :  { %5630 = vmatpush3.bf16.msra.mxu1 %v6046_v30  ;;  %v6050_v37 = vld [vmem:[%s7528_s13 + $0xb8] sm:$0xff]  }
0x1193   :  { %v6868_v40 = vadd.f32 %v2240_v28, %v2236_v36  ;;  %v2243_v42 = vsel %vm111_vm1, %v6865_v35, 0.0  ;;  %5631 = vmatprep.subr.bf16.mxu1 %v6047_v32  ;;  %v6049_v36 = vld [vmem:[%s7528_s13 + $0xf8] sm:$0xff]  }
0x1194   :  { %2244 = vadd.xlane.f32.xlu1 %v2243_v42  ;;  %v5261_v42 = vld [vmem:[%s7529_s22 + $0x2] sm:$0x3] }
0x1195   :  { %v2246_v43 = vsel %vm111_vm1, %v6868_v40, 0.0 }
0x1196   :  { %2247 = vadd.xlane.f32.xlu0 %v2246_v43  ;;  %5632 = vmatpush3.bf16.msra.mxu1 %v6048_v33  ;;  %v2297_v43 = vrot.slane %v5261_v42, %v6464_v47 }
0x1197   :  { %5633 = vmatprep.subr.bf16.mxu1 %v6049_v36  ;;  %v7008_v36 = vld [vmem:[%s7516_s8 + $0x10] sm:$0x3f] }
0x119a   :  { %5634 = vmatpush3.bf16.msra.mxu1 %v6050_v37  ;;  %v2603_v37 = vrot.slane %v7008_v36, %v6464_v47 }
0x119b   :  { %5851 = vmatprep.subr.mxu1 %v6279_v61 }
0x1221   :  { %v2245_v44 = vpop.xlane.xlu1 %2244 }
0x1222   :  { %v2249_v45 = vmul.f32 0.015625, %v2245_v44  ;;  %v2301_v44 = vrot.slane %v5261_v42, %v6474_v52 }
0x1223   :  { %v2248_v7 = vpop.xlane.xlu0 %2247 }
0x1224   :  { %v2251_v12 = vsub.f32 %v6865_v35, %v2249_v45  ;;  %v2250_v48 = vmul.f32 0.015625, %v2248_v7 }
0x1226   :  { %v2252_v50 = vsub.f32 %v6868_v40, %v2250_v48  ;;  %v2253_v9 = vmul.f32 %v2251_v12, %v2251_v12 }
0x1228   :  { %v2255_v51 = vsel %vm111_vm1, %v2253_v9, 0.0  ;;  %v2254_v18 = vmul.f32 %v2252_v50, %v2252_v50 }
0x1229   :  { %2256 = vadd.xlane.f32.xlu0 %v2255_v51 }
0x122a   :  { %v2258_v53 = vsel %vm111_vm1, %v2254_v18, 0.0 }
0x122b   :  { %2259 = vadd.xlane.f32.xlu1 %v2258_v53 }
0x12b6   :  { %v2257_v11 = vpop.xlane.xlu0 %2256 }
0x12b7   :  { %v2261_v13 = vmul.f32 0.015625, %v2257_v11 }
0x12b8   :  { %v2260_v14 = vpop.xlane.xlu1 %2259 }
0x12b9   :  { %v2263_v15 = vadd.f32 1e-05, %v2261_v13  ;;  %v2262_v38 = vmul.f32 0.015625, %v2260_v14 }
0x12bb   :  { %6183 = vrsqrt.f32 %v2263_v15  ;;  %v2264_v16 = vadd.f32 1e-05, %v2262_v38 }
0x12bd   :  { %6185 = vrsqrt.f32 %v2264_v16 }
0x12c5   :  { %v6184_v17 = vpop.eup %6183 }
0x12c6   :  { %v2267_v19 = vmul.f32 %v6184_v17, %v2251_v12  ;;  %v6051_v17 = vld [vmem:[%s7511_s3 + $0x80] ss:$8 sps:$4 sm:$0xff]  }
0x12c7   :  { %v6186_v21 = vpop.eup %6185 }
0x12c8   :  { %v2273_v22 = vmul.f32 %v2272_v41, %v2267_v19  ;;  %v2268_v23 = vmul.f32 %v6186_v21, %v2252_v50  ;;  %v6056_v19 = vld [vmem:[%s7511_s3 + $0x94] ss:$8 sps:$4 sm:$0xff]   ;;  %v6054_v21 = vld [vmem:[%s7511_s3 + $0x90] ss:$8 sps:$4 sm:$0xff]  }
0x12ca   :  { %v2274_v26 = vmul.f32 %v2272_v41, %v2268_v23  ;;  %v2279_v27 = vadd.f32 %v2278_v25, %v2273_v22  ;;  %v6053_v41 = vld [vmem:[%s7511_s3 + $0x84] ss:$8 sps:$4 sm:$0xff]   ;;  %v6057_v23 = vld [vmem:[%s7511_s3 + $0xa0] ss:$8 sps:$4 sm:$0xff]  }
0x12cb   :  { %2665 = vmatprep.subr.bf16.mxu0 %v6053_v41  ;;  %v6059_v22 = vld [vmem:[%s7511_s3 + $0xa4] ss:$8 sps:$4 sm:$0xff]   ;;  %v5348_v41 = vld [vmem:[%s7510_s2 + $0x58] sm:$0xff] }
0x12cc   :  { %v2280_v28 = vadd.f32 %v2278_v25, %v2274_v26  ;;  %v6060_v25 = vld [vmem:[%s7511_s3 + $0xb0] ss:$8 sps:$4 sm:$0xff]   ;;  %v6062_v26 = vld [vmem:[%s7511_s3 + $0xb4] ss:$8 sps:$4 sm:$0xff]  }
0x12ce   :  { %v2281_v29 = vpack.c.bf16 %v2280_v28, %v2279_v27 }
0x12d0   :  { %5270 = vmatmul.mubr.msk.bf16.vlgmr.msra.gmra.mrb[32].mxu0 %vm111_vm1, %v2281_v29 }
0x12d1   :  { %2697 = vmatprep.mubr.bf16.mxu0 %v6278_v34  ;;  %2666 = vmatpush1.bf16.msra.mxu0 %v6051_v17 }
0x12d2   :  { %2667 = vmatprep.subr.bf16.mxu0 %v6056_v19 }
0x12d5   :  { %2668 = vmatpush1.bf16.msra.mxu0 %v6054_v21 }
0x12d6   :  { %2669 = vmatprep.subr.bf16.mxu0 %v6059_v22 }
0x12d9   :  { %2670 = vmatpush1.bf16.msra.mxu0 %v6057_v23 }
0x12da   :  { %2671 = vmatprep.subr.bf16.mxu0 %v6062_v26 }
0x12dd   :  { %2672 = vmatpush1.bf16.msra.mxu0 %v6060_v25 }
0x12de   :  { %5831 = vmatprep.subr.mxu0 %v6279_v61 }
0x13a3   :  { %v2381_v45 = vpop.f32.mrb[32].mxu0 }
0x13a4   :  { %v2382_v7 = vadd.f32 %v2381_v45, %v2297_v43  ;;  %v2383_v12 = vpop.f32.mrb[33].mxu0 }
0x13a5   :  { %v2384_v48 = vadd.f32 %v2383_v12, %v2301_v44  ;;  %v2385_v50 = vpop.f32.mrb[34].mxu0  ;;  %v2609_v12 = vrot.slane %v7008_v36, %v6474_v52 }
0x13a6   :  { %v2386_v9 = vadd.f32 %v2385_v50, %v2297_v43  ;;  %v2387_v51 = vpop.f32.mrb[35].mxu0  ;;  %v2390_v53 = vmax.f32 %v2382_v7, 0.0 }
0x13a7   :  { %v2388_v18 = vadd.f32 %v2387_v51, %v2301_v44  ;;  %v2391_v56 = vmax.f32 %v2384_v48, 0.0 }
0x13a8   :  { %v2392_v54 = vmax.f32 %v2386_v9, 0.0 }
0x13a9   :  { %v2393_v58 = vmax.f32 %v2388_v18, 0.0 }
0x13aa   :  { %v2394_v59 = vpack.c.bf16 %v2392_v54, %v2390_v53 }
0x13ab   :  { %v2395_v60 = vpack.c.bf16 %v2393_v58, %v2391_v56 }
0x13ad   :  { %2561 = vmatprep.mubr.bf16.mxu1 %v2395_v60 }
0x13ae   :  { %2562 = vmatmul.mubr.bf16.vlgmr.msra.gmra.mrb[24].mxu1 %v2394_v59 }
0x13af   :  { %5853 = vmatprep.mubr.msk.f32.mxu1 %vm6280_vm2, %v6279_v61 }
0x1481   :  { %v5635_v0 = vpop.f32.mrb[24].mxu1 }
0x1482   :  { %v5636_v57 = vpop.f32.mrb[25].mxu1 }
0x1483   :  { %v5637_v2 = vadd.f32 %v5636_v57, %v5635_v0  ;;  %v5638_v1 = vpop.f32.mrb[26].mxu1 }
0x1484   :  { %v5639_v63 = vpop.f32.mrb[27].mxu1 }
0x1485   :  { %v2564_v3 = vadd.f32 %v5637_v2, %v2432_v55  ;;  %v5640_v4 = vadd.f32 %v5639_v63, %v5638_v1  ;;  %v5345_v1 = vld [vmem:[%s7510_s2 + $0x40] sm:$0xff] }
0x1487   :  { %v6967_v5 = vadd.f32 %v2564_v3, %v6865_v35  ;;  %v2567_v6 = vadd.f32 %v5640_v4, %v2432_v55 }
0x1489   :  { %v6970_v8 = vadd.f32 %v2567_v6, %v6868_v40  ;;  %v2574_v46 = vsel %vm111_vm1, %v6967_v5, 0.0 }
0x148a   :  { %2575 = vadd.xlane.f32.xlu0 %v2574_v46  ;;  %v5346_v46 = vld [vmem:[%s7510_s2 + $0x48] sm:$0xff] }
0x148b   :  { %v2577_v39 = vsel %vm111_vm1, %v6970_v8, 0.0 }
0x148c   :  { %2578 = vadd.xlane.f32.xlu1 %v2577_v39 }
0x1517   :  { %v2576_v49 = vpop.xlane.xlu0 %2575 }
0x1518   :  { %v2580_v10 = vmul.f32 0.015625, %v2576_v49 }
0x1519   :  { %v2579_v11 = vpop.xlane.xlu1 %2578 }
0x151a   :  { %v2582_v13 = vsub.f32 %v6967_v5, %v2580_v10  ;;  %v2581_v14 = vmul.f32 0.015625, %v2579_v11 }
0x151c   :  { %v2583_v35 = vsub.f32 %v6970_v8, %v2581_v14  ;;  %v2584_v15 = vmul.f32 %v2582_v13, %v2582_v13 }
0x151e   :  { %v2586_v40 = vsel %vm111_vm1, %v2584_v15, 0.0  ;;  %v2585_v38 = vmul.f32 %v2583_v35, %v2583_v35 }
0x151f   :  { %2587 = vadd.xlane.f32.xlu0 %v2586_v40 }
0x1520   :  { %v2589_v16 = vsel %vm111_vm1, %v2585_v38, 0.0 }
0x1521   :  { %2590 = vadd.xlane.f32.xlu1 %v2589_v16 }
0x15ac   :  { %v2588_v27 = vpop.xlane.xlu0 %2587 }
0x15ad   :  { %v2592_v28 = vmul.f32 0.015625, %v2588_v27 }
0x15ae   :  { %v2591_v29 = vpop.xlane.xlu1 %2590 }
0x15af   :  { %v2594_v30 = vadd.f32 1e-05, %v2592_v28  ;;  %v2593_v32 = vmul.f32 0.015625, %v2591_v29 }
0x15b1   :  { %6187 = vrsqrt.f32 %v2594_v30  ;;  %v2595_v33 = vadd.f32 1e-05, %v2593_v32 }
0x15b3   :  { %6189 = vrsqrt.f32 %v2595_v33 }
0x15bb   :  { %v6188_v42 = vpop.eup %6187 }
0x15bc   :  { %v2598_v43 = vmul.f32 %v6188_v42, %v2582_v13 }
0x15bd   :  { %v6190_v44 = vpop.eup %6189 }
0x15be   :  { %v2604_v45 = vmul.f32 %v2603_v37, %v2598_v43  ;;  %v2599_v7 = vmul.f32 %v6190_v44, %v2583_v35  ;;  %v5347_v35 = vld [vmem:[%s7510_s2 + $0x50] sm:$0xff] }
0x15c0   :  { %v2605_v48 = vmul.f32 %v2603_v37, %v2599_v7  ;;  %v2610_v50 = vadd.f32 %v2609_v12, %v2604_v45 }
0x15c2   :  { %v2611_v9 = vadd.f32 %v2609_v12, %v2605_v48 }
0x15c4   :  { %v2612_v51 = vpack.c.bf16 %v2611_v9, %v2610_v50 }
0x15c6   :  { %5336 = vmatmul.mubr.msk.bf16.vlgmr.msra.gmra.mrb[36].mxu0 %vm111_vm1, %v2612_v51 }
0x15c7   :  { %5833 = vmatprep.mubr.msk.f32.mxu0 %vm6280_vm2, %v6279_v61 }
0x1699   :  { %v2699_v18 = vpop.f32.mrb[36].mxu0 }
0x169a   :  { %2710 = vrot.lane.b32.xlu0 %v2699_v18, %s6281_s10  ;;  %v7018_v53 = vpop.f32.mrb[37].mxu0 }
0x169b   :  { %v2703_v54 = vpop.f32.mrb[38].mxu0  ;;  %5852 = vmatpush3.msra.mxu1 %v7018_v53 }
0x169c   :  { %2712 = vrot.lane.b32.xlu1 %v2703_v54, %s6281_s10  ;;  %v7022_v56 = vpop.f32.mrb[39].mxu0  ;;  %5861 = vmatprep.subr.mxu1 %v6279_v61 }
0x16a0   :  { %2722 = vrot.lane.b32.xlu1 %v2699_v18, %s6282_s25 }
0x16a4   :  { %2798 = vrot.lane.b32.xlu1 %v2703_v54, %s6282_s25 }
0x170c   :  { %v2711_v58 = vpop.permute.xlu0 %2710 }
0x170d   :  { %2874 = vrot.lane.b32.xlu0 %v2711_v58, %s6282_s25 }
0x170e   :  { %v2713_v59 = vpop.permute.xlu1 %2712 }
0x170f   :  { %2950 = vrot.lane.b32.xlu1 %v2713_v59, %s6282_s25 }
0x1712   :  { %v2723_v60 = vpop.permute.xlu1 %2722 }
0x1713   :  { %5832 = vmatpush3.xpose.msk.msra.mxu0 %vm262_vm3, %v2723_v60 }
0x1714   :  { %5836 = vmatprep.subr.mxu0 %v6279_v61 }
0x1716   :  { %5834 = vmatmul.mubr.msk.f32.vlgmr.msra.gmra.mrb[40].mxu0 %vm262_vm3, %v2699_v18  ;;  %v2799_v0 = vpop.permute.xlu1 %2798 }
0x1717   :  { %5837 = vmatpush3.xpose.msk.msra.mxu0 %vm262_vm3, %v2799_v0  ;;  %5838 = vmatprep.mubr.msk.f32.mxu0 %vm6280_vm2, %v6279_v61 }
0x1718   :  { %5841 = vmatprep.subr.mxu0 %v6279_v61 }
0x171a   :  { %5839 = vmatmul.mubr.msk.f32.vlgmr.msra.gmra.mrb[42].mxu0 %vm262_vm3, %v2703_v54 }
0x171b   :  { %5843 = vmatprep.mubr.msk.f32.mxu0 %vm6280_vm2, %v6279_v61 }
0x177f   :  { %v2875_v55 = vpop.permute.xlu0 %2874 }
0x1780   :  { %5842 = vmatpush3.xpose.msk.msra.mxu0 %vm262_vm3, %v2875_v55 }
0x1781   :  { %5846 = vmatprep.subr.mxu0 %v6279_v61  ;;  %v2951_v57 = vpop.permute.xlu1 %2950 }
0x1783   :  { %5844 = vmatmul.mubr.msk.f32.vlgmr.msra.gmra.mrb[44].mxu0 %vm262_vm3, %v2711_v58 }
0x1784   :  { %5847 = vmatpush3.xpose.msk.msra.mxu0 %vm262_vm3, %v2951_v57  ;;  %5848 = vmatprep.mubr.msk.f32.mxu0 %vm6280_vm2, %v6279_v61 }
0x1785   :  { %5856 = vmatprep.subr.mxu0 %v6279_v61 }
0x1787   :  { %5849 = vmatmul.mubr.msk.f32.vlgmr.msra.gmra.mrb[46].mxu0 %vm262_vm3, %v2713_v59 }
0x1788   :  { %5857 = vmatpush3.msra.mxu0 %v7022_v56  ;;  %5858 = vmatprep.mubr.msk.f32.mxu0 %vm6280_vm2, %v6279_v61 }
0x1789   :  { %5866 = vmatprep.subr.mxu0 %v6279_v61 }
0x17e9   :  { %v2794_v2 = vpop.f32.mrb[40].mxu0 }
0x17ea   :  { %v3026_v63 = vmul.f32 0.17677669, %v2794_v2  ;;  %v5835_v3 = vpop.f32.mrb[41].mxu0 }
0x17ec   :  { %v3035_v4 = vadd.f32 %v5345_v1, %v3026_v63 }
0x17ed   :  { %v2870_v6 = vpop.f32.mrb[42].mxu0 }
0x17ee   :  { %v3027_v39 = vmul.f32 0.17677669, %v2870_v6  ;;  %v5840_v49 = vpop.f32.mrb[43].mxu0  ;;  %v3039_v10 = vsel %vm577_vm4, %v3035_v4, -inf  ;;  %v6063_v6 = vld [vmem:[%s7512_s4 + $0x40] sm:$0xff]  }
0x17ef   :  { %3040 = vmax.xlane.f32.xlu0 %v3039_v10 }
0x17f0   :  { %v3036_v11 = vadd.f32 %v5346_v46, %v3027_v39  ;;  %v6064_v46 = vld [vmem:[%s7512_s4 + $0x48] sm:$0xff]   ;;  %v6065_v39 = vld [vmem:[%s7512_s4 + $0x50] sm:$0xff]  }
0x17f2   :  { %v3042_v13 = vsel %vm577_vm4, %v3036_v11, -inf }
0x17f3   :  { %3043 = vmax.xlane.f32.xlu1 %v3042_v13 }
0x1856   :  { %v2946_v14 = vpop.f32.mrb[44].mxu0 }
0x1857   :  { %v3028_v15 = vmul.f32 0.17677669, %v2946_v14  ;;  %v5845_v40 = vpop.f32.mrb[45].mxu0  ;;  %v6066_v14 = vld [vmem:[%s7512_s4 + $0x58] sm:$0xff]  }
0x1859   :  { %v3037_v38 = vadd.f32 %v5347_v35, %v3028_v15 }
0x185a   :  { %v3022_v16 = vpop.f32.mrb[46].mxu0 }
0x185b   :  { %v3029_v17 = vmul.f32 0.17677669, %v3022_v16  ;;  %v5850_v19 = vpop.f32.mrb[47].mxu0  ;;  %v3045_v21 = vsel %vm577_vm4, %v3037_v38, -inf }
0x185c   :  { %3046 = vmax.xlane.f32.xlu0 %v3045_v21 }
0x185d   :  { %v3038_v22 = vadd.f32 %v5348_v41, %v3029_v17 }
0x185f   :  { %v3048_v23 = vsel %vm577_vm4, %v3038_v22, -inf }
0x1860   :  { %3049 = vmax.xlane.f32.xlu0 %v3048_v23 }
0x187c   :  { %v3041_v25 = vpop.xlane.xlu0 %3040 }
0x187d   :  { %v3051_v26 = vsub.f32 %v3035_v4, %v3041_v25  ;;  %v3473_v25 = vrot.slane %v7008_v36, %v6591_v31 }
0x187f   :  { %v3055_v27 = vmul.f32 1.442695, %v3051_v26 }
0x1880   :  { %v3044_v28 = vpop.xlane.xlu1 %3043 }
0x1881   :  { %6191 = vpow2.f32 %v3055_v27  ;;  %v3052_v29 = vsub.f32 %v3036_v11, %v3044_v28 }
0x1883   :  { %v3057_v30 = vmul.f32 1.442695, %v3052_v29 }
0x1885   :  { %6193 = vpow2.f32 %v3057_v30 }
0x188b   :  { %v6192_v32 = vpop.eup %6191 }
0x188c   :  { %v3063_v33 = vsel %vm577_vm4, %v6192_v32, 0.0 }
0x188d   :  { %3064 = vadd.xlane.f32.xlu0 %v3063_v33 }
0x188f   :  { %v6194_v37 = vpop.eup %6193 }
0x1890   :  { %v3066_v42 = vsel %vm577_vm4, %v6194_v37, 0.0 }
0x1891   :  { %3067 = vadd.xlane.f32.xlu1 %v3066_v42 }
0x18e9   :  { %v3047_v43 = vpop.xlane.xlu0 %3046 }
0x18ea   :  { %v3053_v44 = vsub.f32 %v3037_v38, %v3047_v43 }
0x18ec   :  { %v3059_v45 = vmul.f32 1.442695, %v3053_v44 }
0x18ed   :  { %v3050_v7 = vpop.xlane.xlu0 %3049 }
0x18ee   :  { %6195 = vpow2.f32 %v3059_v45  ;;  %v3054_v12 = vsub.f32 %v3038_v22, %v3050_v7 }
0x18f0   :  { %v3061_v48 = vmul.f32 1.442695, %v3054_v12 }
0x18f2   :  { %6197 = vpow2.f32 %v3061_v48 }
0x18f8   :  { %v6196_v50 = vpop.eup %6195 }
0x18f9   :  { %v3069_v9 = vsel %vm577_vm4, %v6196_v50, 0.0 }
0x18fa   :  { %3070 = vadd.xlane.f32.xlu0 %v3069_v9 }
0x18fc   :  { %v6198_v51 = vpop.eup %6197 }
0x18fd   :  { %v3072_v18 = vsel %vm577_vm4, %v6198_v51, 0.0 }
0x18fe   :  { %3073 = vadd.xlane.f32.xlu1 %v3072_v18  ;;  %v6069_v18 = vld [vmem:[%s7513_s5 + $0x84] ss:$8 sps:$4 sm:$0xff]  }
0x190f   :  { %2718 = vrot.lane.b32.xlu1 %v7022_v56, %s6281_s10 }
0x1910   :  { %2716 = vrot.lane.b32.xlu0 %v7018_v53, %s6281_s10 }
0x191a   :  { %v3065_v54 = vpop.xlane.xlu0 %3064 }
0x191b   :  { %6199 = vrcp.f32 %v3065_v54  ;;  %v6067_v54 = vld [vmem:[%s7513_s5 + $0x80] ss:$8 sps:$4 sm:$0xff]  }
0x191e   :  { %v3068_v58 = vpop.xlane.xlu1 %3067 }
0x191f   :  { %6201 = vrcp.f32 %v3068_v58  ;;  %v6072_v58 = vld [vmem:[%s7513_s5 + $0x94] ss:$8 sps:$4 sm:$0xff]  }
0x1925   :  { %v6200_v59 = vpop.eup %6199 }
0x1926   :  { %v3079_v60 = vmul.f32 %v6200_v59, %v6192_v32  ;;  %v6070_v59 = vld [vmem:[%s7513_s5 + $0x90] ss:$8 sps:$4 sm:$0xff]  }
0x1928   :  { %5349 = vst.msk [vmem:[%s7519_s11 + $0x40] sm:$0xff] %vm577_vm4, %v3079_v60  ;;  %5854 = vmatmul.mubr.msk.f32.vlgmr.msra.gmra.mrb[28].mxu1 %vm577_vm4, %v3079_v60  ;;  %v6075_v60 = vld [vmem:[%s7513_s5 + $0xa4] ss:$8 sps:$4 sm:$0xff]  }
0x1929   :  { %v6202_v0 = vpop.eup %6201  ;;  %5863 = vmatprep.mubr.msk.f32.mxu1 %vm6280_vm2, %v6279_v61 }
0x192a   :  { %v3080_v56 = vmul.f32 %v6202_v0, %v6194_v37  ;;  %v6073_v0 = vld [vmem:[%s7513_s5 + $0xa0] ss:$8 sps:$4 sm:$0xff]  }
0x192c   :  { %5350 = vst.msk [vmem:[%s7519_s11 + $0x48] sm:$0xff] %vm577_vm4, %v3080_v56  ;;  %5859 = vmatmul.mubr.msk.f32.vlgmr.msra.gmra.mrb[48].mxu0 %vm577_vm4, %v3080_v56  ;;  %v6076_v56 = vld [vmem:[%s7513_s5 + $0xb0] ss:$8 sps:$4 sm:$0xff]  }
0x192d   :  { %5868 = vmatprep.mubr.msk.f32.mxu0 %vm6280_vm2, %v6279_v61 }
0x1987   :  { %v3071_v53 = vpop.xlane.xlu0 %3070 }
0x1988   :  { %6203 = vrcp.f32 %v3071_v53  ;;  %v6078_v53 = vld [vmem:[%s7513_s5 + $0xb4] ss:$8 sps:$4 sm:$0xff]  }
0x198b   :  { %v3074_v55 = vpop.xlane.xlu1 %3073  ;;  %v2717_v57 = vpop.permute.xlu0 %2716 }
0x198c   :  { %6205 = vrcp.f32 %v3074_v55  ;;  %5862 = vmatpush3.msra.mxu1 %v2717_v57  ;;  %v6079_v55 = vld [vmem:[%s7528_s13 + $0x140] sm:$0xff]  }
0x198d   :  { %5871 = vmatprep.subr.bf16.mxu1 %v6279_v61  ;;  %v6080_v57 = vld [vmem:[%s7528_s13 + $0x100] sm:$0xff]  }
0x198f   :  { %v2719_v2 = vpop.permute.xlu1 %2718 }
0x1990   :  { %5867 = vmatpush3.msra.mxu0 %v2719_v2  ;;  %v6081_v2 = vld [vmem:[%s7528_s13 + $0x148] sm:$0xff]  }
0x1991   :  { %3580 = vmatprep.subr.bf16.mxu0 %v6069_v18 }
0x1992   :  { %v6204_v1 = vpop.eup %6203 }
0x1993   :  { %v3081_v63 = vmul.f32 %v6204_v1, %v6196_v50  ;;  %v6082_v1 = vld [vmem:[%s7528_s13 + $0x108] sm:$0xff]  }
0x1995   :  { %5351 = vst.msk [vmem:[%s7519_s11 + $0x50] sm:$0xff] %vm577_vm4, %v3081_v63  ;;  %5864 = vmatmul.mubr.msk.f32.vlgmr.msra.gmra.mrb[30].mxu1 %vm577_vm4, %v3081_v63  ;;  %v6083_v63 = vld [vmem:[%s7528_s13 + $0x150] sm:$0xff]  }
0x1996   :  { %v6206_v3 = vpop.eup %6205  ;;  %5879 = vmatprep.mubr.msk.bf16.mxu1 %vm6280_vm2, %v6279_v61  ;;  %5872 = vmatpush3.bf16.msra.mxu1 %v6063_v6  ;;  %v6086_v6 = vld [vmem:[%s7528_s13 + $0x118] sm:$0xff]  }
0x1997   :  { %v3082_v4 = vmul.f32 %v6206_v3, %v6198_v51  ;;  %5873 = vmatprep.subr.bf16.mxu1 %v6279_v61  ;;  %v6084_v3 = vld [vmem:[%s7528_s13 + $0x110] sm:$0xff]  }
0x1999   :  { %5352 = vst.msk [vmem:[%s7519_s11 + $0x58] sm:$0xff] %vm577_vm4, %v3082_v4  ;;  %5869 = vmatmul.mubr.msk.f32.vlgmr.msra.gmra.mrb[50].mxu0 %vm577_vm4, %v3082_v4  ;;  %v6085_v4 = vld [vmem:[%s7528_s13 + $0x158] sm:$0xff]  }
0x199a   :  { %3612 = vmatprep.mubr.bf16.mxu0 %v6278_v34  ;;  %5874 = vmatpush3.bf16.msra.mxu1 %v6064_v46  ;;  %v6087_v46 = vld [vmem:[%s7528_s13 + $0x160] sm:$0xff]  }
0x199b   :  { %5875 = vmatprep.subr.bf16.mxu1 %v6279_v61  ;;  %3581 = vmatpush1.bf16.msra.mxu0 %v6067_v54 }
0x199c   :  { %3582 = vmatprep.subr.bf16.mxu0 %v6072_v58 }
0x199e   :  { %5876 = vmatpush3.bf16.msra.mxu1 %v6065_v39  ;;  %v6088_v39 = vld [vmem:[%s7528_s13 + $0x120] sm:$0xff]  }
0x199f   :  { %5877 = vmatprep.subr.bf16.mxu1 %v6279_v61  ;;  %3583 = vmatpush1.bf16.msra.mxu0 %v6070_v59 }
0x19a0   :  { %3584 = vmatprep.subr.bf16.mxu0 %v6075_v60 }
0x19a2   :  { %5878 = vmatpush3.bf16.msra.mxu1 %v6066_v14 }
0x19a3   :  { %3585 = vmatpush1.bf16.msra.mxu0 %v6073_v0  ;;  %5662 = vmatprep.subr.bf16.mxu1 %v6079_v55 }
0x19a4   :  { %3586 = vmatprep.subr.bf16.mxu0 %v6078_v53 }
0x19a7   :  { %3587 = vmatpush1.bf16.msra.mxu0 %v6076_v56  ;;  %v3665_v56 = vrot.slane %v7008_v36, %v6702_v62 }
0x19fb   :  { %v3157_v49 = vpop.f32.mrb[28].mxu1 }
0x19fc   :  { %v5855_v10 = vpop.f32.mrb[29].mxu1 }
0x19ff   :  { %v3230_v11 = vpop.f32.mrb[48].mxu0 }
0x1a00   :  { %v5860_v13 = vpop.f32.mrb[49].mxu0 }
0x1a68   :  { %v3303_v35 = vpop.f32.mrb[30].mxu1 }
0x1a69   :  { %v5865_v15 = vpop.f32.mrb[31].mxu1 }
0x1a6c   :  { %v3376_v40 = vpop.f32.mrb[50].mxu0 }
0x1a6d   :  { %v5953_v38 = vpack.i.bf16 %v3376_v40, %v3303_v35  ;;  %v5870_v16 = vpop.f32.mrb[51].mxu0 }
0x1a6f   :  { %5954 = vrot.lane.b32.xlu1 %v5953_v38, %s6283_s0  ;;  %v3505_v38 = vrot.slane %v7008_v36, %v6667_v20 }
0x1ae1   :  { %v5955_v41 = vpop.permute.xlu1 %5954 }
0x1ae2   :  { %v5957_v17 = vunpack.i.h.bf16 %v5955_v41  ;;  %v5956_v19 = vunpack.i.l.bf16 %v5955_v41 }
0x1ae4   :  { %v3389_v21 = vsel %vm262_vm3, %v3230_v11, %v5957_v17  ;;  %v3388_v22 = vsel %vm262_vm3, %v3157_v49, %v5956_v19  ;;  %v6089_v49 = vld [vmem:[%s7528_s13 + $0x168] sm:$0xff]  }
0x1ae5   :  { %v3390_v23 = vpack.c.bf16 %v3389_v21, %v3388_v22  ;;  %v3511_v21 = vrot.slane %v7008_v36, %v6672_v24 }
0x1ae7   :  { %5880 = vmatmul.mubr.msk.bf16.vlgmr.msra.gmra.mrb[32].mxu1 %vm111_vm1, %v3390_v23 }
0x1ae8   :  { %5663 = vmatpush3.bf16.msra.mxu1 %v6080_v57 }
0x1ae9   :  { %5664 = vmatprep.subr.bf16.mxu1 %v6081_v2 }
0x1aec   :  { %5665 = vmatpush3.bf16.msra.mxu1 %v6082_v1 }
0x1aed   :  { %5666 = vmatprep.subr.bf16.mxu1 %v6083_v63 }
0x1af0   :  { %5667 = vmatpush3.bf16.msra.mxu1 %v6084_v3 }
0x1af1   :  { %5668 = vmatprep.subr.bf16.mxu1 %v6085_v4 }
0x1af4   :  { %5669 = vmatpush3.bf16.msra.mxu1 %v6086_v6 }
0x1af5   :  { %5670 = vmatprep.subr.bf16.mxu1 %v6087_v46 }
0x1af8   :  { %5671 = vmatpush3.bf16.msra.mxu1 %v6088_v39 }
0x1af9   :  { %5672 = vmatprep.subr.bf16.mxu1 %v6089_v49 }
0x1bba   :  { %v3461_v26 = vpop.f32.mrb[32].mxu1 }
0x1bbb   :  { %v3468_v27 = vadd.f32 %v3461_v26, %v6967_v5  ;;  %v5881_v28 = vpop.f32.mrb[33].mxu1 }
0x1bbc   :  { %v3464_v29 = vpop.f32.mrb[34].mxu1  ;;  %v6091_v28 = vld [vmem:[%s7528_s13 + $0x170] sm:$0xff]  }
0x1bbd   :  { %v7125_v30 = vadd.f32 %v3473_v25, %v3468_v27  ;;  %v3469_v32 = vadd.f32 %v3464_v29, %v6970_v8  ;;  %v5882_v33 = vpop.f32.mrb[35].mxu1  ;;  %v6090_v27 = vld [vmem:[%s7528_s13 + $0x128] sm:$0xff]   ;;  %v6092_v29 = vld [vmem:[%s7528_s13 + $0x130] sm:$0xff]  }
0x1bbe   :  { %5673 = vmatpush3.bf16.msra.mxu1 %v6090_v27  ;;  %v6094_v33 = vld [vmem:[%s7528_s13 + $0x138] sm:$0xff]  }
0x1bbf   :  { %v7128_v37 = vadd.f32 %v3473_v25, %v3469_v32  ;;  %v3476_v42 = vsel %vm111_vm1, %v7125_v30, 0.0  ;;  %5674 = vmatprep.subr.bf16.mxu1 %v6091_v28  ;;  %v6093_v32 = vld [vmem:[%s7528_s13 + $0x178] sm:$0xff]  }
0x1bc0   :  { %3477 = vadd.xlane.f32.xlu1 %v3476_v42  ;;  %v5378_v42 = vld [vmem:[%s7529_s22 + $0x4] sm:$0x3] }
0x1bc1   :  { %v3479_v43 = vsel %vm111_vm1, %v7128_v37, 0.0 }
0x1bc2   :  { %3480 = vadd.xlane.f32.xlu0 %v3479_v43  ;;  %5675 = vmatpush3.bf16.msra.mxu1 %v6092_v29  ;;  %v3530_v43 = vrot.slane %v5378_v42, %v6464_v47 }
0x1bc3   :  { %5676 = vmatprep.subr.bf16.mxu1 %v6093_v32  ;;  %v7268_v32 = vld [vmem:[%s7516_s8 + $0x18] sm:$0x3f] }
0x1bc6   :  { %5677 = vmatpush3.bf16.msra.mxu1 %v6094_v33  ;;  %v3836_v33 = vrot.slane %v7268_v32, %v6464_v47 }
0x1bc7   :  { %5903 = vmatprep.subr.mxu1 %v6279_v61 }
0x1c4d   :  { %v3478_v44 = vpop.xlane.xlu1 %3477 }
0x1c4e   :  { %v3482_v45 = vmul.f32 0.015625, %v3478_v44  ;;  %v3534_v44 = vrot.slane %v5378_v42, %v6474_v52 }
0x1c4f   :  { %v3481_v5 = vpop.xlane.xlu0 %3480 }
0x1c50   :  { %v3484_v7 = vsub.f32 %v7125_v30, %v3482_v45  ;;  %v3483_v12 = vmul.f32 0.015625, %v3481_v5 }
0x1c52   :  { %v3485_v48 = vsub.f32 %v7128_v37, %v3483_v12  ;;  %v3486_v8 = vmul.f32 %v3484_v7, %v3484_v7 }
0x1c54   :  { %v3488_v50 = vsel %vm111_vm1, %v3486_v8, 0.0  ;;  %v3487_v9 = vmul.f32 %v3485_v48, %v3485_v48 }
0x1c55   :  { %3489 = vadd.xlane.f32.xlu0 %v3488_v50 }
0x1c56   :  { %v3491_v51 = vsel %vm111_vm1, %v3487_v9, 0.0 }
0x1c59   :  { %3492 = vadd.xlane.f32.xlu0 %v3491_v51 }
0x1ce2   :  { %v3490_v10 = vpop.xlane.xlu0 %3489 }
0x1ce3   :  { %v3494_v11 = vmul.f32 0.015625, %v3490_v10 }
0x1ce5   :  { %v3496_v13 = vadd.f32 1e-05, %v3494_v11 }
0x1ce6   :  { %v3493_v14 = vpop.xlane.xlu0 %3492 }
0x1ce7   :  { %6207 = vrsqrt.f32 %v3496_v13  ;;  %v3495_v35 = vmul.f32 0.015625, %v3493_v14 }
0x1ce9   :  { %v3497_v15 = vadd.f32 1e-05, %v3495_v35 }
0x1ceb   :  { %6209 = vrsqrt.f32 %v3497_v15 }
0x1cf1   :  { %v6208_v40 = vpop.eup %6207 }
0x1cf2   :  { %v3500_v16 = vmul.f32 %v6208_v40, %v3484_v7  ;;  %v6097_v40 = vld [vmem:[%s7511_s3 + $0xc4] ss:$8 sps:$4 sm:$0xff]  }
0x1cf3   :  { %3898 = vmatprep.subr.bf16.mxu0 %v6097_v40  ;;  %v5465_v40 = vld [vmem:[%s7510_s2 + $0x78] sm:$0xff] }
0x1cf4   :  { %v3506_v17 = vmul.f32 %v3505_v38, %v3500_v16  ;;  %v6100_v16 = vld [vmem:[%s7511_s3 + $0xd4] ss:$8 sps:$4 sm:$0xff]  }
0x1cf5   :  { %v6210_v41 = vpop.eup %6209 }
0x1cf6   :  { %v3501_v19 = vmul.f32 %v6210_v41, %v3485_v48  ;;  %v3512_v23 = vadd.f32 %v3511_v21, %v3506_v17  ;;  %v6098_v41 = vld [vmem:[%s7511_s3 + $0xd0] ss:$8 sps:$4 sm:$0xff]   ;;  %v6103_v17 = vld [vmem:[%s7511_s3 + $0xe4] ss:$8 sps:$4 sm:$0xff]  }
0x1cf8   :  { %v3507_v22 = vmul.f32 %v3505_v38, %v3501_v19  ;;  %v6095_v38 = vld [vmem:[%s7511_s3 + $0xc0] ss:$8 sps:$4 sm:$0xff]  }
0x1cf9   :  { %v6101_v19 = vld [vmem:[%s7511_s3 + $0xe0] ss:$8 sps:$4 sm:$0xff]  }
0x1cfa   :  { %v3513_v25 = vadd.f32 %v3511_v21, %v3507_v22  ;;  %v6104_v21 = vld [vmem:[%s7511_s3 + $0xf0] ss:$8 sps:$4 sm:$0xff]   ;;  %v6106_v22 = vld [vmem:[%s7511_s3 + $0xf4] ss:$8 sps:$4 sm:$0xff]  }
0x1cfc   :  { %v3514_v26 = vpack.c.bf16 %v3513_v25, %v3512_v23 }
0x1cfe   :  { %5387 = vmatmul.mubr.msk.bf16.vlgmr.msra.gmra.mrb[52].mxu0 %vm111_vm1, %v3514_v26 }
0x1cff   :  { %3930 = vmatprep.mubr.bf16.mxu0 %v6278_v34  ;;  %3899 = vmatpush1.bf16.msra.mxu0 %v6095_v38 }
0x1d00   :  { %3900 = vmatprep.subr.bf16.mxu0 %v6100_v16 }
0x1d03   :  { %3901 = vmatpush1.bf16.msra.mxu0 %v6098_v41 }
0x1d04   :  { %3902 = vmatprep.subr.bf16.mxu0 %v6103_v17 }
0x1d07   :  { %3903 = vmatpush1.bf16.msra.mxu0 %v6101_v19 }
0x1d08   :  { %3904 = vmatprep.subr.bf16.mxu0 %v6106_v22 }
0x1d0b   :  { %3905 = vmatpush1.bf16.msra.mxu0 %v6104_v21 }
0x1d0c   :  { %5883 = vmatprep.subr.mxu0 %v6279_v61 }
0x1dd1   :  { %v3614_v45 = vpop.f32.mrb[52].mxu0 }
0x1dd2   :  { %v3615_v5 = vadd.f32 %v3614_v45, %v3530_v43  ;;  %v3616_v7 = vpop.f32.mrb[53].mxu0 }
0x1dd3   :  { %v3617_v12 = vadd.f32 %v3616_v7, %v3534_v44  ;;  %v3618_v48 = vpop.f32.mrb[54].mxu0  ;;  %v3842_v7 = vrot.slane %v7268_v32, %v6474_v52 }
0x1dd4   :  { %v3619_v8 = vadd.f32 %v3618_v48, %v3530_v43  ;;  %v3620_v50 = vpop.f32.mrb[55].mxu0  ;;  %v3623_v51 = vmax.f32 %v3615_v5, 0.0 }
0x1dd5   :  { %v3621_v9 = vadd.f32 %v3620_v50, %v3534_v44  ;;  %v3624_v54 = vmax.f32 %v3617_v12, 0.0 }
0x1dd6   :  { %v3625_v18 = vmax.f32 %v3619_v8, 0.0 }
0x1dd7   :  { %v3626_v58 = vmax.f32 %v3621_v9, 0.0 }
0x1dd8   :  { %v3627_v59 = vpack.c.bf16 %v3625_v18, %v3623_v51 }
0x1dd9   :  { %v3628_v60 = vpack.c.bf16 %v3626_v58, %v3624_v54 }
0x1ddb   :  { %3794 = vmatprep.mubr.bf16.mxu1 %v3628_v60 }
0x1ddc   :  { %3795 = vmatmul.mubr.bf16.vlgmr.msra.gmra.mrb[36].mxu1 %v3627_v59 }
0x1ddd   :  { %5905 = vmatprep.mubr.msk.f32.mxu1 %vm6280_vm2, %v6279_v61 }
0x1eaf   :  { %v5678_v0 = vpop.f32.mrb[36].mxu1 }
0x1eb0   :  { %v5679_v53 = vpop.f32.mrb[37].mxu1 }
0x1eb1   :  { %v5680_v55 = vadd.f32 %v5679_v53, %v5678_v0  ;;  %v5681_v57 = vpop.f32.mrb[38].mxu1 }
0x1eb2   :  { %v5682_v2 = vpop.f32.mrb[39].mxu1 }
0x1eb3   :  { %v3797_v1 = vadd.f32 %v5680_v55, %v3665_v56  ;;  %v5683_v63 = vadd.f32 %v5682_v2, %v5681_v57  ;;  %v5462_v57 = vld [vmem:[%s7510_s2 + $0x60] sm:$0xff] }
0x1eb5   :  { %v7227_v3 = vadd.f32 %v3797_v1, %v7125_v30  ;;  %v3800_v4 = vadd.f32 %v5683_v63, %v3665_v56 }
0x1eb7   :  { %v7230_v6 = vadd.f32 %v3800_v4, %v7128_v37  ;;  %v3807_v46 = vsel %vm111_vm1, %v7227_v3, 0.0 }
0x1eb8   :  { %3808 = vadd.xlane.f32.xlu1 %v3807_v46  ;;  %v5463_v46 = vld [vmem:[%s7510_s2 + $0x68] sm:$0xff] }
0x1eb9   :  { %v3810_v36 = vsel %vm111_vm1, %v7230_v6, 0.0 }
0x1eba   :  { %3811 = vadd.xlane.f32.xlu0 %v3810_v36 }
0x1f45   :  { %v3809_v39 = vpop.xlane.xlu1 %3808 }
0x1f46   :  { %v3813_v49 = vmul.f32 0.015625, %v3809_v39 }
0x1f47   :  { %v3812_v10 = vpop.xlane.xlu0 %3811 }
0x1f48   :  { %v3815_v11 = vsub.f32 %v7227_v3, %v3813_v49  ;;  %v3814_v13 = vmul.f32 0.015625, %v3812_v10 }
0x1f4a   :  { %v3816_v30 = vsub.f32 %v7230_v6, %v3814_v13  ;;  %v3817_v14 = vmul.f32 %v3815_v11, %v3815_v11 }
0x1f4c   :  { %v3819_v37 = vsel %vm111_vm1, %v3817_v14, 0.0  ;;  %v3818_v35 = vmul.f32 %v3816_v30, %v3816_v30 }
0x1f4d   :  { %3820 = vadd.xlane.f32.xlu1 %v3819_v37 }
0x1f4e   :  { %v3822_v15 = vsel %vm111_vm1, %v3818_v35, 0.0 }
0x1f4f   :  { %3823 = vadd.xlane.f32.xlu0 %v3822_v15 }
0x1fda   :  { %v3821_v23 = vpop.xlane.xlu1 %3820 }
0x1fdb   :  { %v3825_v25 = vmul.f32 0.015625, %v3821_v23 }
0x1fdc   :  { %v3824_v26 = vpop.xlane.xlu0 %3823 }
0x1fdd   :  { %v3827_v27 = vadd.f32 1e-05, %v3825_v25  ;;  %v3826_v28 = vmul.f32 0.015625, %v3824_v26 }
0x1fdf   :  { %6211 = vrsqrt.f32 %v3827_v27  ;;  %v3828_v29 = vadd.f32 1e-05, %v3826_v28 }
0x1fe1   :  { %6213 = vrsqrt.f32 %v3828_v29 }
0x1fe9   :  { %v6212_v42 = vpop.eup %6211 }
0x1fea   :  { %v3831_v43 = vmul.f32 %v6212_v42, %v3815_v11 }
0x1feb   :  { %v6214_v44 = vpop.eup %6213 }
0x1fec   :  { %v3837_v45 = vmul.f32 %v3836_v33, %v3831_v43  ;;  %v3832_v5 = vmul.f32 %v6214_v44, %v3816_v30  ;;  %v5464_v30 = vld [vmem:[%s7510_s2 + $0x70] sm:$0xff] }
0x1fee   :  { %v3838_v12 = vmul.f32 %v3836_v33, %v3832_v5  ;;  %v3843_v48 = vadd.f32 %v3842_v7, %v3837_v45 }
0x1ff0   :  { %v3844_v8 = vadd.f32 %v3842_v7, %v3838_v12 }
0x1ff2   :  { %v3845_v50 = vpack.c.bf16 %v3844_v8, %v3843_v48 }
0x1ff4   :  { %5453 = vmatmul.mubr.msk.bf16.vlgmr.msra.gmra.mrb[56].mxu0 %vm111_vm1, %v3845_v50 }
0x1ff5   :  { %5885 = vmatprep.mubr.msk.f32.mxu0 %vm6280_vm2, %v6279_v61 }
0x20c7   :  { %v3932_v9 = vpop.f32.mrb[56].mxu0 }
0x20c8   :  { %3943 = vrot.lane.b32.xlu1 %v3932_v9, %s6281_s10  ;;  %v7278_v51 = vpop.f32.mrb[57].mxu0 }
0x20c9   :  { %v3936_v18 = vpop.f32.mrb[58].mxu0  ;;  %5904 = vmatpush3.msra.mxu1 %v7278_v51 }
0x20ca   :  { %3945 = vrot.lane.b32.xlu0 %v3936_v18, %s6281_s10  ;;  %v7282_v54 = vpop.f32.mrb[59].mxu0  ;;  %5913 = vmatprep.subr.mxu1 %v6279_v61 }
0x20cc   :  { %3955 = vrot.lane.b32.xlu1 %v3932_v9, %s6282_s25 }
0x20d0   :  { %4031 = vrot.lane.b32.xlu1 %v3936_v18, %s6282_s25 }
0x213a   :  { %v3944_v58 = vpop.permute.xlu1 %3943 }
0x213b   :  { %4107 = vrot.lane.b32.xlu1 %v3944_v58, %s6282_s25 }
0x213c   :  { %v3946_v59 = vpop.permute.xlu0 %3945 }
0x213d   :  { %4183 = vrot.lane.b32.xlu0 %v3946_v59, %s6282_s25 }
0x213e   :  { %v3956_v60 = vpop.permute.xlu1 %3955 }
0x213f   :  { %5884 = vmatpush3.xpose.msk.msra.mxu0 %vm262_vm3, %v3956_v60 }
0x2140   :  { %5888 = vmatprep.subr.mxu0 %v6279_v61 }
0x2142   :  { %5886 = vmatmul.mubr.msk.f32.vlgmr.msra.gmra.mrb[60].mxu0 %vm262_vm3, %v3932_v9  ;;  %v4032_v0 = vpop.permute.xlu1 %4031 }
0x2143   :  { %5889 = vmatpush3.xpose.msk.msra.mxu0 %vm262_vm3, %v4032_v0  ;;  %5890 = vmatprep.mubr.msk.f32.mxu0 %vm6280_vm2, %v6279_v61 }
0x2144   :  { %5893 = vmatprep.subr.mxu0 %v6279_v61 }
0x2146   :  { %5891 = vmatmul.mubr.msk.f32.vlgmr.msra.gmra.mrb[62].mxu0 %vm262_vm3, %v3936_v18 }
0x2147   :  { %5895 = vmatprep.mubr.msk.f32.mxu0 %vm6280_vm2, %v6279_v61 }
0x21ad   :  { %v4108_v56 = vpop.permute.xlu1 %4107 }
0x21ae   :  { %5894 = vmatpush3.xpose.msk.msra.mxu0 %vm262_vm3, %v4108_v56 }
0x21af   :  { %5898 = vmatprep.subr.mxu0 %v6279_v61  ;;  %v4184_v53 = vpop.permute.xlu0 %4183 }
0x21b1   :  { %5896 = vmatmul.mubr.msk.f32.vlgmr.msra.gmra.mrb[64].mxu0 %vm262_vm3, %v3944_v58 }
0x21b2   :  { %5899 = vmatpush3.xpose.msk.msra.mxu0 %vm262_vm3, %v4184_v53  ;;  %5900 = vmatprep.mubr.msk.f32.mxu0 %vm6280_vm2, %v6279_v61 }
0x21b3   :  { %5908 = vmatprep.subr.mxu0 %v6279_v61 }
0x21b5   :  { %5901 = vmatmul.mubr.msk.f32.vlgmr.msra.gmra.mrb[66].mxu0 %vm262_vm3, %v3946_v59 }
0x21b6   :  { %5909 = vmatpush3.msra.mxu0 %v7282_v54  ;;  %5910 = vmatprep.mubr.msk.f32.mxu0 %vm6280_vm2, %v6279_v61 }
0x21b7   :  { %5918 = vmatprep.subr.mxu0 %v6279_v61 }
0x2215   :  { %v4027_v55 = vpop.f32.mrb[60].mxu0 }
0x2216   :  { %v4259_v2 = vmul.f32 0.17677669, %v4027_v55  ;;  %v5887_v1 = vpop.f32.mrb[61].mxu0 }
0x2218   :  { %v4268_v63 = vadd.f32 %v5462_v57, %v4259_v2 }
0x2219   :  { %v4103_v4 = vpop.f32.mrb[62].mxu0 }
0x221a   :  { %v4260_v36 = vmul.f32 0.17677669, %v4103_v4  ;;  %v5892_v39 = vpop.f32.mrb[63].mxu0  ;;  %v4272_v49 = vsel %vm577_vm4, %v4268_v63, -inf  ;;  %v6107_v4 = vld [vmem:[%s7512_s4 + $0x60] sm:$0xff]  }
0x221b   :  { %4273 = vmax.xlane.f32.xlu1 %v4272_v49 }
0x221c   :  { %v4269_v10 = vadd.f32 %v5463_v46, %v4260_v36  ;;  %v6108_v46 = vld [vmem:[%s7512_s4 + $0x68] sm:$0xff]   ;;  %v6109_v36 = vld [vmem:[%s7512_s4 + $0x70] sm:$0xff]  }
0x221e   :  { %v4275_v11 = vsel %vm577_vm4, %v4269_v10, -inf }
0x221f   :  { %4276 = vmax.xlane.f32.xlu0 %v4275_v11  ;;  %v6110_v11 = vld [vmem:[%s7512_s4 + $0x78] sm:$0xff]  }
0x2284   :  { %v4179_v13 = vpop.f32.mrb[64].mxu0 }
0x2285   :  { %v4261_v14 = vmul.f32 0.17677669, %v4179_v13  ;;  %v5897_v37 = vpop.f32.mrb[65].mxu0 }
0x2287   :  { %v4270_v35 = vadd.f32 %v5464_v30, %v4261_v14 }
0x2288   :  { %v4255_v15 = vpop.f32.mrb[66].mxu0 }
0x2289   :  { %v4262_v38 = vmul.f32 0.17677669, %v4255_v15  ;;  %v5902_v16 = vpop.f32.mrb[67].mxu0  ;;  %v4278_v41 = vsel %vm577_vm4, %v4270_v35, -inf }
0x228a   :  { %4279 = vmax.xlane.f32.xlu0 %v4278_v41 }
0x228b   :  { %v4271_v17 = vadd.f32 %v5465_v40, %v4262_v38 }
0x228d   :  { %v4281_v19 = vsel %vm577_vm4, %v4271_v17, -inf }
0x228e   :  { %4282 = vmax.xlane.f32.xlu0 %v4281_v19 }
0x22a8   :  { %v4274_v21 = vpop.xlane.xlu1 %4273 }
0x22a9   :  { %v4284_v22 = vsub.f32 %v4268_v63, %v4274_v21 }
0x22ab   :  { %v4288_v23 = vmul.f32 1.442695, %v4284_v22 }
0x22ac   :  { %v4277_v25 = vpop.xlane.xlu0 %4276 }
0x22ad   :  { %6215 = vpow2.f32 %v4288_v23  ;;  %v4285_v26 = vsub.f32 %v4269_v10, %v4277_v25 }
0x22af   :  { %v4290_v27 = vmul.f32 1.442695, %v4285_v26 }
0x22b1   :  { %6217 = vpow2.f32 %v4290_v27 }
0x22b7   :  { %v6216_v28 = vpop.eup %6215 }
0x22b8   :  { %v4296_v29 = vsel %vm577_vm4, %v6216_v28, 0.0 }
0x22b9   :  { %4297 = vadd.xlane.f32.xlu1 %v4296_v29 }
0x22bb   :  { %v6218_v33 = vpop.eup %6217 }
0x22bc   :  { %v4299_v42 = vsel %vm577_vm4, %v6218_v33, 0.0 }
0x22bd   :  { %4300 = vadd.xlane.f32.xlu0 %v4299_v42 }
0x2317   :  { %v4280_v43 = vpop.xlane.xlu0 %4279 }
0x2318   :  { %v4286_v44 = vsub.f32 %v4270_v35, %v4280_v43 }
0x231a   :  { %v4292_v45 = vmul.f32 1.442695, %v4286_v44 }
0x231b   :  { %v4283_v5 = vpop.xlane.xlu0 %4282 }
0x231c   :  { %6219 = vpow2.f32 %v4292_v45  ;;  %v4287_v7 = vsub.f32 %v4271_v17, %v4283_v5  ;;  %v4706_v17 = vrot.slane %v7268_v32, %v6591_v31 }
0x231e   :  { %v4294_v12 = vmul.f32 1.442695, %v4287_v7 }
0x2320   :  { %6221 = vpow2.f32 %v4294_v12 }
0x2326   :  { %v6220_v48 = vpop.eup %6219 }
0x2327   :  { %v4302_v8 = vsel %vm577_vm4, %v6220_v48, 0.0 }
0x2328   :  { %4303 = vadd.xlane.f32.xlu1 %v4302_v8  ;;  %v6111_v8 = vld [vmem:[%s7513_s5 + $0xc0] ss:$8 sps:$4 sm:$0xff]  }
0x232a   :  { %v6222_v50 = vpop.eup %6221 }
0x232b   :  { %v4305_v9 = vsel %vm577_vm4, %v6222_v50, 0.0 }
0x232c   :  { %4306 = vadd.xlane.f32.xlu0 %v4305_v9  ;;  %v6114_v9 = vld [vmem:[%s7513_s5 + $0xd0] ss:$8 sps:$4 sm:$0xff]  }
0x2339   :  { %3949 = vrot.lane.b32.xlu1 %v7278_v51, %s6281_s10 }
0x2342   :  { %3951 = vrot.lane.b32.xlu0 %v7282_v54, %s6281_s10 }
0x2346   :  { %v4298_v18 = vpop.xlane.xlu1 %4297 }
0x2347   :  { %6223 = vrcp.f32 %v4298_v18  ;;  %v6119_v18 = vld [vmem:[%s7513_s5 + $0xe4] ss:$8 sps:$4 sm:$0xff]  }
0x234a   :  { %v4301_v58 = vpop.xlane.xlu0 %4300 }
0x234b   :  { %6225 = vrcp.f32 %v4301_v58  ;;  %v6117_v58 = vld [vmem:[%s7513_s5 + $0xe0] ss:$8 sps:$4 sm:$0xff]  }
0x2351   :  { %v6224_v59 = vpop.eup %6223 }
0x2352   :  { %v4312_v60 = vmul.f32 %v6224_v59, %v6216_v28  ;;  %v6120_v59 = vld [vmem:[%s7513_s5 + $0xf0] ss:$8 sps:$4 sm:$0xff]  }
0x2354   :  { %5466 = vst.msk [vmem:[%s7519_s11 + $0x60] sm:$0xff] %vm577_vm4, %v4312_v60  ;;  %5906 = vmatmul.mubr.msk.f32.vlgmr.msra.gmra.mrb[40].mxu1 %vm577_vm4, %v4312_v60  ;;  %v6122_v60 = vld [vmem:[%s7513_s5 + $0xf4] ss:$8 sps:$4 sm:$0xff]  }
0x2355   :  { %v6226_v0 = vpop.eup %6225  ;;  %5915 = vmatprep.mubr.msk.f32.mxu1 %vm6280_vm2, %v6279_v61 }
0x2356   :  { %v4313_v51 = vmul.f32 %v6226_v0, %v6218_v33  ;;  %v6123_v0 = vld [vmem:[%s7528_s13 + $0x1c0] sm:$0xff]  }
0x2358   :  { %5467 = vst.msk [vmem:[%s7519_s11 + $0x68] sm:$0xff] %vm577_vm4, %v4313_v51  ;;  %5911 = vmatmul.mubr.msk.f32.vlgmr.msra.gmra.mrb[68].mxu0 %vm577_vm4, %v4313_v51  ;;  %v6124_v51 = vld [vmem:[%s7528_s13 + $0x180] sm:$0xff]  }
0x2359   :  { %5920 = vmatprep.mubr.msk.f32.mxu0 %vm6280_vm2, %v6279_v61 }
0x23b5   :  { %v4304_v54 = vpop.xlane.xlu1 %4303 }
0x23b6   :  { %6227 = vrcp.f32 %v4304_v54  ;;  %v6125_v54 = vld [vmem:[%s7528_s13 + $0x1c8] sm:$0xff]  }
0x23b9   :  { %v3950_v56 = vpop.permute.xlu1 %3949  ;;  %v4307_v53 = vpop.xlane.xlu0 %4306 }
0x23ba   :  { %6229 = vrcp.f32 %v4307_v53  ;;  %5914 = vmatpush3.msra.mxu1 %v3950_v56  ;;  %v6126_v56 = vld [vmem:[%s7528_s13 + $0x188] sm:$0xff]   ;;  %v6127_v53 = vld [vmem:[%s7528_s13 + $0x1d0] sm:$0xff]  }
0x23bb   :  { %5923 = vmatprep.subr.bf16.mxu1 %v6279_v61 }
0x23bd   :  { %v3952_v55 = vpop.permute.xlu0 %3951 }
0x23be   :  { %5919 = vmatpush3.msra.mxu0 %v3952_v55  ;;  %v6128_v55 = vld [vmem:[%s7528_s13 + $0x190] sm:$0xff]  }
0x23c0   :  { %v6228_v57 = vpop.eup %6227 }
0x23c1   :  { %v4314_v2 = vmul.f32 %v6228_v57, %v6220_v48  ;;  %v6113_v48 = vld [vmem:[%s7513_s5 + $0xc4] ss:$8 sps:$4 sm:$0xff]   ;;  %v6129_v57 = vld [vmem:[%s7528_s13 + $0x1d8] sm:$0xff]  }
0x23c2   :  { %4813 = vmatprep.subr.bf16.mxu0 %v6113_v48 }
0x23c3   :  { %5468 = vst.msk [vmem:[%s7519_s11 + $0x70] sm:$0xff] %vm577_vm4, %v4314_v2  ;;  %5916 = vmatmul.mubr.msk.f32.vlgmr.msra.gmra.mrb[42].mxu1 %vm577_vm4, %v4314_v2  ;;  %v6130_v2 = vld [vmem:[%s7528_s13 + $0x198] sm:$0xff]  }
0x23c4   :  { %v6230_v1 = vpop.eup %6229  ;;  %5931 = vmatprep.mubr.msk.bf16.mxu1 %vm6280_vm2, %v6279_v61  ;;  %5924 = vmatpush3.bf16.msra.mxu1 %v6107_v4  ;;  %v6133_v4 = vld [vmem:[%s7528_s13 + $0x1e8] sm:$0xff]  }
0x23c5   :  { %v4315_v63 = vmul.f32 %v6230_v1, %v6222_v50  ;;  %5925 = vmatprep.subr.bf16.mxu1 %v6279_v61  ;;  %v6116_v50 = vld [vmem:[%s7513_s5 + $0xd4] ss:$8 sps:$4 sm:$0xff]   ;;  %v6131_v1 = vld [vmem:[%s7528_s13 + $0x1e0] sm:$0xff]   ;;  %s6284_s5 = smov [#allocation5]  }
0x23c6   :  { %s5108_s21 = sshll.u32 %s6284_s5, 4  ;;  %s5109_s21 = int_to_ptr.vmem [resolvable:$true] %s5108_s21 }
0x23c7   :  { %5469 = vst.msk [vmem:[%s7519_s11 + $0x78] sm:$0xff] %vm577_vm4, %v4315_v63  ;;  %5921 = vmatmul.mubr.msk.f32.vlgmr.msra.gmra.mrb[70].mxu0 %vm577_vm4, %v4315_v63  ;;  %v6132_v63 = vld [vmem:[%s7528_s13 + $0x1a0] sm:$0xff]   ;;  %s6251_s27 = scalar_lea.vmem %s5109_s21, 32  ;;  %p6256_p6 = scmp.lt.s32.totalorder %s5109_s21, %s5109_s21 }
0x23c8   :  { %4845 = vmatprep.mubr.bf16.mxu0 %v6278_v34  ;;  %5926 = vmatpush3.bf16.msra.mxu1 %v6108_v46  ;;  %p6252_p5 = scmp.ne.s32.totalorder %s5109_s21, %s6251_s27  ;;  %p6257_p7 = scmp.lt.s32.totalorder %s6251_s27, %s6251_s27 }
0x23c9   :  { %5927 = vmatprep.subr.bf16.mxu1 %v6279_v61  ;;  %4814 = vmatpush1.bf16.msra.mxu0 %v6111_v8 }
0x23ca   :  { %4815 = vmatprep.subr.bf16.mxu0 %v6116_v50  ;;  %p6258_p8 = por %p6257_p7, %p6256_p6 }
0x23cc   :  { %5928 = vmatpush3.bf16.msra.mxu1 %v6109_v36  ;;  %p6259_p9 = pnand %p6258_p8, %p6252_p5 }
0x23cd   :  { %5929 = vmatprep.subr.bf16.mxu1 %v6279_v61  ;;  %4816 = vmatpush1.bf16.msra.mxu0 %v6114_v9 }
0x23ce   :  { %4817 = vmatprep.subr.bf16.mxu0 %v6119_v18 }
0x23d0   :  { %5930 = vmatpush3.bf16.msra.mxu1 %v6110_v11  ;;  %v4738_v11 = vrot.slane %v7268_v32, %v6667_v20  ;;  %v6135_v20 = vld [vmem:[%s7528_s13 + $0x1f0] sm:$0xff]  }
0x23d1   :  { %4818 = vmatpush1.bf16.msra.mxu0 %v6117_v58  ;;  %5705 = vmatprep.subr.bf16.mxu1 %v6123_v0 }
0x23d2   :  { %4819 = vmatprep.subr.bf16.mxu0 %v6122_v60 }
0x23d5   :  { %4820 = vmatpush1.bf16.msra.mxu0 %v6120_v59 }
0x2427   :  { %v4390_v39 = vpop.f32.mrb[40].mxu1 }
0x2428   :  { %v5907_v34 = vpop.f32.mrb[41].mxu1 }
0x242b   :  { %v4463_v49 = vpop.f32.mrb[68].mxu0 }
0x242c   :  { %v5912_v10 = vpop.f32.mrb[69].mxu0 }
0x2496   :  { %v4536_v13 = vpop.f32.mrb[42].mxu1 }
0x2497   :  { %v5917_v30 = vpop.f32.mrb[43].mxu1 }
0x249a   :  { %v4609_v14 = vpop.f32.mrb[70].mxu0 }
0x249b   :  { %v5958_v37 = vpack.i.bf16 %v4609_v14, %v4536_v13  ;;  %v5922_v35 = vpop.f32.mrb[71].mxu0 }
0x249d   :  { %5959 = vrot.lane.b32.xlu1 %v5958_v37, %s6283_s0 }
0x250f   :  { %v5960_v15 = vpop.permute.xlu1 %5959 }
0x2510   :  { %v5962_v40 = vunpack.i.h.bf16 %v5960_v15  ;;  %v5961_v38 = vunpack.i.l.bf16 %v5960_v15  ;;  %v4744_v15 = vrot.slane %v7268_v32, %v6672_v24  ;;  %v6137_v24 = vld [vmem:[%s7528_s13 + $0x1f8] sm:$0xff]  }
0x2512   :  { %v4622_v16 = vsel %vm262_vm3, %v4463_v49, %v5962_v40  ;;  %v4621_v61 = vsel %vm262_vm3, %v4390_v39, %v5961_v38 }
0x2513   :  { %v4623_v41 = vpack.c.bf16 %v4622_v16, %v4621_v61 }
0x2515   :  { %5932 = vmatmul.mubr.msk.bf16.vlgmr.msra.gmra.mrb[44].mxu1 %vm111_vm1, %v4623_v41  ;;  %v6134_v41 = vld [vmem:[%s7528_s13 + $0x1a8] sm:$0xff]  }
0x2516   :  { %5706 = vmatpush3.bf16.msra.mxu1 %v6124_v51 }
0x2517   :  { %5707 = vmatprep.subr.bf16.mxu1 %v6125_v54 }
0x251a   :  { %5708 = vmatpush3.bf16.msra.mxu1 %v6126_v56 }
0x251b   :  { %5709 = vmatprep.subr.bf16.mxu1 %v6127_v53 }
0x251e   :  { %5710 = vmatpush3.bf16.msra.mxu1 %v6128_v55 }
0x251f   :  { %5711 = vmatprep.subr.bf16.mxu1 %v6129_v57 }
0x2522   :  { %5712 = vmatpush3.bf16.msra.mxu1 %v6130_v2 }
0x2523   :  { %5713 = vmatprep.subr.bf16.mxu1 %v6131_v1 }
0x2526   :  { %5714 = vmatpush3.bf16.msra.mxu1 %v6132_v63 }
0x2527   :  { %5715 = vmatprep.subr.bf16.mxu1 %v6133_v4 }
0x252a   :  { %5716 = vmatpush3.bf16.msra.mxu1 %v6134_v41 }
0x252b   :  { %5717 = vmatprep.subr.bf16.mxu1 %v6135_v20 }
0x25e8   :  { %v4694_v19 = vpop.f32.mrb[44].mxu1 }
0x25e9   :  { %v4701_v21 = vadd.f32 %v4694_v19, %v7227_v3  ;;  %v5933_v22 = vpop.f32.mrb[45].mxu1  ;;  %v6138_v19 = vld [vmem:[%s7528_s13 + $0x1b8] sm:$0xff]  }
0x25ea   :  { %v4697_v23 = vpop.f32.mrb[46].mxu1 }
0x25eb   :  { %v7385_v25 = vadd.f32 %v4706_v17, %v4701_v21  ;;  %v4702_v26 = vadd.f32 %v4697_v23, %v7230_v6  ;;  %v5934_v27 = vpop.f32.mrb[47].mxu1  ;;  %v5495_v21 = vld [vmem:[%s7529_s22 + $0x6] sm:$0x3] }
0x25ec   :  { %v4763_v22 = vrot.slane %v5495_v21, %v6464_v47  ;;  %v4767_v23 = vrot.slane %v5495_v21, %v6474_v52  ;;  %v4898_v47 = vrot.slane %v7268_v32, %v6702_v62 }
0x25ed   :  { %v7388_v28 = vadd.f32 %v4706_v17, %v4702_v26  ;;  %v4709_v29 = vsel %vm111_vm1, %v7385_v25, 0.0  ;;  %v6136_v17 = vld [vmem:[%s7528_s13 + $0x1b0] sm:$0xff]  }
0x25ee   :  { %4710 = vadd.xlane.f32.xlu1 %v4709_v29  ;;  %5718 = vmatpush3.bf16.msra.mxu1 %v6136_v17 }
0x25ef   :  { %v4712_v33 = vsel %vm111_vm1, %v7388_v28, 0.0  ;;  %5719 = vmatprep.subr.bf16.mxu1 %v6137_v24 }
0x25f0   :  { %4713 = vadd.xlane.f32.xlu0 %v4712_v33 }
0x25f2   :  { %5720 = vmatpush3.bf16.msra.mxu1 %v6138_v19 }
0x267b   :  { %v4711_v31 = vpop.xlane.xlu1 %4710 }
0x267c   :  { %v4715_v42 = vmul.f32 0.015625, %v4711_v31 }
0x267d   :  { %v4714_v3 = vpop.xlane.xlu0 %4713 }
0x267e   :  { %v4717_v43 = vsub.f32 %v7385_v25, %v4715_v42  ;;  %v4716_v44 = vmul.f32 0.015625, %v4714_v3 }
0x2680   :  { %v4718_v45 = vsub.f32 %v7388_v28, %v4716_v44  ;;  %v4719_v6 = vmul.f32 %v4717_v43, %v4717_v43 }
0x2682   :  { %v4721_v5 = vsel %vm111_vm1, %v4719_v6, 0.0  ;;  %v4720_v7 = vmul.f32 %v4718_v45, %v4718_v45 }
0x2683   :  { %4722 = vadd.xlane.f32.xlu0 %v4721_v5 }
0x2684   :  { %v4724_v12 = vsel %vm111_vm1, %v4720_v7, 0.0 }
0x2685   :  { %4725 = vadd.xlane.f32.xlu1 %v4724_v12 }
0x2710   :  { %v4723_v46 = vpop.xlane.xlu0 %4722 }
0x2711   :  { %v4727_v36 = vmul.f32 0.015625, %v4723_v46 }
0x2712   :  { %v4726_v39 = vpop.xlane.xlu1 %4725 }
0x2713   :  { %v4729_v34 = vadd.f32 1e-05, %v4727_v36  ;;  %v4728_v49 = vmul.f32 0.015625, %v4726_v39 }
0x2715   :  { %6231 = vrsqrt.f32 %v4729_v34  ;;  %v4730_v10 = vadd.f32 1e-05, %v4728_v49 }
0x2717   :  { %6233 = vrsqrt.f32 %v4730_v10  ;;  %v5553_v10 = vld [vmem:[%s7530_s19] ss:$0 sm:$0xff] }
0x271f   :  { %v6232_v13 = vpop.eup %6231 }
0x2720   :  { %v4733_v30 = vmul.f32 %v6232_v13, %v4717_v43 }
0x2721   :  { %v6234_v14 = vpop.eup %6233 }
0x2722   :  { %v4739_v37 = vmul.f32 %v4738_v11, %v4733_v30  ;;  %v4734_v35 = vmul.f32 %v6234_v14, %v4718_v45  ;;  %v5554_v30 = vld [vmem:[%s7530_s19 + $0x1] ss:$0 sm:$0xff] }
0x2724   :  { %v4740_v40 = vmul.f32 %v4738_v11, %v4734_v35  ;;  %v4745_v38 = vadd.f32 %v4744_v15, %v4739_v37 }
0x2726   :  { %v4746_v16 = vadd.f32 %v4744_v15, %v4740_v40 }
0x2728   :  { %v4747_v61 = vpack.c.bf16 %v4746_v16, %v4745_v38 }
0x272a   :  { %5504 = vmatmul.mubr.msk.bf16.vlgmr.msra.gmra.mrb[72].mxu0 %vm111_vm1, %v4747_v61 }
0x27fd   :  { %v4847_v26 = vpop.f32.mrb[72].mxu0 }
0x27fe   :  { %v4848_v27 = vadd.f32 %v4847_v26, %v4763_v22  ;;  %v4849_v29 = vpop.f32.mrb[73].mxu0 }
0x27ff   :  { %v4850_v33 = vadd.f32 %v4849_v29, %v4767_v23  ;;  %v4851_v31 = vpop.f32.mrb[74].mxu0 }
0x2800   :  { %v4852_v42 = vadd.f32 %v4851_v31, %v4763_v22  ;;  %v4853_v3 = vpop.f32.mrb[75].mxu0  ;;  %v4856_v44 = vmax.f32 %v4848_v27, 0.0 }
0x2801   :  { %v4854_v43 = vadd.f32 %v4853_v3, %v4767_v23  ;;  %v4857_v6 = vmax.f32 %v4850_v33, 0.0 }
0x2802   :  { %v4858_v45 = vmax.f32 %v4852_v42, 0.0 }
0x2803   :  { %v4859_v5 = vmax.f32 %v4854_v43, 0.0 }
0x2804   :  { %v4860_v7 = vpack.c.bf16 %v4858_v45, %v4856_v44 }
0x2805   :  { %v4861_v12 = vpack.c.bf16 %v4859_v5, %v4857_v6 }
0x2807   :  { %5027 = vmatprep.mubr.bf16.mxu1 %v4861_v12 }
0x2808   :  { %5028 = vmatmul.mubr.bf16.vlgmr.msra.gmra.mrb[48].mxu1 %v4860_v7 }
0x28db   :  { %v5721_v48 = vpop.f32.mrb[48].mxu1 }
0x28dc   :  { %v5722_v52 = vpop.f32.mrb[49].mxu1 }
0x28dd   :  { %v5723_v8 = vadd.f32 %v5722_v52, %v5721_v48  ;;  %v5724_v50 = vpop.f32.mrb[50].mxu1 }
0x28de   :  { %v5725_v9 = vpop.f32.mrb[51].mxu1 }
0x28df   :  { %v5030_v18 = vadd.f32 %v5723_v8, %v4898_v47  ;;  %v5726_v58 = vadd.f32 %v5725_v9, %v5724_v50 }
0x28e1   :  { %v5033_v59 = vadd.f32 %v5726_v58, %v4898_v47  ;;  %v5036_v60 = vadd.f32 %v5030_v18, %v7385_v25 }
0x28e3   :  { %v5040_v0 = vsel %vm111_vm1, %v5036_v60, 0.0  ;;  %v5037_v51 = vadd.f32 %v5033_v59, %v7388_v28 }
0x28e4   :  { %5041 = vadd.xlane.f32.xlu0 %v5040_v0 }
0x28e5   :  { %v5043_v54 = vsel %vm111_vm1, %v5037_v51, 0.0 }
0x28e6   :  { %5044 = vadd.xlane.f32.xlu1 %v5043_v54 }
0x2971   :  { %v5042_v56 = vpop.xlane.xlu0 %5041 }
0x2972   :  { %v5046_v53 = vmul.f32 0.015625, %v5042_v56 }
0x2973   :  { %v5045_v62 = vpop.xlane.xlu1 %5044 }
0x2974   :  { %v5048_v32 = vsub.f32 %v5036_v60, %v5046_v53  ;;  %v5047_v55 = vmul.f32 0.015625, %v5045_v62 }
0x2976   :  { %v5049_v57 = vsub.f32 %v5037_v51, %v5047_v55  ;;  %v5050_v2 = vmul.f32 %v5048_v32, %v5048_v32 }
0x2978   :  { %v5052_v1 = vsel %vm111_vm1, %v5050_v2, 0.0  ;;  %v5051_v63 = vmul.f32 %v5049_v57, %v5049_v57 }
0x2979   :  { %5053 = vadd.xlane.f32.xlu0 %v5052_v1 }
0x297a   :  { %v5055_v25 = vsel %vm111_vm1, %v5051_v63, 0.0 }
0x297b   :  { %5056 = vadd.xlane.f32.xlu1 %v5055_v25 }
0x2a06   :  { %v5054_v4 = vpop.xlane.xlu0 %5053 }
0x2a07   :  { %v5058_v28 = vmul.f32 0.015625, %v5054_v4 }
0x2a08   :  { %v5057_v46 = vpop.xlane.xlu1 %5056 }
0x2a09   :  { %v5060_v36 = vadd.f32 1e-05, %v5058_v28  ;;  %v5059_v39 = vmul.f32 0.015625, %v5057_v46 }
0x2a0b   :  { %6235 = vrsqrt.f32 %v5060_v36  ;;  %v5061_v34 = vadd.f32 1e-05, %v5059_v39 }
0x2a0d   :  { %6237 = vrsqrt.f32 %v5061_v34 }
0x2a15   :  { %v6236_v49 = vpop.eup %6235 }
0x2a16   :  { %v5064_v11 = vmul.f32 %v6236_v49, %v5048_v32 }
0x2a17   :  { %v6238_v13 = vpop.eup %6237 }
0x2a18   :  { %v5070_v14 = vmul.f32 %v5553_v10, %v5064_v11  ;;  %v5065_v37 = vmul.f32 %v6238_v13, %v5049_v57 }
0x2a1a   :  { %v5071_v35 = vmul.f32 %v5553_v10, %v5065_v37  ;;  %v5076_v15 = vadd.f32 %v5554_v30, %v5070_v14 }
0x2a1c   :  { %v5077_v40 = vadd.f32 %v5554_v30, %v5071_v35  ;;  %v5078_v38 = vsel %vm111_vm1, %v5076_v15, 0.0 }
0x2a1d   :  { %v5079_v16 = vrot.slane %v5078_v38, 4 }
0x2a1e   :  { %v5085_v61 = vsel %vm111_vm1, %v5077_v40, 0.0 }
0x2a1f   :  { %v5080_v41 = vadd.f32 %v5079_v16, %v5078_v38  ;;  %v5086_v20 = vrot.slane %v5085_v61, 4 }
0x2a21   :  { %v5081_v17 = vrot.slane %v5080_v41, 2  ;;  %v5087_v24 = vadd.f32 %v5086_v20, %v5085_v61 }
0x2a23   :  { %v5082_v19 = vadd.f32 %v5081_v17, %v5080_v41  ;;  %v5088_v21 = vrot.slane %v5087_v24, 2 }
0x2a25   :  { %v5083_v22 = vrot.slane %v5082_v19, 1  ;;  %v5089_v23 = vadd.f32 %v5088_v21, %v5087_v24 }
0x2a27   :  { %v5084_v26 = vadd.f32 %v5083_v22, %v5082_v19  ;;  %v5090_v27 = vrot.slane %v5089_v23, 1 }
0x2a29   :  { %v5091_v29 = vadd.f32 %v5090_v27, %v5089_v23  ;;  %v5093_v33 = vmul.f32 0.125, %v5084_v26 }
0x2a2b   :  { %v5094_v31 = vmul.f32 0.125, %v5091_v29 }
0x2a2d   :  { %v5098_v42 = vsel %vm5097_vm5, %v5094_v31, %v5093_v33 }
0x2a2e   :  { %5101 = vst.msk [vmem:[#allocation5] sm:$0x3] %vm5100_vm6, %v5098_v42 }
0x2a2f   :  { %6262 = shalt.err (!%p6259_p9)
}
0x2a30   :  { %s7531_s4 = sld [smem:[#allocation12_spill]] }
0x2a36   :  { %s6263_s0 = scalar_lea.hbm %s7531_s4, 32 }
0x2a37   :  { %p6264_p10 = scmp.ne.s32.totalorder %s7531_s4, %s6263_s0  ;;  %p6267_p11 = scmp.lt.u32.totalorder %s6263_s0, %s7531_s4 }
0x2a39   :  { %p6269_p12 = pnand %p6267_p11, %p6264_p10 }
0x2a3b   :  { %6272 = shalt.err (!%p6269_p12)
}
0x2a3c   :  { %5111 = dma.vmem_to_hbm [thread:$0]  %s5109_s21, 32, %s7531_s4, [#allocation6]  }
0x2a3d   :  { %6275 = dma.done.wait [#allocation6], 32  }
0x2a3e   :  { %6276 = vsyncadd [#allocation6], 4294967264 }
0x2a3f   :  { %5119 = vsyncpa [#allocation6], 1 }

</bundles_post_ra>
